<compile_context>
chip_gen: v6e
topology: v6e:2x2x1
jax: 0.10.0
libtpu: 0.0.40
codegen_flags: <defaults>
</compile_context>

<pallas_src>
import functools

import jax
import jax.numpy as jnp
from jax.experimental import pallas as pl
from jax.experimental.pallas import tpu as pltpu

BN_EPS = 1e-5
LANES = 128
VMEM_LIMIT = 32 * 1024 * 1024  # safe on every generation (<= scoped default on v6e/v7x)


# ----------------------------------------------------------------------------
# small helpers
# ----------------------------------------------------------------------------
def _round_up(n, m):
    return (n + m - 1) // m * m


def _pad_to(x, shape):
    cfg = [(0, t - s) for s, t in zip(x.shape, shape)]
    return jnp.pad(x, cfg)


def _pick_conv_row_tile(h, w, cin_p, cout_p, budget=8 * 1024 * 1024):
    """Largest row tile th (dividing H) whose double-buffered blocks fit the budget."""
    for th in range(h, 0, -1):
        if h % th:
            continue
        in_bytes = (th + 2) * (w + 2) * cin_p * 2       # bf16 halo input block
        out_bytes = th * w * cout_p * 4                 # f32 pre-BN output block
        acc_bytes = th * w * cout_p * 4                 # f32 accumulator
        if 2 * (in_bytes + out_bytes) + acc_bytes <= budget:
            return th
    return 1


def _pick_row_block(total_rows, lanes, max_bytes=4 * 1024 * 1024):
    """Largest divisor of total_rows (mult. of 8, or full extent) under max_bytes."""
    target = max(1, max_bytes // (lanes * 4))
    best = None
    for r in range(1, total_rows + 1):
        if total_rows % r:
            continue
        if r <= target and (r % 8 == 0 or r == total_rows):
            best = r
    return best if best is not None else total_rows


# ----------------------------------------------------------------------------
# Pallas kernels
# ----------------------------------------------------------------------------
def _conv3x3_kernel(x_ref, w_ref, y_ref, s_ref, ss_ref):
    # x_ref : (th+2, W+2, Cin_p) bf16   spatially padded row tile (halo = 1)
    # w_ref : (9, Cin_p, Cout_p) bf16   resident across the grid (constant block)
    # y_ref : (th*W, Cout_p)     f32    pre-BatchNorm conv output of this tile
    # s_ref, ss_ref : (1, Cout_p) f32   per-tile sum / sum-of-squares (BN partials)
    th = x_ref.shape[0] - 2
    wd = x_ref.shape[1] - 2
    cin_p = x_ref.shape[2]
    cout_p = y_ref.shape[-1]

    x = x_ref[...].astype(jnp.float32)          # load once, slice as 32-bit
    acc = jnp.zeros((th * wd, cout_p), jnp.float32)
    for ki in range(3):
        for kj in range(3):
            xs = x[ki:ki + th, kj:kj + wd, :].reshape(th * wd, cin_p)
            acc = acc + jnp.dot(xs.astype(jnp.bfloat16), w_ref[ki * 3 + kj],
                                preferred_element_type=jnp.float32)

    y_ref[...] = acc
    s_ref[...] = jnp.sum(acc, axis=0, keepdims=True)
    ss_ref[...] = jnp.sum(acc * acc, axis=0, keepdims=True)


def _bn_relu_kernel(y_ref, sc_ref, sh_ref, o_ref):
    # y*scale + shift (folded BN affine), then ReLU.  All f32.
    o_ref[...] = jnp.maximum(y_ref[...] * sc_ref[...] + sh_ref[...], 0.0)


def _bn_relu_linear_kernel(y_ref, sc_ref, sh_ref, wl_ref, bl_ref, act_ref, lin_ref):
    # Last stage: BN+ReLU, then the fused Linear(C, C) on the resident tile.
    act = jnp.maximum(y_ref[...] * sc_ref[...] + sh_ref[...], 0.0)
    act_ref[...] = act
    lin_ref[...] = (
        jnp.dot(act.astype(jnp.bfloat16), wl_ref[...],
                preferred_element_type=jnp.float32) + bl_ref[...])


# ----------------------------------------------------------------------------
# pallas_call wrappers
# ----------------------------------------------------------------------------
def _conv3x3_pre_bn(x_bhwc, w_bf16, row_tile):
    """3x3 'same' conv (no bias) on channel-padded NHWC input.

    Returns pre-BN output as (B*H*W, Cout_p) f32, plus batch mean / biased var.
    """
    b, h, w, cin_p = x_bhwc.shape
    cout_p = w_bf16.shape[-1]
    th = row_tile
    t = h // th

    xpad = jnp.pad(x_bhwc.astype(jnp.bfloat16), ((0, 0), (1, 1), (1, 1), (0, 0)))
    if t == 1:
        xwin = xpad[:, None]                                   # (B,1,H+2,W+2,Cp)
    else:
        xwin = jnp.stack([xpad[:, i * th:i * th + th + 2] for i in range(t)],
                         axis=1)                               # (B,T,th+2,W+2,Cp)

    y, s, ss = pl.pallas_call(
        _conv3x3_kernel,
        grid=(b, t),
        in_specs=[
            pl.BlockSpec((None, None, th + 2, w + 2, cin_p),
                         lambda bi, ti: (bi, ti, 0, 0, 0)),
            pl.BlockSpec((9, cin_p, cout_p), lambda bi, ti: (0, 0, 0)),
        ],
        out_specs=[
            pl.BlockSpec((None, None, th * w, cout_p),
                         lambda bi, ti: (bi, ti, 0, 0)),
            pl.BlockSpec((None, None, 1, cout_p), lambda bi, ti: (bi, ti, 0, 0)),
            pl.BlockSpec((None, None, 1, cout_p), lambda bi, ti: (bi, ti, 0, 0)),
        ],
        out_shape=(
            jax.ShapeDtypeStruct((b, t, th * w, cout_p), jnp.float32),
            jax.ShapeDtypeStruct((b, t, 1, cout_p), jnp.float32),
            jax.ShapeDtypeStruct((b, t, 1, cout_p), jnp.float32),
        ),
        compiler_params=pltpu.CompilerParams(
            dimension_semantics=("parallel", "parallel"),
            vmem_limit_bytes=VMEM_LIMIT),
    )(xwin, w_bf16)

    n = b * h * w
    total = s.sum(axis=(0, 1, 2))
    total_sq = ss.sum(axis=(0, 1, 2))
    mean = total / n
    var = jnp.maximum(total_sq / n - mean * mean, 0.0)   # biased (training-mode BN)
    return y.reshape(b * h * w, cout_p), mean, var


def _bn_affine(mean, var, gamma_p, beta_p):
    inv = jax.lax.rsqrt(var + BN_EPS)
    scale = gamma_p * inv
    shift = beta_p - mean * scale
    return scale.reshape(1, -1), shift.reshape(1, -1)


def _bn_relu(y_flat, scale, shift):
    p, cp = y_flat.shape
    r = _pick_row_block(p, cp)
    return pl.pallas_call(
        _bn_relu_kernel,
        grid=(p // r,),
        in_specs=[
            pl.BlockSpec((r, cp), lambda i: (i, 0)),
            pl.BlockSpec((1, cp), lambda i: (0, 0)),
            pl.BlockSpec((1, cp), lambda i: (0, 0)),
        ],
        out_specs=pl.BlockSpec((r, cp), lambda i: (i, 0)),
        out_shape=jax.ShapeDtypeStruct((p, cp), jnp.float32),
        compiler_params=pltpu.CompilerParams(
            dimension_semantics=("parallel",),
            vmem_limit_bytes=VMEM_LIMIT),
    )(y_flat, scale, shift)


def _bn_relu_linear(y_flat, scale, shift, w_lin_bf16, b_lin):
    p, cp = y_flat.shape
    r = _pick_row_block(p, cp)
    return pl.pallas_call(
        _bn_relu_linear_kernel,
        grid=(p // r,),
        in_specs=[
            pl.BlockSpec((r, cp), lambda i: (i, 0)),
            pl.BlockSpec((1, cp), lambda i: (0, 0)),
            pl.BlockSpec((1, cp), lambda i: (0, 0)),
            pl.BlockSpec((cp, cp), lambda i: (0, 0)),
            pl.BlockSpec((1, cp), lambda i: (0, 0)),
        ],
        out_specs=[
            pl.BlockSpec((r, cp), lambda i: (i, 0)),
            pl.BlockSpec((r, cp), lambda i: (i, 0)),
        ],
        out_shape=(
            jax.ShapeDtypeStruct((p, cp), jnp.float32),
            jax.ShapeDtypeStruct((p, cp), jnp.float32),
        ),
        compiler_params=pltpu.CompilerParams(
            dimension_semantics=("parallel",),
            vmem_limit_bytes=VMEM_LIMIT),
    )(y_flat, scale, shift, w_lin_bf16, b_lin)


# ----------------------------------------------------------------------------
# parameters
# ----------------------------------------------------------------------------
def init_student_params(key, in_channels, stages=3, hidden_dim=100):
    cin_p = _round_up(in_channels, LANES)
    hid_p = _round_up(hidden_dim, LANES)
    params = {"stages": [], "cin_p": cin_p, "hid_p": hid_p}
    for _ in range(stages - 1):
        k1, k2, key = jax.random.split(key, 3)
        w1 = 0.1 * jax.random.normal(k1, (3, 3, in_channels, hidden_dim), jnp.float32)
        w2 = 0.1 * jax.random.normal(k2, (3, 3, hidden_dim, in_channels), jnp.float32)
        stage = {
            # Conv2d(in -> hidden, 3, 1, 1); the conv bias is omitted because
            # training-mode BatchNorm subtracts the batch mean, which cancels a
            # per-channel bias exactly (identical outputs, less work).
            "w1": _pad_to(w1, (3, 3, cin_p, hid_p)).reshape(9, cin_p, hid_p
                                                            ).astype(jnp.bfloat16),
            # gamma/beta padded with ZEROS so padded channels stay exactly 0.
            "g1": _pad_to(jnp.ones((hidden_dim,), jnp.float32), (hid_p,)),
            "be1": jnp.zeros((hid_p,), jnp.float32),
            # ConvTranspose2d(hidden -> in, 3, 1, 1) expressed as the equivalent
            # regular conv (flipped / channel-transposed weights); weights are
            # synthetic so the equivalent HWIO weights are generated directly.
            "w2": _pad_to(w2, (3, 3, hid_p, cin_p)).reshape(9, hid_p, cin_p
                                                            ).astype(jnp.bfloat16),
            "g2": _pad_to(jnp.ones((in_channels,), jnp.float32), (cin_p,)),
            "be2": jnp.zeros((cin_p,), jnp.float32),
        }
        params["stages"].append(stage)
    k3, k4, _ = jax.random.split(key, 3)
    w_out = 0.1 * jax.random.normal(k3, (in_channels, in_channels), jnp.float32)
    b_out = 0.1 * jax.random.normal(k4, (in_channels,), jnp.float32)
    params["w_out"] = _pad_to(w_out, (cin_p, cin_p)).astype(jnp.bfloat16)
    params["b_out"] = _pad_to(b_out.reshape(1, -1), (1, cin_p))
    return params


# ----------------------------------------------------------------------------
# forward pass (mirrors build_student_net.forward)
# ----------------------------------------------------------------------------
def build_student_net_forward(params, x_nchw, mask=None):
    """Returns a list of NCHW f32 tensors: one per stage plus the Linear output."""
    if mask is not None:
        x_nchw = x_nchw * (1.0 - mask)

    b, c, h, w = x_nchw.shape
    cin_p = params["cin_p"]
    hid_p = params["hid_p"]

    # NCHW -> NHWC once; zero-pad channels to a lane-dense multiple of 128.
    x = jnp.transpose(x_nchw, (0, 2, 3, 1))
    x = _pad_to(x, (b, h, w, cin_p))

    th1 = _pick_conv_row_tile(h, w, cin_p, hid_p)
    th2 = _pick_conv_row_tile(h, w, hid_p, cin_p)

    stage_outs = []        # padded (B*H*W, cin_p) f32, one per stage
    lin_out = None
    n_stages = len(params["stages"])
    for si, st in enumerate(params["stages"]):
        # Conv(in -> hidden) + BN + ReLU
        y1, m1, v1 = _conv3x3_pre_bn(x, st["w1"], th1)
        sc1, sh1 = _bn_affine(m1, v1, st["g1"], st["be1"])
        h1 = _bn_relu(y1, sc1, sh1).reshape(b, h, w, hid_p)

        # ConvTranspose(hidden -> in) (== conv, see init) + BN + ReLU
        y2, m2, v2 = _conv3x3_pre_bn(h1, st["w2"], th2)
        sc2, sh2 = _bn_affine(m2, v2, st["g2"], st["be2"])
        if si == n_stages - 1:
            # Fuse the final Linear(C, C) into the last BN+ReLU kernel.
            act, lin_out = _bn_relu_linear(y2, sc2, sh2,
                                           params["w_out"], params["b_out"])
        else:
            act = _bn_relu(y2, sc2, sh2)
            x = act.reshape(b, h, w, cin_p)
        stage_outs.append(act)

    # Slice padded channels back to C and do the NHWC->NCHW transposes once, at
    # the module boundary (no per-stage layout round trips).
    def to_nchw(flat):
        return jnp.transpose(flat.reshape(b, h, w, cin_p)[..., :c], (0, 3, 1, 2))

    out_list = [to_nchw(o) for o in stage_outs]
    out_list.append(to_nchw(lin_out))
    return out_list


# ----------------------------------------------------------------------------
if __name__ == "__main__":
    in_channels = 4
    stages = 3
    student_dim = 32          # hidden_dim (kept small for the demo)
    B, H, W = 2, 16, 16

    key = jax.random.PRNGKey(0)
    kx, kp = jax.random.split(key)
    x = jax.random.normal(kx, (B, in_channels, H, W), jnp.float32)
    params = init_student_params(kp, in_channels, stages, student_dim)

    fwd = jax.jit(functools.partial(build_student_net_forward, params))
    outs = jax.block_until_ready(fwd(x))        # mask=None path

    expected_shape = (B, in_channels, H, W)
    assert len(outs) == stages
    for o in outs:
        assert o.shape == expected_shape, o.shape
        assert o.dtype == jnp.float32
        assert bool(jnp.all(jnp.isfinite(o)))
    print("KERNEL_OK")
</pallas_src>

<mosaic_0001>
module attributes {stable_mosaic.version = 11 : i64} {
  func.func @_conv3x3_kernel(%arg0: i32, %arg1: i32, %arg2: memref<1x1x18x18x128xbf16, #tpu.memory_space<vmem>>, %arg3: memref<9x128x128xbf16, #tpu.memory_space<vmem>>, %arg4: memref<1x1x256x128xf32, #tpu.memory_space<vmem>>, %arg5: memref<1x1x1x128xf32, #tpu.memory_space<vmem>>, %arg6: memref<1x1x1x128xf32, #tpu.memory_space<vmem>>) attributes {dimension_semantics = [#tpu.dimension_semantics<parallel>, #tpu.dimension_semantics<parallel>], iteration_bounds = array<i64: 2, 1>, scalar_prefetch = 0 : i64, scratch_operands = 0 : i64, tpu.core_type = #tpu.core_type<tc>, window_params = [{transform_indices = @transform_0, window_bounds = array<i64: 1, 1, 18, 18, 128>}, {pipeline_mode = #tpu.pipeline_mode<synchronous>, transform_indices = @transform_1, window_bounds = array<i64: 9, 128, 128>}, {transform_indices = @transform_2, window_bounds = array<i64: 1, 1, 256, 128>}, {transform_indices = @transform_3, window_bounds = array<i64: 1, 1, 1, 128>}, {transform_indices = @transform_4, window_bounds = array<i64: 1, 1, 1, 128>}]} {
    %c0 = arith.constant 0 : index
    %c0_0 = arith.constant 0 : index
    %c0_1 = arith.constant 0 : index
    %c0_2 = arith.constant 0 : index
    %c0_3 = arith.constant 0 : index
    %0 = vector.load %arg2[%c0, %c0_0, %c0_1, %c0_2, %c0_3] : memref<1x1x18x18x128xbf16, #tpu.memory_space<vmem>>, vector<1x1x18x18x128xbf16>
    %1 = vector.shape_cast %0 : vector<1x1x18x18x128xbf16> to vector<18x18x128xbf16>
    %2 = arith.extf %1 : vector<18x18x128xbf16> to vector<18x18x128xf32>
    %cst = arith.constant 0.000000e+00 : f32
    %3 = vector.broadcast %cst : f32 to vector<256x128xf32>
    %4 = vector.extract_strided_slice %2 {offsets = [0, 0, 0], sizes = [16, 16, 128], strides = [1, 1, 1]} : vector<18x18x128xf32> to vector<16x16x128xf32>
    %5 = vector.shape_cast %4 : vector<16x16x128xf32> to vector<256x128xf32>
    %6 = arith.truncf %5 : vector<256x128xf32> to vector<256x128xbf16>
    %c0_4 = arith.constant 0 : index
    %c0_5 = arith.constant 0 : index
    %c0_6 = arith.constant 0 : index
    %7 = vector.load %arg3[%c0_4, %c0_5, %c0_6] : memref<9x128x128xbf16, #tpu.memory_space<vmem>>, vector<1x128x128xbf16>
    %8 = vector.shape_cast %7 : vector<1x128x128xbf16> to vector<128x128xbf16>
    %cst_7 = arith.constant dense<0.000000e+00> : vector<256x128xf32>
    %9 = tpu.matmul %6, %8, %cst_7 {dimension_numbers = #tpu.dot_dimension_numbers<[1], [0], [0], [1], [0, 0, 1, 1], [], []>} : vector<256x128xbf16>, vector<128x128xbf16>, vector<256x128xf32> -> vector<256x128xf32>
    %10 = arith.addf %3, %9 : vector<256x128xf32>
    %11 = vector.extract_strided_slice %2 {offsets = [0, 1, 0], sizes = [16, 16, 128], strides = [1, 1, 1]} : vector<18x18x128xf32> to vector<16x16x128xf32>
    %12 = vector.shape_cast %11 : vector<16x16x128xf32> to vector<256x128xf32>
    %13 = arith.truncf %12 : vector<256x128xf32> to vector<256x128xbf16>
    %c1 = arith.constant 1 : index
    %c0_8 = arith.constant 0 : index
    %c0_9 = arith.constant 0 : index
    %14 = vector.load %arg3[%c1, %c0_8, %c0_9] : memref<9x128x128xbf16, #tpu.memory_space<vmem>>, vector<1x128x128xbf16>
    %15 = vector.shape_cast %14 : vector<1x128x128xbf16> to vector<128x128xbf16>
    %cst_10 = arith.constant dense<0.000000e+00> : vector<256x128xf32>
    %16 = tpu.matmul %13, %15, %cst_10 {dimension_numbers = #tpu.dot_dimension_numbers<[1], [0], [0], [1], [0, 0, 1, 1], [], []>} : vector<256x128xbf16>, vector<128x128xbf16>, vector<256x128xf32> -> vector<256x128xf32>
    %17 = arith.addf %10, %16 : vector<256x128xf32>
    %18 = vector.extract_strided_slice %2 {offsets = [0, 2, 0], sizes = [16, 16, 128], strides = [1, 1, 1]} : vector<18x18x128xf32> to vector<16x16x128xf32>
    %19 = vector.shape_cast %18 : vector<16x16x128xf32> to vector<256x128xf32>
    %20 = arith.truncf %19 : vector<256x128xf32> to vector<256x128xbf16>
    %c2 = arith.constant 2 : index
    %c0_11 = arith.constant 0 : index
    %c0_12 = arith.constant 0 : index
    %21 = vector.load %arg3[%c2, %c0_11, %c0_12] : memref<9x128x128xbf16, #tpu.memory_space<vmem>>, vector<1x128x128xbf16>
    %22 = vector.shape_cast %21 : vector<1x128x128xbf16> to vector<128x128xbf16>
    %cst_13 = arith.constant dense<0.000000e+00> : vector<256x128xf32>
    %23 = tpu.matmul %20, %22, %cst_13 {dimension_numbers = #tpu.dot_dimension_numbers<[1], [0], [0], [1], [0, 0, 1, 1], [], []>} : vector<256x128xbf16>, vector<128x128xbf16>, vector<256x128xf32> -> vector<256x128xf32>
    %24 = arith.addf %17, %23 : vector<256x128xf32>
    %25 = vector.extract_strided_slice %2 {offsets = [1, 0, 0], sizes = [16, 16, 128], strides = [1, 1, 1]} : vector<18x18x128xf32> to vector<16x16x128xf32>
    %26 = vector.shape_cast %25 : vector<16x16x128xf32> to vector<256x128xf32>
    %27 = arith.truncf %26 : vector<256x128xf32> to vector<256x128xbf16>
    %c3 = arith.constant 3 : index
    %c0_14 = arith.constant 0 : index
    %c0_15 = arith.constant 0 : index
    %28 = vector.load %arg3[%c3, %c0_14, %c0_15] : memref<9x128x128xbf16, #tpu.memory_space<vmem>>, vector<1x128x128xbf16>
    %29 = vector.shape_cast %28 : vector<1x128x128xbf16> to vector<128x128xbf16>
    %cst_16 = arith.constant dense<0.000000e+00> : vector<256x128xf32>
    %30 = tpu.matmul %27, %29, %cst_16 {dimension_numbers = #tpu.dot_dimension_numbers<[1], [0], [0], [1], [0, 0, 1, 1], [], []>} : vector<256x128xbf16>, vector<128x128xbf16>, vector<256x128xf32> -> vector<256x128xf32>
    %31 = arith.addf %24, %30 : vector<256x128xf32>
    %32 = vector.extract_strided_slice %2 {offsets = [1, 1, 0], sizes = [16, 16, 128], strides = [1, 1, 1]} : vector<18x18x128xf32> to vector<16x16x128xf32>
    %33 = vector.shape_cast %32 : vector<16x16x128xf32> to vector<256x128xf32>
    %34 = arith.truncf %33 : vector<256x128xf32> to vector<256x128xbf16>
    %c4 = arith.constant 4 : index
    %c0_17 = arith.constant 0 : index
    %c0_18 = arith.constant 0 : index
    %35 = vector.load %arg3[%c4, %c0_17, %c0_18] : memref<9x128x128xbf16, #tpu.memory_space<vmem>>, vector<1x128x128xbf16>
    %36 = vector.shape_cast %35 : vector<1x128x128xbf16> to vector<128x128xbf16>
    %cst_19 = arith.constant dense<0.000000e+00> : vector<256x128xf32>
    %37 = tpu.matmul %34, %36, %cst_19 {dimension_numbers = #tpu.dot_dimension_numbers<[1], [0], [0], [1], [0, 0, 1, 1], [], []>} : vector<256x128xbf16>, vector<128x128xbf16>, vector<256x128xf32> -> vector<256x128xf32>
    %38 = arith.addf %31, %37 : vector<256x128xf32>
    %39 = vector.extract_strided_slice %2 {offsets = [1, 2, 0], sizes = [16, 16, 128], strides = [1, 1, 1]} : vector<18x18x128xf32> to vector<16x16x128xf32>
    %40 = vector.shape_cast %39 : vector<16x16x128xf32> to vector<256x128xf32>
    %41 = arith.truncf %40 : vector<256x128xf32> to vector<256x128xbf16>
    %c5 = arith.constant 5 : index
    %c0_20 = arith.constant 0 : index
    %c0_21 = arith.constant 0 : index
    %42 = vector.load %arg3[%c5, %c0_20, %c0_21] : memref<9x128x128xbf16, #tpu.memory_space<vmem>>, vector<1x128x128xbf16>
    %43 = vector.shape_cast %42 : vector<1x128x128xbf16> to vector<128x128xbf16>
    %cst_22 = arith.constant dense<0.000000e+00> : vector<256x128xf32>
    %44 = tpu.matmul %41, %43, %cst_22 {dimension_numbers = #tpu.dot_dimension_numbers<[1], [0], [0], [1], [0, 0, 1, 1], [], []>} : vector<256x128xbf16>, vector<128x128xbf16>, vector<256x128xf32> -> vector<256x128xf32>
    %45 = arith.addf %38, %44 : vector<256x128xf32>
    %46 = vector.extract_strided_slice %2 {offsets = [2, 0, 0], sizes = [16, 16, 128], strides = [1, 1, 1]} : vector<18x18x128xf32> to vector<16x16x128xf32>
    %47 = vector.shape_cast %46 : vector<16x16x128xf32> to vector<256x128xf32>
    %48 = arith.truncf %47 : vector<256x128xf32> to vector<256x128xbf16>
    %c6 = arith.constant 6 : index
    %c0_23 = arith.constant 0 : index
    %c0_24 = arith.constant 0 : index
    %49 = vector.load %arg3[%c6, %c0_23, %c0_24] : memref<9x128x128xbf16, #tpu.memory_space<vmem>>, vector<1x128x128xbf16>
    %50 = vector.shape_cast %49 : vector<1x128x128xbf16> to vector<128x128xbf16>
    %cst_25 = arith.constant dense<0.000000e+00> : vector<256x128xf32>
    %51 = tpu.matmul %48, %50, %cst_25 {dimension_numbers = #tpu.dot_dimension_numbers<[1], [0], [0], [1], [0, 0, 1, 1], [], []>} : vector<256x128xbf16>, vector<128x128xbf16>, vector<256x128xf32> -> vector<256x128xf32>
    %52 = arith.addf %45, %51 : vector<256x128xf32>
    %53 = vector.extract_strided_slice %2 {offsets = [2, 1, 0], sizes = [16, 16, 128], strides = [1, 1, 1]} : vector<18x18x128xf32> to vector<16x16x128xf32>
    %54 = vector.shape_cast %53 : vector<16x16x128xf32> to vector<256x128xf32>
    %55 = arith.truncf %54 : vector<256x128xf32> to vector<256x128xbf16>
    %c7 = arith.constant 7 : index
    %c0_26 = arith.constant 0 : index
    %c0_27 = arith.constant 0 : index
    %56 = vector.load %arg3[%c7, %c0_26, %c0_27] : memref<9x128x128xbf16, #tpu.memory_space<vmem>>, vector<1x128x128xbf16>
    %57 = vector.shape_cast %56 : vector<1x128x128xbf16> to vector<128x128xbf16>
    %cst_28 = arith.constant dense<0.000000e+00> : vector<256x128xf32>
    %58 = tpu.matmul %55, %57, %cst_28 {dimension_numbers = #tpu.dot_dimension_numbers<[1], [0], [0], [1], [0, 0, 1, 1], [], []>} : vector<256x128xbf16>, vector<128x128xbf16>, vector<256x128xf32> -> vector<256x128xf32>
    %59 = arith.addf %52, %58 : vector<256x128xf32>
    %60 = vector.extract_strided_slice %2 {offsets = [2, 2, 0], sizes = [16, 16, 128], strides = [1, 1, 1]} : vector<18x18x128xf32> to vector<16x16x128xf32>
    %61 = vector.shape_cast %60 : vector<16x16x128xf32> to vector<256x128xf32>
    %62 = arith.truncf %61 : vector<256x128xf32> to vector<256x128xbf16>
    %c8 = arith.constant 8 : index
    %c0_29 = arith.constant 0 : index
    %c0_30 = arith.constant 0 : index
    %63 = vector.load %arg3[%c8, %c0_29, %c0_30] : memref<9x128x128xbf16, #tpu.memory_space<vmem>>, vector<1x128x128xbf16>
    %64 = vector.shape_cast %63 : vector<1x128x128xbf16> to vector<128x128xbf16>
    %cst_31 = arith.constant dense<0.000000e+00> : vector<256x128xf32>
    %65 = tpu.matmul %62, %64, %cst_31 {dimension_numbers = #tpu.dot_dimension_numbers<[1], [0], [0], [1], [0, 0, 1, 1], [], []>} : vector<256x128xbf16>, vector<128x128xbf16>, vector<256x128xf32> -> vector<256x128xf32>
    %66 = arith.addf %59, %65 : vector<256x128xf32>
    %c0_32 = arith.constant 0 : index
    %c0_33 = arith.constant 0 : index
    %c0_34 = arith.constant 0 : index
    %c0_35 = arith.constant 0 : index
    %67 = vector.load %arg4[%c0_32, %c0_33, %c0_34, %c0_35] : memref<1x1x256x128xf32, #tpu.memory_space<vmem>>, vector<1x1x256x128xf32>
    %68 = vector.shape_cast %67 : vector<1x1x256x128xf32> to vector<256x128xf32>
    %69 = vector.shape_cast %66 : vector<256x128xf32> to vector<1x1x256x128xf32>
    tpu.vector_store %arg4[%c0_32, %c0_33, %c0_34, %c0_35], %69 {strides = array<i32>} : memref<1x1x256x128xf32, #tpu.memory_space<vmem>>, vector<1x1x256x128xf32>,
    %cst_36 = arith.constant dense<0.000000e+00> : vector<128xf32>
    %70 = vector.multi_reduction <add>, %66, %cst_36 [0] : vector<256x128xf32> to vector<128xf32>
    %71 = vector.shape_cast %70 : vector<128xf32> to vector<1x128xf32>
    %c0_37 = arith.constant 0 : index
    %c0_38 = arith.constant 0 : index
    %c0_39 = arith.constant 0 : index
    %c0_40 = arith.constant 0 : index
    %72 = vector.load %arg5[%c0_37, %c0_38, %c0_39, %c0_40] : memref<1x1x1x128xf32, #tpu.memory_space<vmem>>, vector<1x1x1x128xf32>
    %73 = vector.shape_cast %72 : vector<1x1x1x128xf32> to vector<1x128xf32>
    %74 = vector.shape_cast %71 : vector<1x128xf32> to vector<1x1x1x128xf32>
    tpu.vector_store %arg5[%c0_37, %c0_38, %c0_39, %c0_40], %74 {strides = array<i32>} : memref<1x1x1x128xf32, #tpu.memory_space<vmem>>, vector<1x1x1x128xf32>,
    %75 = arith.mulf %66, %66 : vector<256x128xf32>
    %cst_41 = arith.constant dense<0.000000e+00> : vector<128xf32>
    %76 = vector.multi_reduction <add>, %75, %cst_41 [0] : vector<256x128xf32> to vector<128xf32>
    %77 = vector.shape_cast %76 : vector<128xf32> to vector<1x128xf32>
    %c0_42 = arith.constant 0 : index
    %c0_43 = arith.constant 0 : index
    %c0_44 = arith.constant 0 : index
    %c0_45 = arith.constant 0 : index
    %78 = vector.load %arg6[%c0_42, %c0_43, %c0_44, %c0_45] : memref<1x1x1x128xf32, #tpu.memory_space<vmem>>, vector<1x1x1x128xf32>
    %79 = vector.shape_cast %78 : vector<1x1x1x128xf32> to vector<1x128xf32>
    %80 = vector.shape_cast %77 : vector<1x128xf32> to vector<1x1x1x128xf32>
    tpu.vector_store %arg6[%c0_42, %c0_43, %c0_44, %c0_45], %80 {strides = array<i32>} : memref<1x1x1x128xf32, #tpu.memory_space<vmem>>, vector<1x1x1x128xf32>,
    return
  }
  func.func @transform_0(%arg0: i32, %arg1: i32) -> (i32, i32, i32, i32, i32) {
    %c0_i32 = arith.constant 0 : i32
    %c0_i32_0 = arith.constant 0 : i32
    %c0_i32_1 = arith.constant 0 : i32
    %c0_i32_2 = arith.constant 0 : i32
    return %arg0, %arg1, %c0_i32, %c0_i32_0, %c0_i32_1 : i32, i32, i32, i32, i32
  }
  func.func @transform_1(%arg0: i32, %arg1: i32) -> (i32, i32, i32) {
    %c0_i32 = arith.constant 0 : i32
    %c0_i32_0 = arith.constant 0 : i32
    %c0_i32_1 = arith.constant 0 : i32
    %c0_i32_2 = arith.constant 0 : i32
    return %c0_i32, %c0_i32_0, %c0_i32_1 : i32, i32, i32
  }
  func.func @transform_2(%arg0: i32, %arg1: i32) -> (i32, i32, i32, i32) {
    %c0_i32 = arith.constant 0 : i32
    %c0_i32_0 = arith.constant 0 : i32
    %c0_i32_1 = arith.constant 0 : i32
    return %arg0, %arg1, %c0_i32, %c0_i32_0 : i32, i32, i32, i32
  }
  func.func @transform_3(%arg0: i32, %arg1: i32) -> (i32, i32, i32, i32) {
    %c0_i32 = arith.constant 0 : i32
    %c0_i32_0 = arith.constant 0 : i32
    %c0_i32_1 = arith.constant 0 : i32
    return %arg0, %arg1, %c0_i32, %c0_i32_0 : i32, i32, i32, i32
  }
  func.func @transform_4(%arg0: i32, %arg1: i32) -> (i32, i32, i32, i32) {
    %c0_i32 = arith.constant 0 : i32
    %c0_i32_0 = arith.constant 0 : i32
    %c0_i32_1 = arith.constant 0 : i32
    return %arg0, %arg1, %c0_i32, %c0_i32_0 : i32, i32, i32, i32
  }
}

module attributes {stable_mosaic.version = 11 : i64} {
  func.func @_bn_relu_kernel(%arg0: i32, %arg1: memref<512x128xf32, #tpu.memory_space<vmem>>, %arg2: memref<1x128xf32, #tpu.memory_space<vmem>>, %arg3: memref<1x128xf32, #tpu.memory_space<vmem>>, %arg4: memref<512x128xf32, #tpu.memory_space<vmem>>) attributes {dimension_semantics = [#tpu.dimension_semantics<parallel>], iteration_bounds = array<i64: 1>, scalar_prefetch = 0 : i64, scratch_operands = 0 : i64, tpu.core_type = #tpu.core_type<tc>, window_params = [{transform_indices = @transform_0, window_bounds = array<i64: 512, 128>}, {pipeline_mode = #tpu.pipeline_mode<synchronous>, transform_indices = @transform_1, window_bounds = array<i64: 1, 128>}, {pipeline_mode = #tpu.pipeline_mode<synchronous>, transform_indices = @transform_2, window_bounds = array<i64: 1, 128>}, {transform_indices = @transform_3, window_bounds = array<i64: 512, 128>}]} {
    %c0 = arith.constant 0 : index
    %c0_0 = arith.constant 0 : index
    %0 = vector.load %arg1[%c0, %c0_0] : memref<512x128xf32, #tpu.memory_space<vmem>>, vector<512x128xf32>
    %c0_1 = arith.constant 0 : index
    %c0_2 = arith.constant 0 : index
    %1 = vector.load %arg2[%c0_1, %c0_2] : memref<1x128xf32, #tpu.memory_space<vmem>>, vector<1x128xf32>
    %2 = vector.broadcast %1 : vector<1x128xf32> to vector<512x128xf32>
    %3 = arith.mulf %0, %2 : vector<512x128xf32>
    %c0_3 = arith.constant 0 : index
    %c0_4 = arith.constant 0 : index
    %4 = vector.load %arg3[%c0_3, %c0_4] : memref<1x128xf32, #tpu.memory_space<vmem>>, vector<1x128xf32>
    %5 = vector.broadcast %4 : vector<1x128xf32> to vector<512x128xf32>
    %6 = arith.addf %3, %5 : vector<512x128xf32>
    %cst = arith.constant 0.000000e+00 : f32
    %7 = vector.broadcast %cst : f32 to vector<512x128xf32>
    %8 = arith.maximumf %6, %7 : vector<512x128xf32>
    %c0_5 = arith.constant 0 : index
    %c0_6 = arith.constant 0 : index
    %9 = vector.load %arg4[%c0_5, %c0_6] : memref<512x128xf32, #tpu.memory_space<vmem>>, vector<512x128xf32>
    tpu.vector_store %arg4[%c0_5, %c0_6], %8 {strides = array<i32>} : memref<512x128xf32, #tpu.memory_space<vmem>>, vector<512x128xf32>,
    return
  }
  func.func @transform_0(%arg0: i32) -> (i32, i32) {
    %c0_i32 = arith.constant 0 : i32
    %c0_i32_0 = arith.constant 0 : i32
    return %arg0, %c0_i32 : i32, i32
  }
  func.func @transform_1(%arg0: i32) -> (i32, i32) {
    %c0_i32 = arith.constant 0 : i32
    %c0_i32_0 = arith.constant 0 : i32
    %c0_i32_1 = arith.constant 0 : i32
    return %c0_i32, %c0_i32_0 : i32, i32
  }
  func.func @transform_2(%arg0: i32) -> (i32, i32) {
    %c0_i32 = arith.constant 0 : i32
    %c0_i32_0 = arith.constant 0 : i32
    %c0_i32_1 = arith.constant 0 : i32
    return %c0_i32, %c0_i32_0 : i32, i32
  }
  func.func @transform_3(%arg0: i32) -> (i32, i32) {
    %c0_i32 = arith.constant 0 : i32
    %c0_i32_0 = arith.constant 0 : i32
    return %arg0, %c0_i32 : i32, i32
  }
}

module attributes {stable_mosaic.version = 11 : i64} {
  func.func @_bn_relu_linear_kernel(%arg0: i32, %arg1: memref<512x128xf32, #tpu.memory_space<vmem>>, %arg2: memref<1x128xf32, #tpu.memory_space<vmem>>, %arg3: memref<1x128xf32, #tpu.memory_space<vmem>>, %arg4: memref<128x128xbf16, #tpu.memory_space<vmem>>, %arg5: memref<1x128xf32, #tpu.memory_space<vmem>>, %arg6: memref<512x128xf32, #tpu.memory_space<vmem>>, %arg7: memref<512x128xf32, #tpu.memory_space<vmem>>) attributes {dimension_semantics = [#tpu.dimension_semantics<parallel>], iteration_bounds = array<i64: 1>, scalar_prefetch = 0 : i64, scratch_operands = 0 : i64, tpu.core_type = #tpu.core_type<tc>, window_params = [{transform_indices = @transform_0, window_bounds = array<i64: 512, 128>}, {pipeline_mode = #tpu.pipeline_mode<synchronous>, transform_indices = @transform_1, window_bounds = array<i64: 1, 128>}, {pipeline_mode = #tpu.pipeline_mode<synchronous>, transform_indices = @transform_2, window_bounds = array<i64: 1, 128>}, {pipeline_mode = #tpu.pipeline_mode<synchronous>, transform_indices = @transform_3, window_bounds = array<i64: 128, 128>}, {pipeline_mode = #tpu.pipeline_mode<synchronous>, transform_indices = @transform_4, window_bounds = array<i64: 1, 128>}, {transform_indices = @transform_5, window_bounds = array<i64: 512, 128>}, {transform_indices = @transform_6, window_bounds = array<i64: 512, 128>}]} {
    %c0 = arith.constant 0 : index
    %c0_0 = arith.constant 0 : index
    %0 = vector.load %arg1[%c0, %c0_0] : memref<512x128xf32, #tpu.memory_space<vmem>>, vector<512x128xf32>
    %c0_1 = arith.constant 0 : index
    %c0_2 = arith.constant 0 : index
    %1 = vector.load %arg2[%c0_1, %c0_2] : memref<1x128xf32, #tpu.memory_space<vmem>>, vector<1x128xf32>
    %2 = vector.broadcast %1 : vector<1x128xf32> to vector<512x128xf32>
    %3 = arith.mulf %0, %2 : vector<512x128xf32>
    %c0_3 = arith.constant 0 : index
    %c0_4 = arith.constant 0 : index
    %4 = vector.load %arg3[%c0_3, %c0_4] : memref<1x128xf32, #tpu.memory_space<vmem>>, vector<1x128xf32>
    %5 = vector.broadcast %4 : vector<1x128xf32> to vector<512x128xf32>
    %6 = arith.addf %3, %5 : vector<512x128xf32>
    %cst = arith.constant 0.000000e+00 : f32
    %7 = vector.broadcast %cst : f32 to vector<512x128xf32>
    %8 = arith.maximumf %6, %7 : vector<512x128xf32>
    %c0_5 = arith.constant 0 : index
    %c0_6 = arith.constant 0 : index
    %9 = vector.load %arg6[%c0_5, %c0_6] : memref<512x128xf32, #tpu.memory_space<vmem>>, vector<512x128xf32>
    tpu.vector_store %arg6[%c0_5, %c0_6], %8 {strides = array<i32>} : memref<512x128xf32, #tpu.memory_space<vmem>>, vector<512x128xf32>,
    %10 = arith.truncf %8 : vector<512x128xf32> to vector<512x128xbf16>
    %c0_7 = arith.constant 0 : index
    %c0_8 = arith.constant 0 : index
    %11 = vector.load %arg4[%c0_7, %c0_8] : memref<128x128xbf16, #tpu.memory_space<vmem>>, vector<128x128xbf16>
    %cst_9 = arith.constant dense<0.000000e+00> : vector<512x128xf32>
    %12 = tpu.matmul %10, %11, %cst_9 {dimension_numbers = #tpu.dot_dimension_numbers<[1], [0], [0], [1], [0, 0, 1, 1], [], []>} : vector<512x128xbf16>, vector<128x128xbf16>, vector<512x128xf32> -> vector<512x128xf32>
    %c0_10 = arith.constant 0 : index
    %c0_11 = arith.constant 0 : index
    %13 = vector.load %arg5[%c0_10, %c0_11] : memref<1x128xf32, #tpu.memory_space<vmem>>, vector<1x128xf32>
    %14 = vector.broadcast %13 : vector<1x128xf32> to vector<512x128xf32>
    %15 = arith.addf %12, %14 : vector<512x128xf32>
    %c0_12 = arith.constant 0 : index
    %c0_13 = arith.constant 0 : index
    %16 = vector.load %arg7[%c0_12, %c0_13] : memref<512x128xf32, #tpu.memory_space<vmem>>, vector<512x128xf32>
    tpu.vector_store %arg7[%c0_12, %c0_13], %15 {strides = array<i32>} : memref<512x128xf32, #tpu.memory_space<vmem>>, vector<512x128xf32>,
    return
  }
  func.func @transform_0(%arg0: i32) -> (i32, i32) {
    %c0_i32 = arith.constant 0 : i32
    %c0_i32_0 = arith.constant 0 : i32
    return %arg0, %c0_i32 : i32, i32
  }
  func.func @transform_1(%arg0: i32) -> (i32, i32) {
    %c0_i32 = arith.constant 0 : i32
    %c0_i32_0 = arith.constant 0 : i32
    %c0_i32_1 = arith.constant 0 : i32
    return %c0_i32, %c0_i32_0 : i32, i32
  }
  func.func @transform_2(%arg0: i32) -> (i32, i32) {
    %c0_i32 = arith.constant 0 : i32
    %c0_i32_0 = arith.constant 0 : i32
    %c0_i32_1 = arith.constant 0 : i32
    return %c0_i32, %c0_i32_0 : i32, i32
  }
  func.func @transform_3(%arg0: i32) -> (i32, i32) {
    %c0_i32 = arith.constant 0 : i32
    %c0_i32_0 = arith.constant 0 : i32
    %c0_i32_1 = arith.constant 0 : i32
    return %c0_i32, %c0_i32_0 : i32, i32
  }
  func.func @transform_4(%arg0: i32) -> (i32, i32) {
    %c0_i32 = arith.constant 0 : i32
    %c0_i32_0 = arith.constant 0 : i32
    %c0_i32_1 = arith.constant 0 : i32
    return %c0_i32, %c0_i32_0 : i32, i32
  }
  func.func @transform_5(%arg0: i32) -> (i32, i32) {
    %c0_i32 = arith.constant 0 : i32
    %c0_i32_0 = arith.constant 0 : i32
    return %arg0, %c0_i32 : i32, i32
  }
  func.func @transform_6(%arg0: i32) -> (i32, i32) {
    %c0_i32 = arith.constant 0 : i32
    %c0_i32_0 = arith.constant 0 : i32
    return %arg0, %c0_i32 : i32, i32
  }
}

</mosaic_0001>

<bundles_post_ra>
// kernel: build_student_net_forward.9
= control target key start
LH: loop header
LB: loop body
LE: loop exit
PB: predicated region body
PF: predicated region fallthrough
CT: control target
= control target key end

     0   :  { %s896_s0 = inlined_call_operand.vmem [shape: f32[512,128], index: 0, kind: input, shape index: {}]   ;;  %s897_s1 = inlined_call_operand.vmem [shape: f32[1,128], index: 1, kind: input, shape index: {}]   ;;  %s898_s2 = inlined_call_operand.vmem [shape: f32[1,128], index: 2, kind: input, shape index: {}]   ;;  %s899_s3 = inlined_call_operand.vmem [shape: f32[512,128], index: 3, kind: output, shape index: {}]  }
   0x1   :  { %v14_v0 = vld [vmem:[%s896_s0] sm:$0xff]  ;;  %v15_v4 = vld [vmem:[%s896_s0 + $0x8] sm:$0xff]  ;;  %v16_v5 = vld [vmem:[%s896_s0 + $0x10] sm:$0xff] }
   0x2   :  { %v380_v1 = vld [vmem:[%s897_s1] ss:$0 sm:$0xff]  ;;  %v17_v6 = vld [vmem:[%s896_s0 + $0x18] sm:$0xff]  ;;  %v19_v11 = vld [vmem:[%s896_s0 + $0x28] sm:$0xff] }
   0x3   :  { %v385_v2 = vld [vmem:[%s898_s2] ss:$0 sm:$0xff]  ;;  %v85_v3 = vmul.f32 %v380_v1, %v14_v0  ;;  %v86_v7 = vmul.f32 %v380_v1, %v15_v4  ;;  %v87_v8 = vmul.f32 %v380_v1, %v16_v5  ;;  %v88_v9 = vmul.f32 %v380_v1, %v17_v6  ;;  %v20_v12 = vld [vmem:[%s896_s0 + $0x30] sm:$0xff]  ;;  %v21_v17 = vld [vmem:[%s896_s0 + $0x38] sm:$0xff] }
   0x4   :  { %v18_v10 = vld [vmem:[%s896_s0 + $0x20] sm:$0xff]  ;;  %v90_v15 = vmul.f32 %v380_v1, %v19_v11  ;;  %v91_v16 = vmul.f32 %v380_v1, %v20_v12  ;;  %v92_v21 = vmul.f32 %v380_v1, %v21_v17  ;;  %v23_v27 = vld [vmem:[%s896_s0 + $0x48] sm:$0xff]  ;;  %v24_v28 = vld [vmem:[%s896_s0 + $0x50] sm:$0xff] }
   0x5   :  { %v156_v13 = vadd.f32 %v385_v2, %v85_v3  ;;  %v89_v14 = vmul.f32 %v380_v1, %v18_v10  ;;  %v157_v18 = vadd.f32 %v385_v2, %v86_v7  ;;  %v158_v19 = vadd.f32 %v385_v2, %v87_v8  ;;  %v22_v22 = vld [vmem:[%s896_s0 + $0x40] sm:$0xff]  ;;  %v25_v29 = vld [vmem:[%s896_s0 + $0x58] sm:$0xff]  ;;  %v27_v35 = vld [vmem:[%s896_s0 + $0x68] sm:$0xff] }
   0x6   :  { %v159_v20 = vadd.f32 %v385_v2, %v88_v9  ;;  %v161_v25 = vadd.f32 %v385_v2, %v90_v15  ;;  %v162_v26 = vadd.f32 %v385_v2, %v91_v16  ;;  %v163_v33 = vadd.f32 %v385_v2, %v92_v21  ;;  %v26_v34 = vld [vmem:[%s896_s0 + $0x60] sm:$0xff]  ;;  %v28_v36 = vld [vmem:[%s896_s0 + $0x70] sm:$0xff]  ;;  %v29_v41 = vld [vmem:[%s896_s0 + $0x78] sm:$0xff] }
   0x7   :  { %v220_v23 = vmax.f32 %v156_v13, 0.0  ;;  %v160_v24 = vadd.f32 %v385_v2, %v89_v14  ;;  %v221_v30 = vmax.f32 %v157_v18, 0.0  ;;  %v222_v31 = vmax.f32 %v158_v19, 0.0  ;;  %v30_v54 = vld [vmem:[%s896_s0 + $0x80] sm:$0xff]  ;;  %v31_v59 = vld [vmem:[%s896_s0 + $0x88] sm:$0xff]  ;;  %v32_v60 = vld [vmem:[%s896_s0 + $0x90] sm:$0xff] }
   0x8   :  { %v223_v32 = vmax.f32 %v159_v20, 0.0  ;;  %v225_v38 = vmax.f32 %v161_v25, 0.0  ;;  %v226_v39 = vmax.f32 %v162_v26, 0.0  ;;  %v93_v40 = vmul.f32 %v380_v1, %v22_v22  ;;  %v33_v61 = vld [vmem:[%s896_s0 + $0x98] sm:$0xff]  ;;  %v34_v4 = vld [vmem:[%s896_s0 + $0xa0] sm:$0xff]  ;;  %v35_v5 = vld [vmem:[%s896_s0 + $0xa8] sm:$0xff] }
   0x9   :  { %284 = vst [vmem:[%s899_s3] sm:$0xff] %v220_v23  ;;  %v224_v37 = vmax.f32 %v160_v24, 0.0  ;;  %285 = vst [vmem:[%s899_s3 + $0x8] sm:$0xff] %v221_v30  ;;  %v227_v42 = vmax.f32 %v163_v33, 0.0  ;;  %v94_v43 = vmul.f32 %v380_v1, %v23_v27  ;;  %v95_v44 = vmul.f32 %v380_v1, %v24_v28  ;;  %v36_v6 = vld [vmem:[%s896_s0 + $0xb0] sm:$0xff]  ;;  %v37_v11 = vld [vmem:[%s896_s0 + $0xb8] sm:$0xff] }
   0xa   :  { %286 = vst [vmem:[%s899_s3 + $0x10] sm:$0xff] %v222_v31  ;;  %287 = vst [vmem:[%s899_s3 + $0x18] sm:$0xff] %v223_v32  ;;  %v96_v45 = vmul.f32 %v380_v1, %v25_v29  ;;  %v164_v46 = vadd.f32 %v385_v2, %v93_v40  ;;  %v97_v47 = vmul.f32 %v380_v1, %v26_v34  ;;  %v38_v24 = vld [vmem:[%s896_s0 + $0xc0] sm:$0xff]  ;;  %v39_v29 = vld [vmem:[%s896_s0 + $0xc8] sm:$0xff] }
   0xb   :  { %288 = vst [vmem:[%s899_s3 + $0x20] sm:$0xff] %v224_v37  ;;  %289 = vst [vmem:[%s899_s3 + $0x28] sm:$0xff] %v225_v38  ;;  %v98_v48 = vmul.f32 %v380_v1, %v27_v35  ;;  %v99_v49 = vmul.f32 %v380_v1, %v28_v36  ;;  %v165_v50 = vadd.f32 %v385_v2, %v94_v43  ;;  %v40_v30 = vld [vmem:[%s896_s0 + $0xd0] sm:$0xff]  ;;  %v41_v31 = vld [vmem:[%s896_s0 + $0xd8] sm:$0xff] }
   0xc   :  { %290 = vst [vmem:[%s899_s3 + $0x30] sm:$0xff] %v226_v39  ;;  %291 = vst [vmem:[%s899_s3 + $0x38] sm:$0xff] %v227_v42  ;;  %v166_v51 = vadd.f32 %v385_v2, %v95_v44  ;;  %v167_v52 = vadd.f32 %v385_v2, %v96_v45  ;;  %v100_v53 = vmul.f32 %v380_v1, %v29_v41  ;;  %v228_v55 = vmax.f32 %v164_v46, 0.0  ;;  %v42_v36 = vld [vmem:[%s896_s0 + $0xe0] sm:$0xff]  ;;  %v43_v37 = vld [vmem:[%s896_s0 + $0xe8] sm:$0xff] }
   0xd   :  { %v168_v56 = vadd.f32 %v385_v2, %v97_v47  ;;  %v169_v57 = vadd.f32 %v385_v2, %v98_v48  ;;  %v170_v58 = vadd.f32 %v385_v2, %v99_v49  ;;  %v229_v62 = vmax.f32 %v165_v50, 0.0  ;;  %v44_v38 = vld [vmem:[%s896_s0 + $0xf0] sm:$0xff]  ;;  %v45_v43 = vld [vmem:[%s896_s0 + $0xf8] sm:$0xff] }
   0xe   :  { %v230_v63 = vmax.f32 %v166_v51, 0.0  ;;  %v231_v0 = vmax.f32 %v167_v52, 0.0  ;;  %v171_v3 = vadd.f32 %v385_v2, %v100_v53  ;;  %292 = vst [vmem:[%s899_s3 + $0x40] sm:$0xff] %v228_v55  ;;  %v101_v10 = vmul.f32 %v380_v1, %v30_v54 }
   0xf   :  { %v232_v7 = vmax.f32 %v168_v56, 0.0  ;;  %v233_v8 = vmax.f32 %v169_v57, 0.0  ;;  %v234_v9 = vmax.f32 %v170_v58, 0.0  ;;  %293 = vst [vmem:[%s899_s3 + $0x48] sm:$0xff] %v229_v62  ;;  %v102_v13 = vmul.f32 %v380_v1, %v31_v59  ;;  %v46_v56 = vld [vmem:[%s896_s0 + $0x100] sm:$0xff]  ;;  %v48_v62 = vld [vmem:[%s896_s0 + $0x110] sm:$0xff] }
  0x10   :  { %294 = vst [vmem:[%s899_s3 + $0x50] sm:$0xff] %v230_v63  ;;  %295 = vst [vmem:[%s899_s3 + $0x58] sm:$0xff] %v231_v0  ;;  %v235_v12 = vmax.f32 %v171_v3, 0.0  ;;  %v103_v14 = vmul.f32 %v380_v1, %v32_v60  ;;  %v104_v15 = vmul.f32 %v380_v1, %v33_v61  ;;  %v172_v16 = vadd.f32 %v385_v2, %v101_v10  ;;  %v47_v61 = vld [vmem:[%s896_s0 + $0x108] sm:$0xff]  ;;  %v49_v63 = vld [vmem:[%s896_s0 + $0x118] sm:$0xff] }
  0x11   :  { %296 = vst [vmem:[%s899_s3 + $0x60] sm:$0xff] %v232_v7  ;;  %297 = vst [vmem:[%s899_s3 + $0x68] sm:$0xff] %v233_v8  ;;  %v105_v17 = vmul.f32 %v380_v1, %v34_v4  ;;  %v106_v18 = vmul.f32 %v380_v1, %v35_v5  ;;  %v107_v19 = vmul.f32 %v380_v1, %v36_v6  ;;  %v50_v6 = vld [vmem:[%s896_s0 + $0x120] sm:$0xff]  ;;  %v51_v7 = vld [vmem:[%s896_s0 + $0x128] sm:$0xff] }
  0x12   :  { %298 = vst [vmem:[%s899_s3 + $0x70] sm:$0xff] %v234_v9  ;;  %299 = vst [vmem:[%s899_s3 + $0x78] sm:$0xff] %v235_v12  ;;  %v173_v20 = vadd.f32 %v385_v2, %v102_v13  ;;  %v174_v21 = vadd.f32 %v385_v2, %v103_v14  ;;  %v175_v22 = vadd.f32 %v385_v2, %v104_v15  ;;  %v236_v25 = vmax.f32 %v172_v16, 0.0  ;;  %v52_v8 = vld [vmem:[%s896_s0 + $0x130] sm:$0xff]  ;;  %v53_v13 = vld [vmem:[%s896_s0 + $0x138] sm:$0xff] }
  0x13   :  { %v108_v23 = vmul.f32 %v380_v1, %v37_v11  ;;  %v176_v26 = vadd.f32 %v385_v2, %v105_v17  ;;  %v177_v27 = vadd.f32 %v385_v2, %v106_v18  ;;  %v178_v28 = vadd.f32 %v385_v2, %v107_v19 }
  0x14   :  { %v237_v32 = vmax.f32 %v173_v20, 0.0  ;;  %v238_v33 = vmax.f32 %v174_v21, 0.0  ;;  %v239_v34 = vmax.f32 %v175_v22, 0.0  ;;  %300 = vst [vmem:[%s899_s3 + $0x80] sm:$0xff] %v236_v25  ;;  %v109_v42 = vmul.f32 %v380_v1, %v38_v24 }
  0x15   :  { %v179_v35 = vadd.f32 %v385_v2, %v108_v23  ;;  %v240_v39 = vmax.f32 %v176_v26, 0.0  ;;  %v241_v40 = vmax.f32 %v177_v27, 0.0  ;;  %v242_v41 = vmax.f32 %v178_v28, 0.0  ;;  %v54_v26 = vld [vmem:[%s896_s0 + $0x140] sm:$0xff] }
  0x16   :  { %301 = vst [vmem:[%s899_s3 + $0x88] sm:$0xff] %v237_v32  ;;  %302 = vst [vmem:[%s899_s3 + $0x90] sm:$0xff] %v238_v33  ;;  %v110_v45 = vmul.f32 %v380_v1, %v39_v29  ;;  %v111_v46 = vmul.f32 %v380_v1, %v40_v30  ;;  %v112_v47 = vmul.f32 %v380_v1, %v41_v31  ;;  %v55_v31 = vld [vmem:[%s896_s0 + $0x148] sm:$0xff]  ;;  %v56_v32 = vld [vmem:[%s896_s0 + $0x150] sm:$0xff] }
  0x17   :  { %303 = vst [vmem:[%s899_s3 + $0x98] sm:$0xff] %v239_v34  ;;  %v243_v44 = vmax.f32 %v179_v35, 0.0  ;;  %304 = vst [vmem:[%s899_s3 + $0xa0] sm:$0xff] %v240_v39  ;;  %v180_v48 = vadd.f32 %v385_v2, %v109_v42  ;;  %v113_v49 = vmul.f32 %v380_v1, %v42_v36  ;;  %v114_v50 = vmul.f32 %v380_v1, %v43_v37  ;;  %v57_v33 = vld [vmem:[%s896_s0 + $0x158] sm:$0xff]  ;;  %v59_v39 = vld [vmem:[%s896_s0 + $0x168] sm:$0xff] }
  0x18   :  { %305 = vst [vmem:[%s899_s3 + $0xa8] sm:$0xff] %v241_v40  ;;  %306 = vst [vmem:[%s899_s3 + $0xb0] sm:$0xff] %v242_v41  ;;  %v115_v51 = vmul.f32 %v380_v1, %v44_v38  ;;  %v181_v52 = vadd.f32 %v385_v2, %v110_v45  ;;  %v182_v53 = vadd.f32 %v385_v2, %v111_v46  ;;  %v58_v38 = vld [vmem:[%s896_s0 + $0x160] sm:$0xff]  ;;  %v60_v40 = vld [vmem:[%s896_s0 + $0x170] sm:$0xff] }
  0x19   :  { %307 = vst [vmem:[%s899_s3 + $0xb8] sm:$0xff] %v243_v44  ;;  %v183_v54 = vadd.f32 %v385_v2, %v112_v47  ;;  %v116_v55 = vmul.f32 %v380_v1, %v45_v43  ;;  %v244_v57 = vmax.f32 %v180_v48, 0.0  ;;  %v184_v58 = vadd.f32 %v385_v2, %v113_v49  ;;  %v61_v45 = vld [vmem:[%s896_s0 + $0x178] sm:$0xff] }
  0x1a   :  { %v185_v59 = vadd.f32 %v385_v2, %v114_v50  ;;  %v186_v60 = vadd.f32 %v385_v2, %v115_v51  ;;  %v245_v0 = vmax.f32 %v181_v52, 0.0  ;;  %v246_v3 = vmax.f32 %v182_v53, 0.0 }
  0x1b   :  { %v247_v4 = vmax.f32 %v183_v54, 0.0  ;;  %v187_v5 = vadd.f32 %v385_v2, %v116_v55  ;;  %308 = vst [vmem:[%s899_s3 + $0xc0] sm:$0xff] %v244_v57  ;;  %v248_v9 = vmax.f32 %v184_v58, 0.0  ;;  %v117_v12 = vmul.f32 %v380_v1, %v46_v56  ;;  %v62_v58 = vld [vmem:[%s896_s0 + $0x180] sm:$0xff] }
  0x1c   :  { %v249_v10 = vmax.f32 %v185_v59, 0.0  ;;  %v250_v11 = vmax.f32 %v186_v60, 0.0  ;;  %309 = vst [vmem:[%s899_s3 + $0xc8] sm:$0xff] %v245_v0  ;;  %310 = vst [vmem:[%s899_s3 + $0xd0] sm:$0xff] %v246_v3  ;;  %v118_v15 = vmul.f32 %v380_v1, %v47_v61  ;;  %v119_v16 = vmul.f32 %v380_v1, %v48_v62  ;;  %v64_v0 = vld [vmem:[%s896_s0 + $0x190] sm:$0xff]  ;;  %v65_v3 = vld [vmem:[%s896_s0 + $0x198] sm:$0xff] }
  0x1d   :  { %311 = vst [vmem:[%s899_s3 + $0xd8] sm:$0xff] %v247_v4  ;;  %v251_v14 = vmax.f32 %v187_v5, 0.0  ;;  %v120_v17 = vmul.f32 %v380_v1, %v49_v63  ;;  %312 = vst [vmem:[%s899_s3 + $0xe0] sm:$0xff] %v248_v9  ;;  %v188_v18 = vadd.f32 %v385_v2, %v117_v12  ;;  %v121_v19 = vmul.f32 %v380_v1, %v50_v6  ;;  %v63_v63 = vld [vmem:[%s896_s0 + $0x188] sm:$0xff] }
  0x1e   :  { %313 = vst [vmem:[%s899_s3 + $0xe8] sm:$0xff] %v249_v10  ;;  %314 = vst [vmem:[%s899_s3 + $0xf0] sm:$0xff] %v250_v11  ;;  %v122_v20 = vmul.f32 %v380_v1, %v51_v7  ;;  %v123_v21 = vmul.f32 %v380_v1, %v52_v8  ;;  %v189_v22 = vadd.f32 %v385_v2, %v118_v15  ;;  %v66_v8 = vld [vmem:[%s896_s0 + $0x1a0] sm:$0xff]  ;;  %v67_v9 = vld [vmem:[%s896_s0 + $0x1a8] sm:$0xff] }
  0x1f   :  { %315 = vst [vmem:[%s899_s3 + $0xf8] sm:$0xff] %v251_v14  ;;  %v190_v23 = vadd.f32 %v385_v2, %v119_v16  ;;  %v191_v24 = vadd.f32 %v385_v2, %v120_v17  ;;  %v124_v25 = vmul.f32 %v380_v1, %v53_v13  ;;  %v252_v27 = vmax.f32 %v188_v18, 0.0  ;;  %v68_v10 = vld [vmem:[%s896_s0 + $0x1b0] sm:$0xff]  ;;  %v69_v15 = vld [vmem:[%s896_s0 + $0x1b8] sm:$0xff] }
  0x20   :  { %v192_v28 = vadd.f32 %v385_v2, %v121_v19  ;;  %v193_v29 = vadd.f32 %v385_v2, %v122_v20  ;;  %v194_v30 = vadd.f32 %v385_v2, %v123_v21  ;;  %v253_v34 = vmax.f32 %v189_v22, 0.0 }
  0x21   :  { %v254_v35 = vmax.f32 %v190_v23, 0.0  ;;  %v255_v36 = vmax.f32 %v191_v24, 0.0  ;;  %v195_v37 = vadd.f32 %v385_v2, %v124_v25  ;;  %316 = vst [vmem:[%s899_s3 + $0x100] sm:$0xff] %v252_v27  ;;  %v125_v44 = vmul.f32 %v380_v1, %v54_v26 }
  0x22   :  { %v256_v41 = vmax.f32 %v192_v28, 0.0  ;;  %v257_v42 = vmax.f32 %v193_v29, 0.0  ;;  %v258_v43 = vmax.f32 %v194_v30, 0.0  ;;  %317 = vst [vmem:[%s899_s3 + $0x108] sm:$0xff] %v253_v34  ;;  %v126_v47 = vmul.f32 %v380_v1, %v55_v31  ;;  %v70_v28 = vld [vmem:[%s896_s0 + $0x1c0] sm:$0xff]  ;;  %v72_v34 = vld [vmem:[%s896_s0 + $0x1d0] sm:$0xff] }
  0x23   :  { %318 = vst [vmem:[%s899_s3 + $0x110] sm:$0xff] %v254_v35  ;;  %319 = vst [vmem:[%s899_s3 + $0x118] sm:$0xff] %v255_v36  ;;  %v259_v46 = vmax.f32 %v195_v37, 0.0  ;;  %v127_v48 = vmul.f32 %v380_v1, %v56_v32  ;;  %v128_v49 = vmul.f32 %v380_v1, %v57_v33  ;;  %v196_v50 = vadd.f32 %v385_v2, %v125_v44  ;;  %v71_v33 = vld [vmem:[%s896_s0 + $0x1c8] sm:$0xff]  ;;  %v73_v35 = vld [vmem:[%s896_s0 + $0x1d8] sm:$0xff] }
  0x24   :  { %320 = vst [vmem:[%s899_s3 + $0x120] sm:$0xff] %v256_v41  ;;  %321 = vst [vmem:[%s899_s3 + $0x128] sm:$0xff] %v257_v42  ;;  %v129_v51 = vmul.f32 %v380_v1, %v58_v38  ;;  %v130_v52 = vmul.f32 %v380_v1, %v59_v39  ;;  %v131_v53 = vmul.f32 %v380_v1, %v60_v40  ;;  %v74_v40 = vld [vmem:[%s896_s0 + $0x1e0] sm:$0xff]  ;;  %v75_v41 = vld [vmem:[%s896_s0 + $0x1e8] sm:$0xff] }
  0x25   :  { %322 = vst [vmem:[%s899_s3 + $0x130] sm:$0xff] %v258_v43  ;;  %323 = vst [vmem:[%s899_s3 + $0x138] sm:$0xff] %v259_v46  ;;  %v197_v54 = vadd.f32 %v385_v2, %v126_v47  ;;  %v198_v55 = vadd.f32 %v385_v2, %v127_v48  ;;  %v199_v56 = vadd.f32 %v385_v2, %v128_v49  ;;  %v260_v59 = vmax.f32 %v196_v50, 0.0  ;;  %v76_v42 = vld [vmem:[%s896_s0 + $0x1f0] sm:$0xff]  ;;  %v77_v47 = vld [vmem:[%s896_s0 + $0x1f8] sm:$0xff] }
  0x26   :  { %v132_v57 = vmul.f32 %v380_v1, %v61_v45  ;;  %v200_v60 = vadd.f32 %v385_v2, %v129_v51  ;;  %v201_v61 = vadd.f32 %v385_v2, %v130_v52  ;;  %v202_v62 = vadd.f32 %v385_v2, %v131_v53 }
  0x27   :  { %v261_v4 = vmax.f32 %v197_v54, 0.0  ;;  %v262_v5 = vmax.f32 %v198_v55, 0.0  ;;  %v263_v6 = vmax.f32 %v199_v56, 0.0  ;;  %324 = vst [vmem:[%s899_s3 + $0x140] sm:$0xff] %v260_v59  ;;  %v133_v14 = vmul.f32 %v380_v1, %v62_v58 }
  0x28   :  { %v203_v7 = vadd.f32 %v385_v2, %v132_v57  ;;  %v264_v11 = vmax.f32 %v200_v60, 0.0  ;;  %v265_v12 = vmax.f32 %v201_v61, 0.0  ;;  %v266_v13 = vmax.f32 %v202_v62, 0.0 }
  0x29   :  { %325 = vst [vmem:[%s899_s3 + $0x148] sm:$0xff] %v261_v4  ;;  %326 = vst [vmem:[%s899_s3 + $0x150] sm:$0xff] %v262_v5  ;;  %v134_v17 = vmul.f32 %v380_v1, %v63_v63  ;;  %v135_v18 = vmul.f32 %v380_v1, %v64_v0  ;;  %v136_v19 = vmul.f32 %v380_v1, %v65_v3 }
  0x2a   :  { %327 = vst [vmem:[%s899_s3 + $0x158] sm:$0xff] %v263_v6  ;;  %v267_v16 = vmax.f32 %v203_v7, 0.0  ;;  %328 = vst [vmem:[%s899_s3 + $0x160] sm:$0xff] %v264_v11  ;;  %v204_v20 = vadd.f32 %v385_v2, %v133_v14  ;;  %v137_v21 = vmul.f32 %v380_v1, %v66_v8  ;;  %v138_v22 = vmul.f32 %v380_v1, %v67_v9 }
  0x2b   :  { %329 = vst [vmem:[%s899_s3 + $0x168] sm:$0xff] %v265_v12  ;;  %330 = vst [vmem:[%s899_s3 + $0x170] sm:$0xff] %v266_v13  ;;  %v139_v23 = vmul.f32 %v380_v1, %v68_v10  ;;  %v205_v24 = vadd.f32 %v385_v2, %v134_v17  ;;  %v206_v25 = vadd.f32 %v385_v2, %v135_v18 }
  0x2c   :  { %331 = vst [vmem:[%s899_s3 + $0x178] sm:$0xff] %v267_v16  ;;  %v207_v26 = vadd.f32 %v385_v2, %v136_v19  ;;  %v140_v27 = vmul.f32 %v380_v1, %v69_v15  ;;  %v268_v29 = vmax.f32 %v204_v20, 0.0  ;;  %v208_v30 = vadd.f32 %v385_v2, %v137_v21 }
  0x2d   :  { %v209_v31 = vadd.f32 %v385_v2, %v138_v22  ;;  %v210_v32 = vadd.f32 %v385_v2, %v139_v23  ;;  %v269_v36 = vmax.f32 %v205_v24, 0.0  ;;  %v270_v37 = vmax.f32 %v206_v25, 0.0 }
  0x2e   :  { %v271_v38 = vmax.f32 %v207_v26, 0.0  ;;  %v211_v39 = vadd.f32 %v385_v2, %v140_v27  ;;  %332 = vst [vmem:[%s899_s3 + $0x180] sm:$0xff] %v268_v29  ;;  %v272_v43 = vmax.f32 %v208_v30, 0.0  ;;  %v141_v46 = vmul.f32 %v380_v1, %v70_v28 }
  0x2f   :  { %v273_v44 = vmax.f32 %v209_v31, 0.0  ;;  %v274_v45 = vmax.f32 %v210_v32, 0.0  ;;  %333 = vst [vmem:[%s899_s3 + $0x188] sm:$0xff] %v269_v36  ;;  %334 = vst [vmem:[%s899_s3 + $0x190] sm:$0xff] %v270_v37  ;;  %v142_v49 = vmul.f32 %v380_v1, %v71_v33  ;;  %v143_v50 = vmul.f32 %v380_v1, %v72_v34 }
  0x30   :  { %335 = vst [vmem:[%s899_s3 + $0x198] sm:$0xff] %v271_v38  ;;  %v275_v48 = vmax.f32 %v211_v39, 0.0  ;;  %v144_v51 = vmul.f32 %v380_v1, %v73_v35  ;;  %336 = vst [vmem:[%s899_s3 + $0x1a0] sm:$0xff] %v272_v43  ;;  %v212_v52 = vadd.f32 %v385_v2, %v141_v46  ;;  %v145_v53 = vmul.f32 %v380_v1, %v74_v40 }
  0x31   :  { %337 = vst [vmem:[%s899_s3 + $0x1a8] sm:$0xff] %v273_v44  ;;  %338 = vst [vmem:[%s899_s3 + $0x1b0] sm:$0xff] %v274_v45  ;;  %v146_v54 = vmul.f32 %v380_v1, %v75_v41  ;;  %v147_v55 = vmul.f32 %v380_v1, %v76_v42  ;;  %v213_v56 = vadd.f32 %v385_v2, %v142_v49 }
  0x32   :  { %339 = vst [vmem:[%s899_s3 + $0x1b8] sm:$0xff] %v275_v48  ;;  %v214_v57 = vadd.f32 %v385_v2, %v143_v50  ;;  %v215_v58 = vadd.f32 %v385_v2, %v144_v51  ;;  %v148_v59 = vmul.f32 %v380_v1, %v77_v47  ;;  %v276_v60 = vmax.f32 %v212_v52, 0.0 }
  0x33   :  { %v216_v61 = vadd.f32 %v385_v2, %v145_v53  ;;  %v217_v62 = vadd.f32 %v385_v2, %v146_v54  ;;  %v218_v63 = vadd.f32 %v385_v2, %v147_v55  ;;  %v277_v0 = vmax.f32 %v213_v56, 0.0 }
  0x34   :  { %v278_v3 = vmax.f32 %v214_v57, 0.0  ;;  %v279_v4 = vmax.f32 %v215_v58, 0.0  ;;  %v219_v5 = vadd.f32 %v385_v2, %v148_v59  ;;  %340 = vst [vmem:[%s899_s3 + $0x1c0] sm:$0xff] %v276_v60 }
  0x35   :  { %v280_v6 = vmax.f32 %v216_v61, 0.0  ;;  %v281_v7 = vmax.f32 %v217_v62, 0.0  ;;  %v282_v8 = vmax.f32 %v218_v63, 0.0  ;;  %341 = vst [vmem:[%s899_s3 + $0x1c8] sm:$0xff] %v277_v0 }
  0x36   :  { %342 = vst [vmem:[%s899_s3 + $0x1d0] sm:$0xff] %v278_v3  ;;  %343 = vst [vmem:[%s899_s3 + $0x1d8] sm:$0xff] %v279_v4  ;;  %v283_v1 = vmax.f32 %v219_v5, 0.0 }
  0x37   :  { %344 = vst [vmem:[%s899_s3 + $0x1e0] sm:$0xff] %v280_v6  ;;  %345 = vst [vmem:[%s899_s3 + $0x1e8] sm:$0xff] %v281_v7 }
  0x38   :  { %346 = vst [vmem:[%s899_s3 + $0x1f0] sm:$0xff] %v282_v8  ;;  %347 = vst [vmem:[%s899_s3 + $0x1f8] sm:$0xff] %v283_v1 }

// kernel: build_student_net_forward.15
= control target key start
LH: loop header
LB: loop body
LE: loop exit
PB: predicated region body
PF: predicated region fallthrough
CT: control target
= control target key end

     0   :  { %s2155_s3 = inlined_call_operand.vmem [shape: bf16[128,128], index: 3, kind: input, shape index: {}]   ;;  %s2156_s0 = inlined_call_operand.vmem [shape: f32[512,128], index: 0, kind: input, shape index: {}]   ;;  %s2157_s1 = inlined_call_operand.vmem [shape: f32[1,128], index: 1, kind: input, shape index: {}]   ;;  %s2158_s2 = inlined_call_operand.vmem [shape: f32[1,128], index: 2, kind: input, shape index: {}]   ;;  %s2159_s5 = inlined_call_operand.vmem [shape: f32[512,128], index: 5, kind: output, shape index: {0}]   ;;  %s2160_s4 = inlined_call_operand.vmem [shape: f32[1,128], index: 4, kind: input, shape index: {}]   ;;  %s2161_s6 = inlined_call_operand.vmem [shape: f32[512,128], index: 6, kind: output, shape index: {1}]  }
   0x1   :  { %v968_v0 = vld [vmem:[%s2155_s3 + $0x38] sm:$0xff]   ;;  %v969_v1 = vld [vmem:[%s2155_s3 + $0x30] sm:$0xff]   ;;  %v970_v2 = vld [vmem:[%s2155_s3 + $0x28] sm:$0xff]  }
   0x2   :  { %872 = vmatprep.subr.bf16.mxu0 %v968_v0  ;;  %952 = vmatprep.subr.bf16.mxu1 %v968_v0  ;;  %v971_v3 = vld [vmem:[%s2155_s3 + $0x20] sm:$0xff]   ;;  %v24_v5 = vld [vmem:[%s2156_s0 + $0x8] sm:$0xff]  ;;  %v25_v14 = vld [vmem:[%s2156_s0 + $0x10] sm:$0xff] }
   0x3   :  { %873 = vmatpush3.bf16.msra.mxu0 %v968_v0  ;;  %960 = vmatpush3.bf16.msra.mxu1 %v968_v0  ;;  %v23_v4 = vld [vmem:[%s2156_s0] sm:$0xff]  ;;  %v56_v11 = vld [vmem:[%s2156_s0 + $0x108] sm:$0xff]  ;;  %v26_v15 = vld [vmem:[%s2156_s0 + $0x18] sm:$0xff] }
   0x4   :  { %874 = vmatprep.subr.bf16.mxu0 %v969_v1  ;;  %953 = vmatprep.subr.bf16.mxu1 %v969_v1  ;;  %v1032_v6 = vld [vmem:[%s2157_s1] ss:$0 sm:$0xff]  ;;  %v57_v16 = vld [vmem:[%s2156_s0 + $0x110] sm:$0xff]  ;;  %v58_v20 = vld [vmem:[%s2156_s0 + $0x118] sm:$0xff] }
   0x5   :  { %v94_v7 = vmul.f32 %v1032_v6, %v23_v4  ;;  %v95_v8 = vmul.f32 %v1032_v6, %v24_v5  ;;  %v1039_v9 = vld [vmem:[%s2158_s2] ss:$0 sm:$0xff]  ;;  %v127_v13 = vmul.f32 %v1032_v6, %v56_v11  ;;  %v96_v19 = vmul.f32 %v1032_v6, %v25_v14  ;;  %v972_v21 = vld [vmem:[%s2155_s3 + $0x18] sm:$0xff]   ;;  %v28_v30 = vld [vmem:[%s2156_s0 + $0x28] sm:$0xff] }
   0x6   :  { %v55_v10 = vld [vmem:[%s2156_s0 + $0x100] sm:$0xff]  ;;  %v97_v24 = vmul.f32 %v1032_v6, %v26_v15  ;;  %v128_v29 = vmul.f32 %v1032_v6, %v57_v16  ;;  %v129_v34 = vmul.f32 %v1032_v6, %v58_v20  ;;  %v60_v36 = vld [vmem:[%s2156_s0 + $0x128] sm:$0xff]  ;;  %v29_v41 = vld [vmem:[%s2156_s0 + $0x30] sm:$0xff]  ;;  %v99_v46 = vmul.f32 %v1032_v6, %v28_v30 }
   0x7   :  { %875 = vmatpush3.bf16.msra.mxu0 %v969_v1  ;;  %961 = vmatpush3.bf16.msra.mxu1 %v969_v1  ;;  %v126_v12 = vmul.f32 %v1032_v6, %v55_v10  ;;  %v165_v17 = vadd.f32 %v1039_v9, %v94_v7  ;;  %v166_v18 = vadd.f32 %v1039_v9, %v95_v8  ;;  %v27_v25 = vld [vmem:[%s2156_s0 + $0x20] sm:$0xff]  ;;  %v973_v42 = vld [vmem:[%s2155_s3 + $0x10] sm:$0xff]   ;;  %v30_v47 = vld [vmem:[%s2156_s0 + $0x38] sm:$0xff] }
   0x8   :  { %876 = vmatprep.subr.bf16.mxu0 %v970_v2  ;;  %954 = vmatprep.subr.bf16.mxu1 %v970_v2  ;;  %v198_v23 = vadd.f32 %v1039_v9, %v127_v13  ;;  %v1074_v28 = vadd.f32 %v1039_v9, %v96_v19  ;;  %v1081_v33 = vadd.f32 %v1039_v9, %v97_v24  ;;  %v59_v35 = vld [vmem:[%s2156_s0 + $0x120] sm:$0xff]  ;;  %v61_v52 = vld [vmem:[%s2156_s0 + $0x130] sm:$0xff]  ;;  %v62_v56 = vld [vmem:[%s2156_s0 + $0x138] sm:$0xff] }
   0x9   :  { %v197_v22 = vadd.f32 %v1039_v9, %v126_v12  ;;  %v229_v26 = vmax.f32 %v165_v17, 0.0  ;;  %v230_v27 = vmax.f32 %v166_v18, 0.0  ;;  %v1098_v39 = vadd.f32 %v1039_v9, %v128_v29  ;;  %v31_v61 = vld [vmem:[%s2156_s0 + $0x40] sm:$0xff]  ;;  %v974_v62 = vld [vmem:[%s2155_s3 + $0x8] sm:$0xff]   ;;  %v33_v14 = vld [vmem:[%s2156_s0 + $0x50] sm:$0xff] }
   0xa   :  { %v262_v32 = vmax.f32 %v198_v23, 0.0  ;;  %v231_v38 = vmax.f32 %v1074_v28, 0.0  ;;  %v98_v40 = vmul.f32 %v1032_v6, %v27_v25  ;;  %v232_v44 = vmax.f32 %v1081_v33, 0.0  ;;  %v63_v8 = vld [vmem:[%s2156_s0 + $0x140] sm:$0xff]  ;;  %v64_v10 = vld [vmem:[%s2156_s0 + $0x148] sm:$0xff]  ;;  %v34_v18 = vld [vmem:[%s2156_s0 + $0x58] sm:$0xff] }
   0xb   :  { %877 = vmatpush3.bf16.msra.mxu0 %v970_v2  ;;  %962 = vmatpush3.bf16.msra.mxu1 %v970_v2  ;;  %v261_v31 = vmax.f32 %v197_v22, 0.0  ;;  %293 = vst [vmem:[%s2159_s5] sm:$0xff] %v229_v26  ;;  %294 = vst [vmem:[%s2159_s5 + $0x8] sm:$0xff] %v230_v27  ;;  %v357_v37 = vpack.c.bf16 %v230_v27, %v229_v26  ;;  %v1115_v45 = vadd.f32 %v1039_v9, %v129_v34  ;;  %v32_v2 = vld [vmem:[%s2156_s0 + $0x48] sm:$0xff]  ;;  %v975_v19 = vld [vmem:[%s2155_s3] sm:$0xff]  }
   0xc   :  { %878 = vmatprep.subr.bf16.mxu0 %v971_v3  ;;  %955 = vmatprep.subr.bf16.mxu1 %v971_v3  ;;  %326 = vst [vmem:[%s2159_s5 + $0x108] sm:$0xff] %v262_v32  ;;  %295 = vst [vmem:[%s2159_s5 + $0x10] sm:$0xff] %v231_v38  ;;  %v263_v48 = vmax.f32 %v1098_v39, 0.0  ;;  %v1128_v49 = vadd.f32 %v1039_v9, %v98_v40  ;;  %v130_v50 = vmul.f32 %v1032_v6, %v59_v35  ;;  %v65_v24 = vld [vmem:[%s2156_s0 + $0x150] sm:$0xff]  ;;  %v66_v30 = vld [vmem:[%s2156_s0 + $0x158] sm:$0xff] }
   0xd   :  { %325 = vst [vmem:[%s2159_s5 + $0x100] sm:$0xff] %v261_v31  ;;  %v373_v43 = vpack.c.bf16 %v262_v32, %v261_v31  ;;  %888 = vmatprep.mubr.bf16.mxu0 %v357_v37  ;;  %v131_v51 = vmul.f32 %v1032_v6, %v60_v36  ;;  %296 = vst [vmem:[%s2159_s5 + $0x18] sm:$0xff] %v232_v44  ;;  %v264_v53 = vmax.f32 %v1115_v45, 0.0  ;;  %v35_v34 = vld [vmem:[%s2156_s0 + $0x60] sm:$0xff]  ;;  %v36_v39 = vld [vmem:[%s2156_s0 + $0x68] sm:$0xff] }
   0xe   :  { %v1140_v54 = vadd.f32 %v1039_v9, %v99_v46  ;;  %v100_v55 = vmul.f32 %v1032_v6, %v29_v41  ;;  %327 = vst [vmem:[%s2159_s5 + $0x110] sm:$0xff] %v263_v48  ;;  %v233_v57 = vmax.f32 %v1128_v49, 0.0  ;;  %v1153_v58 = vadd.f32 %v1039_v9, %v130_v50  ;;  %v68_v45 = vld [vmem:[%s2156_s0 + $0x168] sm:$0xff] }
   0xf   :  { %879 = vmatpush3.bf16.msra.mxu0 %v971_v3  ;;  %963 = vmatpush3.bf16.msra.mxu1 %v971_v3  ;;  %v1156_v59 = vadd.f32 %v1039_v9, %v131_v51  ;;  %v101_v60 = vmul.f32 %v1032_v6, %v30_v47  ;;  %328 = vst [vmem:[%s2159_s5 + $0x118] sm:$0xff] %v264_v53  ;;  %v37_v51 = vld [vmem:[%s2156_s0 + $0x70] sm:$0xff] }
  0x10   :  { %880 = vmatprep.subr.bf16.mxu0 %v972_v21  ;;  %956 = vmatprep.subr.bf16.mxu1 %v972_v21  ;;  %v234_v63 = vmax.f32 %v1140_v54, 0.0  ;;  %v1172_v0 = vadd.f32 %v1039_v9, %v100_v55  ;;  %v132_v1 = vmul.f32 %v1032_v6, %v61_v52  ;;  %297 = vst [vmem:[%s2159_s5 + $0x20] sm:$0xff] %v233_v57  ;;  %v265_v3 = vmax.f32 %v1153_v58, 0.0  ;;  %v38_v55 = vld [vmem:[%s2156_s0 + $0x78] sm:$0xff] }
  0x11   :  { %920 = vmatprep.mubr.bf16.mxu1 %v373_v43  ;;  %v266_v4 = vmax.f32 %v1156_v59, 0.0  ;;  %v1186_v5 = vadd.f32 %v1039_v9, %v101_v60  ;;  %v133_v7 = vmul.f32 %v1032_v6, %v62_v56  ;;  %v102_v13 = vmul.f32 %v1032_v6, %v31_v61  ;;  %v69_v60 = vld [vmem:[%s2156_s0 + $0x170] sm:$0xff] }
  0x12   :  { %298 = vst [vmem:[%s2159_s5 + $0x28] sm:$0xff] %v234_v63  ;;  %v235_v11 = vmax.f32 %v1172_v0, 0.0  ;;  %v1200_v12 = vadd.f32 %v1039_v9, %v132_v1  ;;  %329 = vst [vmem:[%s2159_s5 + $0x120] sm:$0xff] %v265_v3  ;;  %v103_v17 = vmul.f32 %v1032_v6, %v32_v2  ;;  %v134_v22 = vmul.f32 %v1032_v6, %v63_v8  ;;  %v70_v1 = vld [vmem:[%s2156_s0 + $0x178] sm:$0xff]  ;;  %v39_v8 = vld [vmem:[%s2156_s0 + $0x80] sm:$0xff] }
  0x13   :  { %881 = vmatpush3.bf16.msra.mxu0 %v972_v21  ;;  %964 = vmatpush3.bf16.msra.mxu1 %v972_v21  ;;  %330 = vst [vmem:[%s2159_s5 + $0x128] sm:$0xff] %v266_v4  ;;  %v236_v15 = vmax.f32 %v1186_v5, 0.0  ;;  %v1216_v16 = vadd.f32 %v1039_v9, %v133_v7  ;;  %v1232_v21 = vadd.f32 %v1039_v9, %v102_v13  ;;  %v40_v0 = vld [vmem:[%s2156_s0 + $0x88] sm:$0xff] }
  0x14   :  { %882 = vmatprep.subr.bf16.mxu0 %v973_v42  ;;  %957 = vmatprep.subr.bf16.mxu1 %v973_v42  ;;  %299 = vst [vmem:[%s2159_s5 + $0x30] sm:$0xff] %v235_v11  ;;  %v267_v20 = vmax.f32 %v1200_v12, 0.0  ;;  %v135_v23 = vmul.f32 %v1032_v6, %v64_v10  ;;  %v358_v25 = vpack.c.bf16 %v232_v44, %v231_v38  ;;  %v67_v44 = vld [vmem:[%s2156_s0 + $0x160] sm:$0xff]  ;;  %v41_v12 = vld [vmem:[%s2156_s0 + $0x90] sm:$0xff] }
  0x15   :  { %300 = vst [vmem:[%s2159_s5 + $0x38] sm:$0xff] %v236_v15  ;;  %v268_v26 = vmax.f32 %v1216_v16, 0.0  ;;  %v1248_v27 = vadd.f32 %v1039_v9, %v103_v17  ;;  %v104_v29 = vmul.f32 %v1032_v6, %v33_v14  ;;  %v237_v28 = vmax.f32 %v1232_v21, 0.0 }
  0x16   :  { %331 = vst [vmem:[%s2159_s5 + $0x130] sm:$0xff] %v267_v20  ;;  %v1261_v31 = vadd.f32 %v1039_v9, %v134_v22  ;;  %v1264_v32 = vadd.f32 %v1039_v9, %v135_v23  ;;  %v105_v33 = vmul.f32 %v1032_v6, %v34_v18  ;;  %v374_v35 = vpack.c.bf16 %v264_v53, %v263_v48  ;;  %v72_v22 = vld [vmem:[%s2156_s0 + $0x188] sm:$0xff] }
  0x17   :  { %883 = vmatpush3.bf16.msra.mxu0 %v973_v42  ;;  %965 = vmatpush3.bf16.msra.mxu1 %v973_v42  ;;  %332 = vst [vmem:[%s2159_s5 + $0x138] sm:$0xff] %v268_v26  ;;  %v238_v36 = vmax.f32 %v1248_v27, 0.0  ;;  %v1281_v37 = vadd.f32 %v1039_v9, %v104_v29  ;;  %v136_v38 = vmul.f32 %v1032_v6, %v65_v24  ;;  %301 = vst [vmem:[%s2159_s5 + $0x40] sm:$0xff] %v237_v28  ;;  %v42_v27 = vld [vmem:[%s2156_s0 + $0x98] sm:$0xff] }
  0x18   :  { %884 = vmatprep.subr.bf16.mxu0 %v974_v62  ;;  %958 = vmatprep.subr.bf16.mxu1 %v974_v62  ;;  %v269_v40 = vmax.f32 %v1261_v31, 0.0  ;;  %v270_v41 = vmax.f32 %v1264_v32, 0.0  ;;  %v1295_v42 = vadd.f32 %v1039_v9, %v105_v33  ;;  %v137_v43 = vmul.f32 %v1032_v6, %v66_v30  ;;  %v74_v31 = vld [vmem:[%s2156_s0 + $0x198] sm:$0xff] }
  0x19   :  { %v359_v46 = vpack.c.bf16 %v234_v63, %v233_v57  ;;  %302 = vst [vmem:[%s2159_s5 + $0x48] sm:$0xff] %v238_v36  ;;  %v239_v47 = vmax.f32 %v1281_v37, 0.0  ;;  %v1313_v48 = vadd.f32 %v1039_v9, %v136_v38  ;;  %v106_v50 = vmul.f32 %v1032_v6, %v35_v34  ;;  %v44_v37 = vld [vmem:[%s2156_s0 + $0xa8] sm:$0xff] }
  0x1a   :  { %v375_v49 = vpack.c.bf16 %v266_v4, %v265_v3  ;;  %333 = vst [vmem:[%s2159_s5 + $0x140] sm:$0xff] %v269_v40  ;;  %334 = vst [vmem:[%s2159_s5 + $0x148] sm:$0xff] %v270_v41  ;;  %v240_v52 = vmax.f32 %v1295_v42, 0.0  ;;  %v1333_v53 = vadd.f32 %v1039_v9, %v137_v43  ;;  %v107_v54 = vmul.f32 %v1032_v6, %v36_v39 }
  0x1b   :  { %885 = vmatpush3.bf16.msra.mxu0 %v974_v62  ;;  %966 = vmatpush3.bf16.msra.mxu1 %v974_v62  ;;  %303 = vst [vmem:[%s2159_s5 + $0x50] sm:$0xff] %v239_v47  ;;  %v271_v56 = vmax.f32 %v1313_v48, 0.0  ;;  %v1346_v57 = vadd.f32 %v1039_v9, %v106_v50  ;;  %v138_v58 = vmul.f32 %v1032_v6, %v67_v44  ;;  %v45_v48 = vld [vmem:[%s2156_s0 + $0xb0] sm:$0xff] }
  0x1c   :  { %886 = vmatprep.subr.bf16.mxu0 %v975_v19  ;;  %959 = vmatprep.subr.bf16.mxu1 %v975_v19  ;;  %v139_v59 = vmul.f32 %v1032_v6, %v68_v45  ;;  %304 = vst [vmem:[%s2159_s5 + $0x58] sm:$0xff] %v240_v52  ;;  %v272_v61 = vmax.f32 %v1333_v53, 0.0  ;;  %v1360_v62 = vadd.f32 %v1039_v9, %v107_v54  ;;  %v43_v45 = vld [vmem:[%s2156_s0 + $0xa0] sm:$0xff] }
  0x1d   :  { %v108_v63 = vmul.f32 %v1032_v6, %v37_v51  ;;  %335 = vst [vmem:[%s2159_s5 + $0x150] sm:$0xff] %v271_v56  ;;  %v241_v2 = vmax.f32 %v1346_v57, 0.0  ;;  %v1373_v3 = vadd.f32 %v1039_v9, %v138_v58  ;;  %v109_v7 = vmul.f32 %v1032_v6, %v38_v55  ;;  %v75_v55 = vld [vmem:[%s2156_s0 + $0x1a0] sm:$0xff]  ;;  %v76_v58 = vld [vmem:[%s2156_s0 + $0x1a8] sm:$0xff] }
  0x1e   :  { %v1376_v4 = vadd.f32 %v1039_v9, %v139_v59  ;;  %v360_v10 = vpack.c.bf16 %v236_v15, %v235_v11  ;;  %336 = vst [vmem:[%s2159_s5 + $0x158] sm:$0xff] %v272_v61  ;;  %v242_v13 = vmax.f32 %v1360_v62, 0.0  ;;  %v140_v17 = vmul.f32 %v1032_v6, %v69_v60  ;;  %v46_v62 = vld [vmem:[%s2156_s0 + $0xb8] sm:$0xff] }
  0x1f   :  { %887 = vmatpush3.bf16.msra.mxu0 %v975_v19  ;;  %967 = vmatpush3.bf16.msra.mxu1 %v975_v19  ;;  %v1393_v14 = vadd.f32 %v1039_v9, %v108_v63  ;;  %305 = vst [vmem:[%s2159_s5 + $0x60] sm:$0xff] %v241_v2  ;;  %v273_v5 = vmax.f32 %v1373_v3, 0.0  ;;  %v1407_v15 = vadd.f32 %v1039_v9, %v109_v7  ;;  %v71_v19 = vld [vmem:[%s2156_s0 + $0x180] sm:$0xff]  ;;  %v78_v3 = vld [vmem:[%s2156_s0 + $0x1b8] sm:$0xff] }
  0x20   :  { %v274_v11 = vmax.f32 %v1376_v4, 0.0  ;;  %v141_v18 = vmul.f32 %v1032_v6, %v70_v1  ;;  %v376_v23 = vpack.c.bf16 %v268_v26, %v267_v20  ;;  %306 = vst [vmem:[%s2159_s5 + $0x68] sm:$0xff] %v242_v13  ;;  %v110_v29 = vmul.f32 %v1032_v6, %v39_v8 }
  0x21   :  { %v243_v24 = vmax.f32 %v1393_v14, 0.0  ;;  %v361_v16 = vpack.c.bf16 %v238_v36, %v237_v28  ;;  %337 = vst [vmem:[%s2159_s5 + $0x160] sm:$0xff] %v273_v5  ;;  %v244_v20 = vmax.f32 %v1407_v15, 0.0  ;;  %v111_v21 = vmul.f32 %v1032_v6, %v40_v0  ;;  %v49_v14 = vld [vmem:[%s2156_s0 + $0xd0] sm:$0xff] }
  0x22   :  { %889 = vmatmul.mubr.bf16.vlgmr.msra.gmra.mxu0 %v358_v25  ;;  %921 = vmatmul.mubr.bf16.vlgmr.msra.gmra.mxu1 %v374_v35  ;;  %v1427_v25 = vadd.f32 %v1039_v9, %v140_v17  ;;  %338 = vst [vmem:[%s2159_s5 + $0x168] sm:$0xff] %v274_v11  ;;  %v1449_v26 = vadd.f32 %v1039_v9, %v141_v18  ;;  %v73_v35 = vld [vmem:[%s2156_s0 + $0x190] sm:$0xff] }
  0x23   :  { %892 = vmatprep.mubr.bf16.mxu0 %v359_v46  ;;  %924 = vmatprep.mubr.bf16.mxu1 %v375_v49  ;;  %307 = vst [vmem:[%s2159_s5 + $0x70] sm:$0xff] %v243_v24  ;;  %v1462_v28 = vadd.f32 %v1039_v9, %v110_v29  ;;  %v142_v33 = vmul.f32 %v1032_v6, %v71_v19  ;;  %308 = vst [vmem:[%s2159_s5 + $0x78] sm:$0xff] %v244_v20 }
  0x24   :  { %v275_v30 = vmax.f32 %v1427_v25, 0.0  ;;  %v143_v34 = vmul.f32 %v1032_v6, %v72_v22  ;;  %v377_v36 = vpack.c.bf16 %v270_v41, %v269_v40  ;;  %v276_v38 = vmax.f32 %v1449_v26, 0.0  ;;  %v50_v26 = vld [vmem:[%s2156_s0 + $0xd8] sm:$0xff] }
  0x25   :  { %v1480_v39 = vadd.f32 %v1039_v9, %v111_v21  ;;  %v112_v43 = vmul.f32 %v1032_v6, %v41_v12  ;;  %v245_v32 = vmax.f32 %v1462_v28, 0.0  ;;  %v1493_v40 = vadd.f32 %v1039_v9, %v142_v33  ;;  %v48_v21 = vld [vmem:[%s2156_s0 + $0xc8] sm:$0xff]  ;;  %v82_v28 = vld [vmem:[%s2156_s0 + $0x1d8] sm:$0xff] }
  0x26   :  { %339 = vst [vmem:[%s2159_s5 + $0x170] sm:$0xff] %v275_v30  ;;  %v1496_v41 = vadd.f32 %v1039_v9, %v143_v34  ;;  %v113_v44 = vmul.f32 %v1032_v6, %v42_v27  ;;  %v362_v46 = vpack.c.bf16 %v240_v52, %v239_v47  ;;  %340 = vst [vmem:[%s2159_s5 + $0x178] sm:$0xff] %v276_v38 }
  0x27   :  { %v246_v50 = vmax.f32 %v1480_v39, 0.0  ;;  %v1513_v51 = vadd.f32 %v1039_v9, %v112_v43  ;;  %v144_v49 = vmul.f32 %v1032_v6, %v73_v35  ;;  %309 = vst [vmem:[%s2159_s5 + $0x80] sm:$0xff] %v245_v32  ;;  %v277_v42 = vmax.f32 %v1493_v40, 0.0  ;;  %v80_v43 = vld [vmem:[%s2156_s0 + $0x1c8] sm:$0xff] }
  0x28   :  { %v278_v47 = vmax.f32 %v1496_v41, 0.0  ;;  %v1527_v52 = vadd.f32 %v1039_v9, %v113_v44  ;;  %v145_v54 = vmul.f32 %v1032_v6, %v74_v31  ;;  %v378_v59 = vpack.c.bf16 %v272_v61, %v271_v56  ;;  %v52_v40 = vld [vmem:[%s2156_s0 + $0xe8] sm:$0xff] }
  0x29   :  { %310 = vst [vmem:[%s2159_s5 + $0x88] sm:$0xff] %v246_v50  ;;  %v247_v60 = vmax.f32 %v1513_v51, 0.0  ;;  %v1547_v63 = vadd.f32 %v1039_v9, %v144_v49  ;;  %v114_v1 = vmul.f32 %v1032_v6, %v43_v45  ;;  %v363_v53 = vpack.c.bf16 %v242_v13, %v241_v2  ;;  %341 = vst [vmem:[%s2159_s5 + $0x180] sm:$0xff] %v277_v42  ;;  %v77_v13 = vld [vmem:[%s2156_s0 + $0x1b0] sm:$0xff] }
  0x2a   :  { %893 = vmatmul.mubr.bf16.gmra.mxu0 %v360_v10  ;;  %925 = vmatmul.mubr.bf16.gmra.mxu1 %v376_v23  ;;  %342 = vst [vmem:[%s2159_s5 + $0x188] sm:$0xff] %v278_v47  ;;  %v248_v56 = vmax.f32 %v1527_v52, 0.0  ;;  %v1569_v61 = vadd.f32 %v1039_v9, %v145_v54  ;;  %v115_v57 = vmul.f32 %v1032_v6, %v44_v37  ;;  %v47_v23 = vld [vmem:[%s2156_s0 + $0xc0] sm:$0xff]  ;;  %v81_v54 = vld [vmem:[%s2156_s0 + $0x1d0] sm:$0xff] }
  0x2b   :  { %896 = vmatprep.mubr.bf16.mxu0 %v361_v16  ;;  %928 = vmatprep.mubr.bf16.mxu1 %v377_v36  ;;  %311 = vst [vmem:[%s2159_s5 + $0x90] sm:$0xff] %v247_v60  ;;  %v279_v2 = vmax.f32 %v1547_v63, 0.0  ;;  %v1582_v7 = vadd.f32 %v1039_v9, %v114_v1  ;;  %v146_v8 = vmul.f32 %v1032_v6, %v75_v55  ;;  %v79_v36 = vld [vmem:[%s2156_s0 + $0x1c0] sm:$0xff]  ;;  %v53_v51 = vld [vmem:[%s2156_s0 + $0xf0] sm:$0xff] }
  0x2c   :  { %v147_v10 = vmul.f32 %v1032_v6, %v76_v58  ;;  %v379_v17 = vpack.c.bf16 %v274_v11, %v273_v5  ;;  %312 = vst [vmem:[%s2159_s5 + $0x98] sm:$0xff] %v248_v56  ;;  %v280_v0 = vmax.f32 %v1569_v61, 0.0  ;;  %v1600_v18 = vadd.f32 %v1039_v9, %v115_v57  ;;  %v54_v61 = vld [vmem:[%s2156_s0 + $0xf8] sm:$0xff] }
  0x2d   :  { %v116_v19 = vmul.f32 %v1032_v6, %v45_v48  ;;  %343 = vst [vmem:[%s2159_s5 + $0x190] sm:$0xff] %v279_v2  ;;  %v249_v4 = vmax.f32 %v1582_v7, 0.0  ;;  %v1613_v5 = vadd.f32 %v1039_v9, %v146_v8  ;;  %v117_v22 = vmul.f32 %v1032_v6, %v46_v62 }
  0x2e   :  { %v1616_v11 = vadd.f32 %v1039_v9, %v147_v10  ;;  %344 = vst [vmem:[%s2159_s5 + $0x198] sm:$0xff] %v280_v0  ;;  %v250_v29 = vmax.f32 %v1600_v18, 0.0  ;;  %v148_v16 = vmul.f32 %v1032_v6, %v77_v13  ;;  %v149_v35 = vmul.f32 %v1032_v6, %v78_v3 }
  0x2f   :  { %v1629_v12 = vadd.f32 %v1039_v9, %v116_v19  ;;  %313 = vst [vmem:[%s2159_s5 + $0xa0] sm:$0xff] %v249_v4  ;;  %v281_v27 = vmax.f32 %v1613_v5, 0.0  ;;  %v1643_v34 = vadd.f32 %v1039_v9, %v117_v22  ;;  %v364_v31 = vpack.c.bf16 %v244_v20, %v243_v24  ;;  %v84_v19 = vld [vmem:[%s2156_s0 + $0x1e8] sm:$0xff] }
  0x30   :  { %v282_v33 = vmax.f32 %v1616_v11, 0.0  ;;  %314 = vst [vmem:[%s2159_s5 + $0xa8] sm:$0xff] %v250_v29  ;;  %v1663_v45 = vadd.f32 %v1039_v9, %v148_v16  ;;  %v118_v49 = vmul.f32 %v1032_v6, %v47_v23  ;;  %v380_v15 = vpack.c.bf16 %v276_v38, %v275_v30 }
  0x31   :  { %v251_v44 = vmax.f32 %v1629_v12, 0.0  ;;  %345 = vst [vmem:[%s2159_s5 + $0x1a0] sm:$0xff] %v281_v27  ;;  %v252_v24 = vmax.f32 %v1643_v34, 0.0  ;;  %v1685_v20 = vadd.f32 %v1039_v9, %v149_v35  ;;  %v119_v25 = vmul.f32 %v1032_v6, %v48_v21 }
  0x32   :  { %897 = vmatmul.mubr.bf16.gmra.mxu0 %v362_v46  ;;  %929 = vmatmul.mubr.bf16.gmra.mxu1 %v378_v59  ;;  %346 = vst [vmem:[%s2159_s5 + $0x1a8] sm:$0xff] %v282_v33  ;;  %v283_v30 = vmax.f32 %v1663_v45, 0.0  ;;  %v1698_v38 = vadd.f32 %v1039_v9, %v118_v49  ;;  %v150_v46 = vmul.f32 %v1032_v6, %v79_v36  ;;  %v85_v36 = vld [vmem:[%s2156_s0 + $0x1f0] sm:$0xff] }
  0x33   :  { %900 = vmatprep.mubr.bf16.mxu0 %v363_v53  ;;  %932 = vmatprep.mubr.bf16.mxu1 %v379_v17  ;;  %315 = vst [vmem:[%s2159_s5 + $0xb0] sm:$0xff] %v251_v44  ;;  %v151_v37 = vmul.f32 %v1032_v6, %v80_v43  ;;  %v365_v55 = vpack.c.bf16 %v246_v50, %v245_v32  ;;  %316 = vst [vmem:[%s2159_s5 + $0xb8] sm:$0xff] %v252_v24  ;;  %v284_v58 = vmax.f32 %v1685_v20, 0.0  ;;  %v51_v53 = vld [vmem:[%s2156_s0 + $0xe0] sm:$0xff] }
  0x34   :  { %v1716_v59 = vadd.f32 %v1039_v9, %v119_v25  ;;  %v120_v1 = vmul.f32 %v1032_v6, %v49_v14  ;;  %347 = vst [vmem:[%s2159_s5 + $0x1b0] sm:$0xff] %v283_v30  ;;  %v253_v39 = vmax.f32 %v1698_v38, 0.0  ;;  %v1729_v32 = vadd.f32 %v1039_v9, %v150_v46  ;;  %v83_v17 = vld [vmem:[%s2156_s0 + $0x1e0] sm:$0xff] }
  0x35   :  { %v1732_v50 = vadd.f32 %v1039_v9, %v151_v37  ;;  %v121_v48 = vmul.f32 %v1032_v6, %v50_v26  ;;  %v381_v57 = vpack.c.bf16 %v278_v47, %v277_v42  ;;  %348 = vst [vmem:[%s2159_s5 + $0x1b8] sm:$0xff] %v284_v58  ;;  %v152_v10 = vmul.f32 %v1032_v6, %v81_v54 }
  0x36   :  { %v254_v62 = vmax.f32 %v1716_v59, 0.0  ;;  %v1749_v8 = vadd.f32 %v1039_v9, %v120_v1  ;;  %317 = vst [vmem:[%s2159_s5 + $0xc0] sm:$0xff] %v253_v39  ;;  %v285_v41 = vmax.f32 %v1729_v32, 0.0  ;;  %v153_v13 = vmul.f32 %v1032_v6, %v82_v28 }
  0x37   :  { %v286_v42 = vmax.f32 %v1732_v50, 0.0  ;;  %v1763_v47 = vadd.f32 %v1039_v9, %v121_v48  ;;  %v366_v3 = vpack.c.bf16 %v248_v56, %v247_v60  ;;  %v1783_v23 = vadd.f32 %v1039_v9, %v152_v10 }
  0x38   :  { %318 = vst [vmem:[%s2159_s5 + $0xc8] sm:$0xff] %v254_v62  ;;  %v255_v22 = vmax.f32 %v1749_v8, 0.0  ;;  %v122_v16 = vmul.f32 %v1032_v6, %v51_v53  ;;  %v382_v52 = vpack.c.bf16 %v280_v0, %v279_v2  ;;  %349 = vst [vmem:[%s2159_s5 + $0x1c0] sm:$0xff] %v285_v41  ;;  %v224_v56 = vadd.f32 %v1039_v9, %v153_v13 }
  0x39   :  { %350 = vst [vmem:[%s2159_s5 + $0x1c8] sm:$0xff] %v286_v42  ;;  %v256_v60 = vmax.f32 %v1763_v47, 0.0  ;;  %v123_v63 = vmul.f32 %v1032_v6, %v52_v40  ;;  %v287_v2 = vmax.f32 %v1783_v23, 0.0  ;;  %v154_v21 = vmul.f32 %v1032_v6, %v83_v17 }
  0x3a   :  { %901 = vmatmul.mubr.bf16.gmra.mxu0 %v364_v31  ;;  %933 = vmatmul.mubr.bf16.gmra.mxu1 %v380_v15  ;;  %319 = vst [vmem:[%s2159_s5 + $0xd0] sm:$0xff] %v255_v22  ;;  %v193_v0 = vadd.f32 %v1039_v9, %v122_v16  ;;  %v155_v35 = vmul.f32 %v1032_v6, %v84_v19  ;;  %v288_v31 = vmax.f32 %v224_v56, 0.0  ;;  %v86_v15 = vld [vmem:[%s2156_s0 + $0x1f8] sm:$0xff] }
  0x3b   :  { %904 = vmatprep.mubr.bf16.mxu0 %v365_v55  ;;  %936 = vmatprep.mubr.bf16.mxu1 %v381_v57  ;;  %v367_v43 = vpack.c.bf16 %v250_v29, %v249_v4  ;;  %320 = vst [vmem:[%s2159_s5 + $0xd8] sm:$0xff] %v256_v60  ;;  %v194_v49 = vadd.f32 %v1039_v9, %v123_v63  ;;  %351 = vst [vmem:[%s2159_s5 + $0x1d0] sm:$0xff] %v287_v2 }
  0x3c   :  { %v124_v14 = vmul.f32 %v1032_v6, %v53_v51  ;;  %v257_v7 = vmax.f32 %v193_v0, 0.0  ;;  %v225_v18 = vadd.f32 %v1039_v9, %v154_v21  ;;  %v226_v4 = vadd.f32 %v1039_v9, %v155_v35  ;;  %352 = vst [vmem:[%s2159_s5 + $0x1d8] sm:$0xff] %v288_v31 }
  0x3d   :  { %v125_v29 = vmul.f32 %v1032_v6, %v54_v61  ;;  %v383_v25 = vpack.c.bf16 %v282_v33, %v281_v27  ;;  %v258_v26 = vmax.f32 %v194_v49, 0.0  ;;  %v156_v37 = vmul.f32 %v1032_v6, %v85_v36 }
  0x3e   :  { %v195_v46 = vadd.f32 %v1039_v9, %v124_v14  ;;  %321 = vst [vmem:[%s2159_s5 + $0xe0] sm:$0xff] %v257_v7  ;;  %v289_v54 = vmax.f32 %v225_v18, 0.0  ;;  %v290_v55 = vmax.f32 %v226_v4, 0.0  ;;  %v157_v11 = vmul.f32 %v1032_v6, %v86_v15 }
  0x3f   :  { %v196_v5 = vadd.f32 %v1039_v9, %v125_v29  ;;  %322 = vst [vmem:[%s2159_s5 + $0xe8] sm:$0xff] %v258_v26  ;;  %v227_v33 = vadd.f32 %v1039_v9, %v156_v37  ;;  %v384_v53 = vpack.c.bf16 %v284_v58, %v283_v30  ;;  %v369_v57 = vpack.c.bf16 %v254_v62, %v253_v39  ;;  %v1897_v30 = vld [vmem:[%s2160_s4] ss:$0 sm:$0xff] }
  0x40   :  { %v259_v27 = vmax.f32 %v195_v46, 0.0  ;;  %353 = vst [vmem:[%s2159_s5 + $0x1e0] sm:$0xff] %v289_v54  ;;  %354 = vst [vmem:[%s2159_s5 + $0x1e8] sm:$0xff] %v290_v55  ;;  %v228_v28 = vadd.f32 %v1039_v9, %v157_v11  ;;  %v368_v9 = vpack.c.bf16 %v252_v24, %v251_v44  ;;  %v385_v10 = vpack.c.bf16 %v286_v42, %v285_v41 }
  0x41   :  { %v260_v1 = vmax.f32 %v196_v5, 0.0  ;;  %v291_v6 = vmax.f32 %v227_v33, 0.0  ;;  %v370_v12 = vpack.c.bf16 %v256_v60, %v255_v22  ;;  %v386_v34 = vpack.c.bf16 %v288_v31, %v287_v2 }
  0x42   :  { %905 = vmatmul.mubr.bf16.gmra.mxu0 %v366_v3  ;;  %937 = vmatmul.mubr.bf16.gmra.mxu1 %v382_v52  ;;  %323 = vst [vmem:[%s2159_s5 + $0xf0] sm:$0xff] %v259_v27  ;;  %v292_v48 = vmax.f32 %v228_v28, 0.0  ;;  %v371_v44 = vpack.c.bf16 %v258_v26, %v257_v7  ;;  %v387_v45 = vpack.c.bf16 %v290_v55, %v289_v54 }
  0x43   :  { %908 = vmatprep.mubr.bf16.mxu0 %v367_v43  ;;  %940 = vmatprep.mubr.bf16.mxu1 %v383_v25  ;;  %324 = vst [vmem:[%s2159_s5 + $0xf8] sm:$0xff] %v260_v1  ;;  %355 = vst [vmem:[%s2159_s5 + $0x1f0] sm:$0xff] %v291_v6  ;;  %v372_v24 = vpack.c.bf16 %v260_v1, %v259_v27 }
  0x44   :  { %356 = vst [vmem:[%s2159_s5 + $0x1f8] sm:$0xff] %v292_v48  ;;  %v388_v20 = vpack.c.bf16 %v292_v48, %v291_v6 }
  0x4a   :  { %909 = vmatmul.mubr.bf16.gmra.mxu0 %v368_v9  ;;  %941 = vmatmul.mubr.bf16.gmra.mxu1 %v384_v53 }
  0x4b   :  { %912 = vmatprep.mubr.bf16.mxu0 %v369_v57  ;;  %944 = vmatprep.mubr.bf16.mxu1 %v385_v10 }
  0x52   :  { %913 = vmatmul.mubr.bf16.gmra.mxu0 %v370_v12  ;;  %945 = vmatmul.mubr.bf16.gmra.mxu1 %v386_v34 }
  0x53   :  { %916 = vmatprep.mubr.bf16.mxu0 %v371_v44  ;;  %948 = vmatprep.mubr.bf16.mxu1 %v387_v45 }
  0x5a   :  { %917 = vmatmul.mubr.bf16.gmra.mxu0 %v372_v24  ;;  %949 = vmatmul.mubr.bf16.gmra.mxu1 %v388_v20 }
  0xe2   :  { %v890_v38 = vpop.f32.mrf.mxu0  ;;  %v922_v58 = vpop.f32.mrf.mxu1 }
  0xe3   :  { %v503_v59 = vadd.f32 %v890_v38, %v1897_v30  ;;  %v631_v39 = vadd.f32 %v922_v58, %v1897_v30 }
  0xe4   :  { %v494_v32 = vpop.f32.mrf.mxu0  ;;  %v622_v50 = vpop.f32.mrf.mxu1 }
  0xe5   :  { %751 = vst [vmem:[%s2161_s6 + $0x10] sm:$0xff] %v503_v59  ;;  %783 = vst [vmem:[%s2161_s6 + $0x110] sm:$0xff] %v631_v39  ;;  %v495_v62 = vadd.f32 %v1897_v30, %v494_v32  ;;  %v623_v8 = vadd.f32 %v1897_v30, %v622_v50 }
  0xe6   :  { %v891_v40 = vpop.f32.mrf.mxu0  ;;  %v923_v41 = vpop.f32.mrf.mxu1 }
  0xe7   :  { %749 = vst [vmem:[%s2161_s6] sm:$0xff] %v495_v62  ;;  %781 = vst [vmem:[%s2161_s6 + $0x100] sm:$0xff] %v623_v8  ;;  %v506_v42 = vadd.f32 %v891_v40, %v1897_v30  ;;  %v634_v47 = vadd.f32 %v923_v41, %v1897_v30 }
  0xe8   :  { %v497_v13 = vpop.f32.mrf.mxu0  ;;  %v625_v17 = vpop.f32.mrf.mxu1 }
  0xe9   :  { %752 = vst [vmem:[%s2161_s6 + $0x18] sm:$0xff] %v506_v42  ;;  %784 = vst [vmem:[%s2161_s6 + $0x118] sm:$0xff] %v634_v47  ;;  %v498_v19 = vadd.f32 %v1897_v30, %v497_v13  ;;  %v626_v3 = vadd.f32 %v1897_v30, %v625_v17 }
  0xea   :  { %v894_v22 = vpop.f32.mrf.mxu0  ;;  %v926_v23 = vpop.f32.mrf.mxu1 }
  0xeb   :  { %750 = vst [vmem:[%s2161_s6 + $0x8] sm:$0xff] %v498_v19  ;;  %782 = vst [vmem:[%s2161_s6 + $0x108] sm:$0xff] %v626_v3  ;;  %v519_v16 = vadd.f32 %v894_v22, %v1897_v30  ;;  %v647_v51 = vadd.f32 %v926_v23, %v1897_v30 }
  0xec   :  { %v510_v52 = vpop.f32.mrf.mxu0  ;;  %v638_v60 = vpop.f32.mrf.mxu1 }
  0xed   :  { %755 = vst [vmem:[%s2161_s6 + $0x30] sm:$0xff] %v519_v16  ;;  %787 = vst [vmem:[%s2161_s6 + $0x130] sm:$0xff] %v647_v51  ;;  %v511_v56 = vadd.f32 %v1897_v30, %v510_v52  ;;  %v639_v63 = vadd.f32 %v1897_v30, %v638_v60 }
  0xee   :  { %v895_v61 = vpop.f32.mrf.mxu0  ;;  %v927_v2 = vpop.f32.mrf.mxu1 }
  0xef   :  { %753 = vst [vmem:[%s2161_s6 + $0x20] sm:$0xff] %v511_v56  ;;  %785 = vst [vmem:[%s2161_s6 + $0x120] sm:$0xff] %v639_v63  ;;  %v522_v0 = vadd.f32 %v895_v61, %v1897_v30  ;;  %v650_v21 = vadd.f32 %v927_v2, %v1897_v30 }
  0xf0   :  { %v513_v35 = vpop.f32.mrf.mxu0  ;;  %v641_v36 = vpop.f32.mrf.mxu1 }
  0xf1   :  { %756 = vst [vmem:[%s2161_s6 + $0x38] sm:$0xff] %v522_v0  ;;  %788 = vst [vmem:[%s2161_s6 + $0x138] sm:$0xff] %v650_v21  ;;  %v514_v43 = vadd.f32 %v1897_v30, %v513_v35  ;;  %v642_v31 = vadd.f32 %v1897_v30, %v641_v36 }
  0xf2   :  { %v898_v49 = vpop.f32.mrf.mxu0  ;;  %v930_v14 = vpop.f32.mrf.mxu1 }
  0xf3   :  { %754 = vst [vmem:[%s2161_s6 + $0x28] sm:$0xff] %v514_v43  ;;  %786 = vst [vmem:[%s2161_s6 + $0x128] sm:$0xff] %v642_v31  ;;  %v535_v15 = vadd.f32 %v898_v49, %v1897_v30  ;;  %v663_v7 = vadd.f32 %v930_v14, %v1897_v30 }
  0xf4   :  { %v526_v18 = vpop.f32.mrf.mxu0  ;;  %v654_v4 = vpop.f32.mrf.mxu1 }
  0xf5   :  { %759 = vst [vmem:[%s2161_s6 + $0x50] sm:$0xff] %v535_v15  ;;  %791 = vst [vmem:[%s2161_s6 + $0x150] sm:$0xff] %v663_v7  ;;  %v527_v29 = vadd.f32 %v1897_v30, %v526_v18  ;;  %v655_v25 = vadd.f32 %v1897_v30, %v654_v4 }
  0xf6   :  { %v899_v26 = vpop.f32.mrf.mxu0  ;;  %v931_v46 = vpop.f32.mrf.mxu1 }
  0xf7   :  { %757 = vst [vmem:[%s2161_s6 + $0x40] sm:$0xff] %v527_v29  ;;  %789 = vst [vmem:[%s2161_s6 + $0x140] sm:$0xff] %v655_v25  ;;  %v538_v37 = vadd.f32 %v899_v26, %v1897_v30  ;;  %v666_v54 = vadd.f32 %v931_v46, %v1897_v30 }
  0xf8   :  { %v529_v55 = vpop.f32.mrf.mxu0  ;;  %v657_v5 = vpop.f32.mrf.mxu1 }
  0xf9   :  { %760 = vst [vmem:[%s2161_s6 + $0x58] sm:$0xff] %v538_v37  ;;  %792 = vst [vmem:[%s2161_s6 + $0x158] sm:$0xff] %v666_v54  ;;  %v530_v11 = vadd.f32 %v1897_v30, %v529_v55  ;;  %v658_v27 = vadd.f32 %v1897_v30, %v657_v5 }
  0xfa   :  { %v902_v33 = vpop.f32.mrf.mxu0  ;;  %v934_v1 = vpop.f32.mrf.mxu1 }
  0xfb   :  { %758 = vst [vmem:[%s2161_s6 + $0x48] sm:$0xff] %v530_v11  ;;  %790 = vst [vmem:[%s2161_s6 + $0x148] sm:$0xff] %v658_v27  ;;  %v551_v28 = vadd.f32 %v902_v33, %v1897_v30  ;;  %v679_v6 = vadd.f32 %v934_v1, %v1897_v30 }
  0xfc   :  { %v542_v48 = vpop.f32.mrf.mxu0  ;;  %v670_v9 = vpop.f32.mrf.mxu1 }
  0xfd   :  { %763 = vst [vmem:[%s2161_s6 + $0x70] sm:$0xff] %v551_v28  ;;  %795 = vst [vmem:[%s2161_s6 + $0x170] sm:$0xff] %v679_v6  ;;  %v543_v53 = vadd.f32 %v1897_v30, %v542_v48  ;;  %v671_v57 = vadd.f32 %v1897_v30, %v670_v9 }
  0xfe   :  { %v903_v10 = vpop.f32.mrf.mxu0  ;;  %v935_v12 = vpop.f32.mrf.mxu1 }
  0xff   :  { %761 = vst [vmem:[%s2161_s6 + $0x60] sm:$0xff] %v543_v53  ;;  %793 = vst [vmem:[%s2161_s6 + $0x160] sm:$0xff] %v671_v57  ;;  %v554_v34 = vadd.f32 %v903_v10, %v1897_v30  ;;  %v682_v44 = vadd.f32 %v935_v12, %v1897_v30 }
 0x100   :  { %v545_v45 = vpop.f32.mrf.mxu0  ;;  %v673_v24 = vpop.f32.mrf.mxu1 }
 0x101   :  { %764 = vst [vmem:[%s2161_s6 + $0x78] sm:$0xff] %v554_v34  ;;  %796 = vst [vmem:[%s2161_s6 + $0x178] sm:$0xff] %v682_v44  ;;  %v546_v20 = vadd.f32 %v1897_v30, %v545_v45  ;;  %v674_v38 = vadd.f32 %v1897_v30, %v673_v24 }
 0x102   :  { %v906_v58 = vpop.f32.mrf.mxu0  ;;  %v938_v59 = vpop.f32.mrf.mxu1 }
 0x103   :  { %762 = vst [vmem:[%s2161_s6 + $0x68] sm:$0xff] %v546_v20  ;;  %794 = vst [vmem:[%s2161_s6 + $0x168] sm:$0xff] %v674_v38  ;;  %v567_v39 = vadd.f32 %v906_v58, %v1897_v30  ;;  %v695_v32 = vadd.f32 %v938_v59, %v1897_v30 }
 0x104   :  { %v558_v50 = vpop.f32.mrf.mxu0  ;;  %v686_v62 = vpop.f32.mrf.mxu1 }
 0x105   :  { %767 = vst [vmem:[%s2161_s6 + $0x90] sm:$0xff] %v567_v39  ;;  %799 = vst [vmem:[%s2161_s6 + $0x190] sm:$0xff] %v695_v32  ;;  %v559_v8 = vadd.f32 %v1897_v30, %v558_v50  ;;  %v687_v40 = vadd.f32 %v1897_v30, %v686_v62 }
 0x106   :  { %v907_v41 = vpop.f32.mrf.mxu0  ;;  %v939_v42 = vpop.f32.mrf.mxu1 }
 0x107   :  { %765 = vst [vmem:[%s2161_s6 + $0x80] sm:$0xff] %v559_v8  ;;  %797 = vst [vmem:[%s2161_s6 + $0x180] sm:$0xff] %v687_v40  ;;  %v570_v47 = vadd.f32 %v907_v41, %v1897_v30  ;;  %v698_v13 = vadd.f32 %v939_v42, %v1897_v30 }
 0x108   :  { %v561_v17 = vpop.f32.mrf.mxu0  ;;  %v689_v19 = vpop.f32.mrf.mxu1 }
 0x109   :  { %768 = vst [vmem:[%s2161_s6 + $0x98] sm:$0xff] %v570_v47  ;;  %800 = vst [vmem:[%s2161_s6 + $0x198] sm:$0xff] %v698_v13  ;;  %v562_v3 = vadd.f32 %v1897_v30, %v561_v17  ;;  %v690_v22 = vadd.f32 %v1897_v30, %v689_v19 }
 0x10a   :  { %v910_v23 = vpop.f32.mrf.mxu0  ;;  %v942_v16 = vpop.f32.mrf.mxu1 }
 0x10b   :  { %766 = vst [vmem:[%s2161_s6 + $0x88] sm:$0xff] %v562_v3  ;;  %798 = vst [vmem:[%s2161_s6 + $0x188] sm:$0xff] %v690_v22  ;;  %v583_v51 = vadd.f32 %v910_v23, %v1897_v30  ;;  %v711_v52 = vadd.f32 %v942_v16, %v1897_v30 }
 0x10c   :  { %v574_v60 = vpop.f32.mrf.mxu0  ;;  %v702_v56 = vpop.f32.mrf.mxu1 }
 0x10d   :  { %771 = vst [vmem:[%s2161_s6 + $0xb0] sm:$0xff] %v583_v51  ;;  %803 = vst [vmem:[%s2161_s6 + $0x1b0] sm:$0xff] %v711_v52  ;;  %v575_v63 = vadd.f32 %v1897_v30, %v574_v60  ;;  %v703_v61 = vadd.f32 %v1897_v30, %v702_v56 }
 0x10e   :  { %v911_v2 = vpop.f32.mrf.mxu0  ;;  %v943_v0 = vpop.f32.mrf.mxu1 }
 0x10f   :  { %769 = vst [vmem:[%s2161_s6 + $0xa0] sm:$0xff] %v575_v63  ;;  %801 = vst [vmem:[%s2161_s6 + $0x1a0] sm:$0xff] %v703_v61  ;;  %v586_v21 = vadd.f32 %v911_v2, %v1897_v30  ;;  %v714_v35 = vadd.f32 %v943_v0, %v1897_v30 }
 0x110   :  { %v577_v36 = vpop.f32.mrf.mxu0  ;;  %v705_v43 = vpop.f32.mrf.mxu1 }
 0x111   :  { %772 = vst [vmem:[%s2161_s6 + $0xb8] sm:$0xff] %v586_v21  ;;  %804 = vst [vmem:[%s2161_s6 + $0x1b8] sm:$0xff] %v714_v35  ;;  %v578_v31 = vadd.f32 %v1897_v30, %v577_v36  ;;  %v706_v49 = vadd.f32 %v1897_v30, %v705_v43 }
 0x112   :  { %v914_v14 = vpop.f32.mrf.mxu0  ;;  %v946_v15 = vpop.f32.mrf.mxu1 }
 0x113   :  { %770 = vst [vmem:[%s2161_s6 + $0xa8] sm:$0xff] %v578_v31  ;;  %802 = vst [vmem:[%s2161_s6 + $0x1a8] sm:$0xff] %v706_v49  ;;  %v599_v7 = vadd.f32 %v914_v14, %v1897_v30  ;;  %v727_v18 = vadd.f32 %v946_v15, %v1897_v30 }
 0x114   :  { %v590_v4 = vpop.f32.mrf.mxu0  ;;  %v718_v29 = vpop.f32.mrf.mxu1 }
 0x115   :  { %775 = vst [vmem:[%s2161_s6 + $0xd0] sm:$0xff] %v599_v7  ;;  %807 = vst [vmem:[%s2161_s6 + $0x1d0] sm:$0xff] %v727_v18  ;;  %v591_v25 = vadd.f32 %v1897_v30, %v590_v4  ;;  %v719_v26 = vadd.f32 %v1897_v30, %v718_v29 }
 0x116   :  { %v915_v46 = vpop.f32.mrf.mxu0  ;;  %v947_v37 = vpop.f32.mrf.mxu1 }
 0x117   :  { %773 = vst [vmem:[%s2161_s6 + $0xc0] sm:$0xff] %v591_v25  ;;  %805 = vst [vmem:[%s2161_s6 + $0x1c0] sm:$0xff] %v719_v26  ;;  %v602_v54 = vadd.f32 %v915_v46, %v1897_v30  ;;  %v730_v55 = vadd.f32 %v947_v37, %v1897_v30 }
 0x118   :  { %v593_v5 = vpop.f32.mrf.mxu0  ;;  %v721_v11 = vpop.f32.mrf.mxu1 }
 0x119   :  { %776 = vst [vmem:[%s2161_s6 + $0xd8] sm:$0xff] %v602_v54  ;;  %808 = vst [vmem:[%s2161_s6 + $0x1d8] sm:$0xff] %v730_v55  ;;  %v594_v27 = vadd.f32 %v1897_v30, %v593_v5  ;;  %v722_v33 = vadd.f32 %v1897_v30, %v721_v11 }
 0x11a   :  { %v918_v1 = vpop.f32.mrf.mxu0  ;;  %v950_v28 = vpop.f32.mrf.mxu1 }
 0x11b   :  { %774 = vst [vmem:[%s2161_s6 + $0xc8] sm:$0xff] %v594_v27  ;;  %806 = vst [vmem:[%s2161_s6 + $0x1c8] sm:$0xff] %v722_v33  ;;  %v615_v6 = vadd.f32 %v918_v1, %v1897_v30  ;;  %v743_v48 = vadd.f32 %v950_v28, %v1897_v30 }
 0x11c   :  { %v606_v9 = vpop.f32.mrf.mxu0  ;;  %v734_v53 = vpop.f32.mrf.mxu1 }
 0x11d   :  { %779 = vst [vmem:[%s2161_s6 + $0xf0] sm:$0xff] %v615_v6  ;;  %811 = vst [vmem:[%s2161_s6 + $0x1f0] sm:$0xff] %v743_v48  ;;  %v607_v57 = vadd.f32 %v1897_v30, %v606_v9  ;;  %v735_v10 = vadd.f32 %v1897_v30, %v734_v53 }
 0x11e   :  { %v919_v12 = vpop.f32.mrf.mxu0  ;;  %v951_v34 = vpop.f32.mrf.mxu1 }
 0x11f   :  { %777 = vst [vmem:[%s2161_s6 + $0xe0] sm:$0xff] %v607_v57  ;;  %809 = vst [vmem:[%s2161_s6 + $0x1e0] sm:$0xff] %v735_v10  ;;  %v618_v44 = vadd.f32 %v919_v12, %v1897_v30  ;;  %v746_v45 = vadd.f32 %v951_v34, %v1897_v30 }
 0x120   :  { %v609_v24 = vpop.f32.mrf.mxu0  ;;  %v737_v20 = vpop.f32.mrf.mxu1 }
 0x121   :  { %780 = vst [vmem:[%s2161_s6 + $0xf8] sm:$0xff] %v618_v44  ;;  %812 = vst [vmem:[%s2161_s6 + $0x1f8] sm:$0xff] %v746_v45  ;;  %v610_v38 = vadd.f32 %v1897_v30, %v609_v24  ;;  %v738_v58 = vadd.f32 %v1897_v30, %v737_v20 }
 0x123   :  { %778 = vst [vmem:[%s2161_s6 + $0xe8] sm:$0xff] %v610_v38  ;;  %810 = vst [vmem:[%s2161_s6 + $0x1e8] sm:$0xff] %v738_v58 }

// kernel: build_student_net_forward.8
= control target key start
LH: loop header
LB: loop body
LE: loop exit
PB: predicated region body
PF: predicated region fallthrough
CT: control target
= control target key end

     0   :  { %s4374_s15 = smov 0   ;;  %s4376_s16 = smov 0   ;;  %s5772_s0 = inlined_call_operand.vmem [shape: bf16[2,1,18,18,128], index: 0, kind: input, shape index: {}]   ;;  %s5773_s1 = inlined_call_operand.vmem [shape: bf16[9,128,128], index: 1, kind: input, shape index: {}]   ;;  %s5774_s2 = inlined_call_operand.vmem [shape: f32[2,1,256,128], index: 2, kind: output, shape index: {0}]   ;;  %s5775_s3 = inlined_call_operand.vmem [shape: f32[2,1,1,128], index: 3, kind: output, shape index: {1}]   ;;  %s5776_s4 = inlined_call_operand.vmem [shape: f32[2,1,1,128], index: 4, kind: output, shape index: {2}]  }
   0x1   :  { %s4378_s17 = smov 0  }
   0x2 LB: > { %s27_s18 = sadd.s32 1, %s4343_s16  ;;  %p3301_p0 = scmp.ge.s32.totalorder %s4347_s17, 1  ;;  %s4347_s17 = sphi %s4378_s17, %s15_s17   ;;  %s4343_s16 = sphi %s4376_s16, %s5994_s16   ;;  %s4339_s15 = sphi %s4374_s15, %s5993_s15  }
   0x3   : > { %p29_p1 = scmp.ge.s32.totalorder %s27_s18, 2  ;;  %p191_p2 = scmp.lt.s32.totalorder %s4347_s17, 3 }
   0x5   : > { %s5996_s18 = smov (%p29_p1, %s27_s18), 0  ;;  %p192_p3 = pnand %p3301_p0, %p191_p2 }
   0x7   : > { %195 = sbr.rel (%p192_p3) target bundleno = 550 (0x226), region = 28 }
   0xc   : > { %v4215_v0 = vld [vmem:[%s5773_s1 + $0x78] sm:$0xff]   ;;  %p237_p4 = scmp.lt.s32.totalorder %s4339_s15, 1  ;;  %v4216_v1 = vld [vmem:[%s5773_s1 + $0x70] sm:$0xff]   ;;  %v4217_v2 = vld [vmem:[%s5773_s1 + $0x68] sm:$0xff]   ;;  %vm456_vm0 = vcmask 1046528   ;;  %vm1020_vm1 = vcmask 1045504  }
   0xd   : > { %3742 = vmatprep.subr.bf16.mxu0 %v4215_v0  ;;  %4174 = vmatprep.subr.bf16.mxu1 %v4215_v0  ;;  %v4218_v3 = vld [vmem:[%s5773_s1 + $0x60] sm:$0xff]   ;;  %v4219_v22 = vld [vmem:[%s5773_s1 + $0x58] sm:$0xff]   ;;  %v4220_v37 = vld [vmem:[%s5773_s1 + $0x50] sm:$0xff]  }
   0xe   : > { %s5998_s15 = smov (!%p237_p4, %s4339_s15), 1  ;;  %3743 = vmatpush3.bf16.msra.mxu0 %v4215_v0  ;;  %4182 = vmatpush3.bf16.msra.mxu1 %v4215_v0  ;;  %v4221_v46 = vld [vmem:[%s5773_s1 + $0x48] sm:$0xff]  }
   0xf   : > { %3744 = vmatprep.subr.bf16.mxu0 %v4216_v1  ;;  %4175 = vmatprep.subr.bf16.mxu1 %v4216_v1  ;;  %s4190_s25 = smul.u32 216, %s5998_s15  ;;  %s260_s24 = scalar_lea.vmem %s5775_s3, %s5998_s15 }
  0x10   : > { %s266_s27 = scalar_lea.vmem %s5776_s4, %s5998_s15 }
  0x11   : > { %s4407_s28 = scalar_lea.vmem %s5772_s0, %s4190_s25 }
  0x12   : > { %3745 = vmatpush3.bf16.msra.mxu0 %v4216_v1  ;;  %4183 = vmatpush3.bf16.msra.mxu1 %v4216_v1  ;;  %v4413_v4 = vld [vmem:[%s4407_s28] sm:$0xff]   ;;  %v4416_v5 = vld [vmem:[%s4407_s28 + $0x8] sm:$0x1]  ;;  %v4429_v12 = vld [vmem:[%s4407_s28 + $0xc] sm:$0xff]  }
  0x13   : > { %3746 = vmatprep.subr.bf16.mxu0 %v4217_v2  ;;  %4176 = vmatprep.subr.bf16.mxu1 %v4217_v2  ;;  %v4419_v6 = vld [vmem:[%s4407_s28 + $0x60] sm:$0xff]   ;;  %v5811_v7 = vunpack.c.l.bf16 %v4413_v4  ;;  %v5810_v8 = vunpack.c.h.bf16 %v4413_v4  ;;  %v5803_v9 = vunpack.c.l.bf16 %v4416_v5  ;;  %v4425_v10 = vld [vmem:[%s4407_s28 + $0x68] sm:$0x1]  ;;  %v4432_v13 = vld [vmem:[%s4407_s28 + $0x14] sm:$0x1]  ;;  %v5812_v16 = vunpack.c.l.bf16 %v4429_v12 }
  0x14   : > { %v5795_v11 = vunpack.c.l.bf16 %v4419_v6  ;;  %v5794_v14 = vunpack.c.h.bf16 %v4419_v6  ;;  %v5786_v15 = vunpack.c.l.bf16 %v4425_v10  ;;  %v5802_v17 = vunpack.c.h.bf16 %v4429_v12  ;;  %v4455_v26 = vld [vmem:[%s4407_s28 + $0x6c] sm:$0xff]   ;;  %v4464_v31 = vld [vmem:[%s4407_s28 + $0x74] sm:$0x1]  ;;  %v4478_v40 = vld [vmem:[%s4407_s28 + $0x18] sm:$0xff]  }
  0x15   : > { %v457_v18 = vrot.slane %v5811_v7, 1  ;;  %v458_v19 = vrot.slane %v5810_v8, 1  ;;  %v460_v20 = vrot.slane %v5803_v9, 1  ;;  %v5801_v25 = vunpack.c.l.bf16 %v4432_v13  ;;  %v4481_v41 = vld [vmem:[%s4407_s28 + $0x20] sm:$0x1]  ;;  %v4487_v44 = vld [vmem:[%s4407_s28 + $0x78] sm:$0xff]  }
  0x16   : > { %3747 = vmatpush3.bf16.msra.mxu0 %v4217_v2  ;;  %4184 = vmatpush3.bf16.msra.mxu1 %v4217_v2  ;;  %v497_v21 = vrot.slane %v5795_v11, 1  ;;  %v498_v23 = vrot.slane %v5794_v14, 1  ;;  %v500_v24 = vrot.slane %v5786_v15, 1  ;;  %v462_v29 = vrot.slane %v5812_v16, 1  ;;  %v4490_v45 = vld [vmem:[%s4407_s28 + $0x80] sm:$0x1] }
  0x17   : > { %3748 = vmatprep.subr.bf16.mxu0 %v4218_v3  ;;  %4177 = vmatprep.subr.bf16.mxu1 %v4218_v3  ;;  %v459_v27 = vsel %vm456_vm0, %v457_v18, %v458_v19  ;;  %v461_v28 = vsel %vm456_vm0, %v458_v19, %v460_v20  ;;  %v463_v30 = vrot.slane %v5802_v17, 1  ;;  %v465_v35 = vrot.slane %v5801_v25, 1  ;;  %v4500_v51 = vld [vmem:[%s4407_s28 + $0x2c] sm:$0x1]  ;;  %v4507_v54 = vld [vmem:[%s4407_s28 + $0x24] sm:$0xff]  }
  0x18   : > { %v569_v32 = vpack.c.bf16 %v461_v28, %v459_v27  ;;  %v499_v33 = vsel %vm456_vm0, %v497_v21, %v498_v23  ;;  %v501_v34 = vsel %vm456_vm0, %v498_v23, %v500_v24  ;;  %v5785_v38 = vunpack.c.l.bf16 %v4455_v26  ;;  %v4510_v55 = vld [vmem:[%s4407_s28 + $0x84] sm:$0xff]   ;;  %v4516_v59 = vld [vmem:[%s4407_s28 + $0x8c] sm:$0x1]  ;;  %v4635_v25 = vld [vmem:[%s4407_s28 + $0x50] sm:$0x1] }
  0x19   : > { %v4470_v36 = vpack.c.bf16 %v501_v34, %v499_v33  ;;  %v5784_v39 = vunpack.c.h.bf16 %v4455_v26  ;;  %v5781_v42 = vunpack.c.l.bf16 %v4464_v31  ;;  %v5800_v43 = vunpack.c.l.bf16 %v4478_v40  ;;  %v4701_v7 = vld [vmem:[%s4407_s28 + $0xbc] sm:$0x1] }
  0x1a   : > { %3749 = vmatpush3.bf16.msra.mxu0 %v4218_v3  ;;  %4185 = vmatpush3.bf16.msra.mxu1 %v4218_v3  ;;  %v464_v47 = vsel %vm456_vm0, %v462_v29, %v463_v30  ;;  %v466_v48 = vsel %vm456_vm0, %v463_v30, %v465_v35  ;;  %v5799_v49 = vunpack.c.h.bf16 %v4478_v40  ;;  %v5798_v50 = vunpack.c.l.bf16 %v4481_v41  ;;  %v4222_v3 = vld [vmem:[%s5773_s1 + $0x40] sm:$0xff]   ;;  %v4548_v29 = vld [vmem:[%s4407_s28 + $0x38] sm:$0x1]  ;;  %v4551_v30 = vld [vmem:[%s4407_s28 + $0x90] sm:$0xff]  }
  0x1b   : > { %3750 = vmatprep.subr.bf16.mxu0 %v4219_v22  ;;  %4178 = vmatprep.subr.bf16.mxu1 %v4219_v22  ;;  %v502_v52 = vrot.slane %v5785_v38, 1  ;;  %v503_v53 = vrot.slane %v5784_v39, 1  ;;  %v5779_v56 = vunpack.c.l.bf16 %v4487_v44  ;;  %v5778_v57 = vunpack.c.h.bf16 %v4487_v44 }
  0x1c   : > { %3758 = vmatprep.mubr.bf16.mxu0 %v569_v32  ;;  %3774 = vmatprep.mubr.bf16.mxu1 %v4470_v36  ;;  %v5777_v58 = vunpack.c.l.bf16 %v4490_v45  ;;  %v4518_v60 = vpack.c.bf16 %v466_v48, %v464_v47  ;;  %v505_v61 = vrot.slane %v5781_v42, 1  ;;  %v467_v62 = vrot.slane %v5800_v43, 1  ;;  %v4223_v47 = vld [vmem:[%s5773_s1 + $0x38] sm:$0xff]  }
  0x1d   : > { %v468_v63 = vrot.slane %v5799_v49, 1  ;;  %v470_v0 = vrot.slane %v5798_v50, 1  ;;  %v5797_v1 = vunpack.c.l.bf16 %v4507_v54  ;;  %v5796_v2 = vunpack.c.h.bf16 %v4507_v54  ;;  %v4224_v48 = vld [vmem:[%s5773_s1 + $0xb8] sm:$0xff]  }
  0x1e   : > { %3751 = vmatpush3.bf16.msra.mxu0 %v4219_v22  ;;  %4186 = vmatpush3.bf16.msra.mxu1 %v4219_v22  ;;  %v504_v18 = vsel %vm456_vm0, %v502_v52, %v503_v53  ;;  %v5780_v19 = vunpack.c.l.bf16 %v4500_v51  ;;  %v5782_v20 = vunpack.c.l.bf16 %v4510_v55  ;;  %v5783_v21 = vunpack.c.h.bf16 %v4510_v55  ;;  %v4538_v22 = vld [vmem:[%s4407_s28 + $0x30] sm:$0xff]  }
  0x1f   : > { %3752 = vmatprep.subr.bf16.mxu0 %v4220_v37  ;;  %4179 = vmatprep.subr.bf16.mxu1 %v4220_v37  ;;  %v507_v23 = vrot.slane %v5779_v56, 1  ;;  %v508_v24 = vrot.slane %v5778_v57, 1  ;;  %v510_v27 = vrot.slane %v5777_v58, 1  ;;  %v5787_v28 = vunpack.c.l.bf16 %v4516_v59  ;;  %v4576_v57 = vld [vmem:[%s4407_s28 + $0x3c] sm:$0xff]  }
  0x20   : > { %v506_v32 = vsel %vm456_vm0, %v503_v53, %v505_v61  ;;  %v472_v33 = vrot.slane %v5797_v1, 1  ;;  %v473_v34 = vrot.slane %v5796_v2, 1  ;;  %v475_v35 = vrot.slane %v5780_v19, 1  ;;  %v4628_v2 = vld [vmem:[%s4407_s28 + $0x48] sm:$0xff]  }
  0x21   : > { %v512_v52 = vrot.slane %v5782_v20, 1  ;;  %v513_v53 = vrot.slane %v5783_v21, 1  ;;  %v5788_v61 = vunpack.c.l.bf16 %v4538_v22  ;;  %v5789_v58 = vunpack.c.h.bf16 %v4538_v22 }
  0x22   : > { %3753 = vmatpush3.bf16.msra.mxu0 %v4220_v37  ;;  %4187 = vmatpush3.bf16.msra.mxu1 %v4220_v37  ;;  %v4561_v37 = vld [vmem:[%s4407_s28 + $0x98] sm:$0x1]  ;;  %v469_v56 = vsel %vm456_vm0, %v467_v62, %v468_v63  ;;  %v471_v19 = vsel %vm456_vm0, %v468_v63, %v470_v0  ;;  %v5790_v42 = vunpack.c.l.bf16 %v4548_v29  ;;  %v5792_v20 = vunpack.c.l.bf16 %v4551_v30  ;;  %v4592_v62 = vld [vmem:[%s4407_s28 + $0x9c] sm:$0xff]  }
  0x23   : > { %3754 = vmatprep.subr.bf16.mxu0 %v4221_v46  ;;  %4180 = vmatprep.subr.bf16.mxu1 %v4221_v46  ;;  %v4582_v21 = vpack.c.bf16 %v506_v32, %v504_v18  ;;  %v509_v39 = vsel %vm456_vm0, %v507_v23, %v508_v24  ;;  %v511_v38 = vsel %vm456_vm0, %v508_v24, %v510_v27  ;;  %v515_v15 = vrot.slane %v5787_v28, 1 }
  0x24   : > { %v477_v63 = vrot.slane %v5788_v61, 1  ;;  %v478_v0 = vrot.slane %v5789_v58, 1  ;;  %v5791_v18 = vunpack.c.h.bf16 %v4551_v30  ;;  %v5793_v23 = vunpack.c.l.bf16 %v4561_v37 }
  0x25   : > { %v4600_v32 = vpack.c.bf16 %v471_v19, %v469_v56  ;;  %v480_v24 = vrot.slane %v5790_v42, 1  ;;  %v5806_v27 = vunpack.c.l.bf16 %v4576_v57  ;;  %v5805_v28 = vunpack.c.h.bf16 %v4576_v57  ;;  %v4614_v42 = vld [vmem:[%s4407_s28 + $0xa4] sm:$0x1] }
  0x26   : > { %3755 = vmatpush3.bf16.msra.mxu0 %v4221_v46  ;;  %4188 = vmatpush3.bf16.msra.mxu1 %v4221_v46  ;;  %v4589_v46 = vld [vmem:[%s4407_s28 + $0x44] sm:$0x1]  ;;  %v517_v61 = vrot.slane %v5792_v20, 1  ;;  %v518_v58 = vrot.slane %v5791_v18, 1  ;;  %v520_v56 = vrot.slane %v5793_v23, 1  ;;  %v4226_v18 = vld [vmem:[%s5773_s1 + $0xb0] sm:$0xff]   ;;  %v4622_v20 = vpack.c.bf16 %v511_v38, %v509_v39 }
  0x27   : > { %3756 = vmatprep.subr.bf16.mxu0 %v4222_v3  ;;  %4181 = vmatprep.subr.bf16.mxu1 %v4222_v3  ;;  %v5804_v19 = vunpack.c.l.bf16 %v4589_v46  ;;  %v474_v23 = vsel %vm456_vm0, %v472_v33, %v473_v34  ;;  %v476_v14 = vsel %vm456_vm0, %v473_v34, %v475_v35  ;;  %v5809_v11 = vunpack.c.l.bf16 %v4592_v62  ;;  %v4638_v38 = vld [vmem:[%s4407_s28 + $0xa8] sm:$0xff]   ;;  %v4641_v39 = vld [vmem:[%s4407_s28 + $0xb0] sm:$0x1] }
  0x28   : > { %5829 = vst [vmem:[#allocation2_spill] sm:$0xff] %v4622_v20  ;;  %v514_v1 = vsel %vm456_vm0, %v512_v52, %v513_v53  ;;  %v516_v50 = vsel %vm456_vm0, %v513_v53, %v515_v15  ;;  %v479_v49 = vsel %vm456_vm0, %v477_v63, %v478_v0  ;;  %v5808_v43 = vunpack.c.h.bf16 %v4592_v62  ;;  %v4227_v33 = vld [vmem:[%s5773_s1 + $0x28] sm:$0xff]  }
  0x29   : > { %v4228_v15 = vld [vmem:[%s5773_s1 + $0xa8] sm:$0xff]   ;;  %v481_v34 = vsel %vm456_vm0, %v478_v0, %v480_v24  ;;  %v482_v35 = vrot.slane %v5806_v27, 1  ;;  %v483_v52 = vrot.slane %v5805_v28, 1  ;;  %v5807_v53 = vunpack.c.l.bf16 %v4614_v42  ;;  %v4681_v27 = vld [vmem:[%s4407_s28 + $0x5c] sm:$0x1] }
  0x2a   : > { %3757 = vmatpush3.bf16.msra.mxu0 %v4222_v3  ;;  %4189 = vmatpush3.bf16.msra.mxu1 %v4222_v3  ;;  %v4225_v3 = vld [vmem:[%s5773_s1 + $0x30] sm:$0xff]   ;;  %v519_v63 = vsel %vm456_vm0, %v517_v61, %v518_v58  ;;  %v521_v17 = vsel %vm456_vm0, %v518_v58, %v520_v56  ;;  %v485_v9 = vrot.slane %v5804_v19, 1  ;;  %v522_v0 = vrot.slane %v5809_v11, 1 }
  0x2b   : > { %3790 = vmatprep.subr.bf16.mxu1 %v4223_v47  ;;  %3838 = vmatprep.subr.bf16.mxu0 %v4224_v48  ;;  %v523_v24 = vrot.slane %v5808_v43, 1  ;;  %v5813_v61 = vunpack.c.h.bf16 %v4628_v2  ;;  %v4670_v58 = vld [vmem:[%s4407_s28 + $0x54] sm:$0xff]   ;;  %v4674_v56 = vpack.c.bf16 %v476_v14, %v474_v23  ;;  %v4676_v19 = vpack.c.bf16 %v516_v50, %v514_v1  ;;  %v4230_v43 = vld [vmem:[%s5773_s1 + $0xa0] sm:$0xff]  }
  0x2c   : > { %v4678_v28 = vpack.c.bf16 %v481_v34, %v479_v49  ;;  %v5815_v11 = vunpack.c.l.bf16 %v4635_v25  ;;  %v5816_v14 = vunpack.c.l.bf16 %v4638_v38  ;;  %v4694_v49 = vld [vmem:[%s4407_s28 + $0xb4] sm:$0xff]   ;;  %v4696_v1 = vpack.c.bf16 %v521_v17, %v519_v63 }
  0x2d   : > { %3759 = vmatmul.mubr.bf16.vlgmr.msra.gmra.mxu0 %v4518_v60  ;;  %3775 = vmatmul.mubr.bf16.vlgmr.msra.gmra.mxu1 %v4582_v21  ;;  %5830 = vst [vmem:[#allocation3_spill] sm:$0xff] %v4676_v19  ;;  %v484_v34 = vsel %vm456_vm0, %v482_v35, %v483_v52  ;;  %v486_v8 = vsel %vm456_vm0, %v483_v52, %v485_v9  ;;  %v5819_v17 = vunpack.c.l.bf16 %v4670_v58 }
  0x2e   : > { %3791 = vmatpush3.bf16.msra.mxu1 %v4223_v47  ;;  %3839 = vmatpush3.bf16.msra.mxu0 %v4224_v48  ;;  %v525_v47 = vrot.slane %v5807_v53, 1  ;;  %v5814_v48 = vunpack.c.l.bf16 %v4628_v2  ;;  %v4229_v53 = vld [vmem:[%s5773_s1 + $0x20] sm:$0xff]   ;;  %5831 = vst [vmem:[#allocation4_spill] sm:$0xff] %v4696_v1  ;;  %v524_v16 = vsel %vm456_vm0, %v522_v0, %v523_v24  ;;  %v490_v52 = vrot.slane %v5815_v11, 1 }
  0x2f   : > { %3792 = vmatprep.subr.bf16.mxu1 %v4225_v3  ;;  %3840 = vmatprep.subr.bf16.mxu0 %v4226_v18  ;;  %v527_v63 = vrot.slane %v5816_v14, 1  ;;  %v5832_v0 = vunpack.c.h.bf16 %v4638_v38  ;;  %v4728_v11 = vpack.c.bf16 %v486_v8, %v484_v34  ;;  %v4233_v34 = vld [vmem:[%s5773_s1 + $0x10] sm:$0xff]  }
  0x30   : > { %3762 = vmatprep.mubr.bf16.mxu0 %v4600_v32  ;;  %3778 = vmatprep.mubr.bf16.mxu1 %v4622_v20  ;;  %v526_v23 = vsel %vm456_vm0, %v523_v24, %v525_v47  ;;  %v487_v50 = vrot.slane %v5814_v48, 1  ;;  %v5833_v47 = vunpack.c.l.bf16 %v4641_v39  ;;  %v4231_v48 = vld [vmem:[%s5773_s1 + $0x18] sm:$0xff]   ;;  %v5842_v20 = vunpack.c.l.bf16 %v4416_v5  ;;  %v4236_v5 = vld [vmem:[%s5773_s1 + $0x88] sm:$0xff]  }
  0x31   : > { %v528_v24 = vrot.slane %v5832_v0, 1  ;;  %v4730_v14 = vpack.c.bf16 %v526_v23, %v524_v16  ;;  %v4232_v0 = vld [vmem:[%s5773_s1 + $0x98] sm:$0xff]   ;;  %v5836_v16 = vunpack.c.l.bf16 %v4694_v49 }
  0x32   : > { %3793 = vmatpush3.bf16.msra.mxu1 %v4225_v3  ;;  %3841 = vmatpush3.bf16.msra.mxu0 %v4226_v18  ;;  %v488_v18 = vrot.slane %v5813_v61, 1  ;;  %v5820_v3 = vunpack.c.h.bf16 %v4670_v58  ;;  %v530_v61 = vrot.slane %v5833_v47, 1  ;;  %v5835_v47 = vunpack.c.l.bf16 %v4681_v27 }
  0x33   : > { %3794 = vmatprep.subr.bf16.mxu1 %v4227_v33  ;;  %3842 = vmatprep.subr.bf16.mxu0 %v4228_v15  ;;  %5834 = vst [vmem:[#allocation5_spill] sm:$0xff] %v4730_v14  ;;  %v532_v23 = vrot.slane %v5836_v16, 1 }
  0x34   : > { %v495_v8 = vrot.slane %v5835_v47, 1  ;;  %v489_v9 = vsel %vm456_vm0, %v487_v50, %v488_v18  ;;  %v491_v35 = vsel %vm456_vm0, %v488_v18, %v490_v52  ;;  %v4234_v50 = vld [vmem:[%s5773_s1 + $0x90] sm:$0xff]   ;;  %v5839_v18 = vunpack.c.l.bf16 %v4429_v12 }
  0x35   : > { %3763 = vmatmul.mubr.bf16.gmra.mxu0 %v4674_v56  ;;  %3779 = vmatmul.mubr.bf16.gmra.mxu1 %v4676_v19  ;;  %v5838_v19 = vunpack.c.l.bf16 %v4701_v7 }
  0x36   : > { %3795 = vmatpush3.bf16.msra.mxu1 %v4227_v33  ;;  %3843 = vmatpush3.bf16.msra.mxu0 %v4228_v15  ;;  %v492_v33 = vrot.slane %v5819_v17, 1  ;;  %v493_v15 = vrot.slane %v5820_v3, 1  ;;  %v531_v17 = vsel %vm456_vm0, %v528_v24, %v530_v61  ;;  %v5837_v3 = vunpack.c.h.bf16 %v4694_v49 }
  0x37   : > { %3796 = vmatprep.subr.bf16.mxu1 %v4229_v53  ;;  %3844 = vmatprep.subr.bf16.mxu0 %v4230_v43  ;;  %v535_v16 = vrot.slane %v5838_v19, 1  ;;  %v1026_v52 = vrot.slane %v5839_v18, 2  ;;  %v5840_v19 = vunpack.c.l.bf16 %v4413_v4  ;;  %v1024_v18 = vrot.slane %v5842_v20, 2 }
  0x38   : > { %3766 = vmatprep.mubr.bf16.mxu0 %v4678_v28  ;;  %3782 = vmatprep.mubr.bf16.mxu1 %v4696_v1  ;;  %v529_v1 = vsel %vm456_vm0, %v527_v63, %v528_v24  ;;  %v533_v47 = vrot.slane %v5837_v3, 1  ;;  %v4761_v63 = vpack.c.bf16 %v491_v35, %v489_v9  ;;  %v5841_v3 = vunpack.c.h.bf16 %v4413_v4 }
  0x39   : > { %v4763_v61 = vpack.c.bf16 %v531_v17, %v529_v1  ;;  %v5843_v9 = vunpack.c.h.bf16 %v4429_v12  ;;  %v496_v17 = vsel %vm456_vm0, %v493_v15, %v495_v8  ;;  %v4238_v8 = vld [vmem:[%s5773_s1 + $0x80] sm:$0xff]  }
  0x3a   : > { %3797 = vmatpush3.bf16.msra.mxu1 %v4229_v53  ;;  %3845 = vmatpush3.bf16.msra.mxu0 %v4230_v43  ;;  %v494_v43 = vsel %vm456_vm0, %v492_v33, %v493_v15  ;;  %v1021_v53 = vrot.slane %v5840_v19, 2  ;;  %v1022_v24 = vrot.slane %v5841_v3, 2  ;;  %v534_v35 = vsel %vm456_vm0, %v532_v23, %v533_v47  ;;  %v4235_v19 = vld [vmem:[%s5773_s1 + $0x8] sm:$0xff]  }
  0x3b   : > { %3798 = vmatprep.subr.bf16.mxu1 %v4231_v48  ;;  %3846 = vmatprep.subr.bf16.mxu0 %v4232_v0  ;;  %v1027_v1 = vrot.slane %v5843_v9, 2  ;;  %v536_v33 = vsel %vm456_vm0, %v533_v47, %v535_v16  ;;  %v5844_v3 = vunpack.c.l.bf16 %v4432_v13  ;;  %v4789_v20 = vpack.c.bf16 %v496_v17, %v494_v43  ;;  %v4237_v13 = vld [vmem:[%s5773_s1] sm:$0xff]  }
  0x3c   : > { %v1025_v15 = vsel %vm1020_vm1, %v1022_v24, %v1024_v18  ;;  %v5845_v16 = vunpack.c.l.bf16 %v4478_v40  ;;  %v5848_v9 = vunpack.c.l.bf16 %v4507_v54 }
  0x3d   : > { %3767 = vmatmul.mubr.bf16.gmra.mxu0 %v4728_v11  ;;  %3783 = vmatmul.mubr.bf16.gmra.mxu1 %v4730_v14  ;;  %v1029_v14 = vrot.slane %v5844_v3, 2  ;;  %v1028_v23 = vsel %vm1020_vm1, %v1026_v52, %v1027_v1  ;;  %v5849_v52 = vunpack.c.h.bf16 %v4507_v54  ;;  %v5851_v3 = vunpack.c.h.bf16 %v4419_v6 }
  0x3e   : > { %3799 = vmatpush3.bf16.msra.mxu1 %v4231_v48  ;;  %3847 = vmatpush3.bf16.msra.mxu0 %v4232_v0  ;;  %v4791_v48 = vpack.c.bf16 %v536_v33, %v534_v35  ;;  %v1023_v0 = vsel %vm1020_vm1, %v1021_v53, %v1022_v24  ;;  %v1031_v43 = vrot.slane %v5845_v16, 2  ;;  %v5847_v24 = vunpack.c.l.bf16 %v4481_v41 }
  0x3f   : > { %3800 = vmatprep.subr.bf16.mxu1 %v4233_v34  ;;  %3848 = vmatprep.subr.bf16.mxu0 %v4234_v50  ;;  %v1030_v47 = vsel %vm1020_vm1, %v1027_v1, %v1029_v14  ;;  %v1133_v53 = vpack.c.bf16 %v1025_v15, %v1023_v0  ;;  %v1036_v17 = vrot.slane %v5848_v9, 2  ;;  %v4241_v14 = vld [vmem:[%s5773_s1 + $0xf8] sm:$0xff]   ;;  %v1037_v1 = vrot.slane %v5849_v52, 2 }
  0x40   : > { %3770 = vmatprep.mubr.bf16.mxu0 %v4761_v63  ;;  %3786 = vmatprep.mubr.bf16.mxu1 %v4763_v61  ;;  %v1034_v18 = vrot.slane %v5847_v24, 2  ;;  %v5850_v35 = vunpack.c.l.bf16 %v4419_v6  ;;  %v4820_v41 = vpack.c.bf16 %v1030_v47, %v1028_v23  ;;  %v1062_v0 = vrot.slane %v5851_v3, 2 }
  0x41   : > { %v5852_v15 = vunpack.c.l.bf16 %v4425_v10  ;;  %v5853_v9 = vunpack.c.l.bf16 %v4455_v26  ;;  %v5855_v6 = vunpack.c.l.bf16 %v4464_v31  ;;  %v5856_v52 = vunpack.c.l.bf16 %v4500_v51 }
  0x42   : > { %3801 = vmatpush3.bf16.msra.mxu1 %v4233_v34  ;;  %3849 = vmatpush3.bf16.msra.mxu0 %v4234_v50  ;;  %v5846_v34 = vunpack.c.h.bf16 %v4478_v40  ;;  %v1061_v33 = vrot.slane %v5850_v35, 2  ;;  %v5859_v51 = vunpack.c.l.bf16 %v4548_v29  ;;  %v4245_v29 = vld [vmem:[%s5773_s1 + $0xf0] sm:$0xff]  }
  0x43   : > { %3802 = vmatprep.subr.bf16.mxu1 %v4235_v19  ;;  %3850 = vmatprep.subr.bf16.mxu0 %v4236_v5  ;;  %v1064_v16 = vrot.slane %v5852_v15, 2  ;;  %v1069_v47 = vrot.slane %v5855_v6, 2  ;;  %v1039_v35 = vrot.slane %v5856_v52, 2  ;;  %v5857_v15 = vunpack.c.l.bf16 %v4538_v22 }
  0x44   : > { %v1032_v50 = vrot.slane %v5846_v34, 2  ;;  %v4242_v34 = vld [vmem:[%s5773_s1 + $0x138] sm:$0xff]   ;;  %v1063_v3 = vsel %vm1020_vm1, %v1061_v33, %v1062_v0  ;;  %v5860_v33 = vunpack.c.l.bf16 %v4510_v55  ;;  %v1038_v6 = vsel %vm1020_vm1, %v1036_v17, %v1037_v1 }
  0x45   : > { %3771 = vmatmul.mubr.bf16.gmra.mxu0 %v4789_v20  ;;  %3787 = vmatmul.mubr.bf16.gmra.mxu1 %v4791_v48  ;;  %v5863_v52 = vunpack.c.l.bf16 %v4592_v62 }
  0x46   : > { %3803 = vmatpush3.bf16.msra.mxu1 %v4235_v19  ;;  %3851 = vmatpush3.bf16.msra.mxu0 %v4236_v5  ;;  %v1033_v24 = vsel %vm1020_vm1, %v1031_v43, %v1032_v50  ;;  %v1066_v19 = vrot.slane %v5853_v9, 2  ;;  %v5854_v5 = vunpack.c.h.bf16 %v4455_v26  ;;  %v1035_v10 = vsel %vm1020_vm1, %v1032_v50, %v1034_v18 }
  0x47   : > { %3804 = vmatprep.subr.bf16.mxu1 %v4237_v13  ;;  %3852 = vmatprep.subr.bf16.mxu0 %v4238_v8  ;;  %v1065_v43 = vsel %vm1020_vm1, %v1062_v0, %v1064_v16  ;;  %v1041_v9 = vrot.slane %v5857_v15, 2  ;;  %v1076_v0 = vrot.slane %v5860_v33, 2  ;;  %v4856_v16 = vpack.c.bf16 %v1035_v10, %v1033_v24 }
  0x48   : > { %v1067_v23 = vrot.slane %v5854_v5, 2  ;;  %3806 = vmatprep.mubr.bf16.mxu1 %v4413_v4  ;;  %3854 = vmatprep.mubr.bf16.mxu0 %v1133_v53  ;;  %v4844_v26 = vpack.c.bf16 %v1065_v43, %v1063_v3  ;;  %v5858_v4 = vunpack.c.h.bf16 %v4538_v22  ;;  %v1044_v53 = vrot.slane %v5859_v51, 2 }
  0x49   : > { %v1040_v24 = vsel %vm1020_vm1, %v1037_v1, %v1039_v35  ;;  %v1086_v3 = vrot.slane %v5863_v52, 2  ;;  %v4249_v1 = vld [vmem:[%s5773_s1 + $0xe8] sm:$0xff]   ;;  %v5867_v51 = vunpack.c.h.bf16 %v4576_v57 }
  0x4a   : > { %v1068_v31 = vsel %vm1020_vm1, %v1066_v19, %v1067_v23  ;;  %v1070_v5 = vsel %vm1020_vm1, %v1067_v23, %v1069_v47  ;;  %3805 = vmatpush3.bf16.msra.mxu1 %v4237_v13  ;;  %3853 = vmatpush3.bf16.msra.mxu0 %v4238_v8  ;;  %v1042_v50 = vrot.slane %v5858_v4, 2  ;;  %v5861_v19 = vunpack.c.h.bf16 %v4510_v55  ;;  %v4246_v47 = vld [vmem:[%s5773_s1 + $0x130] sm:$0xff]  }
  0x4b   : > { %v4852_v18 = vpack.c.bf16 %v1070_v5, %v1068_v31  ;;  %3886 = vmatprep.subr.bf16.mxu1 %v4241_v14  ;;  %3934 = vmatprep.subr.bf16.mxu0 %v4242_v34  ;;  %v5862_v13 = vunpack.c.l.bf16 %v4516_v59  ;;  %v5865_v31 = vunpack.c.l.bf16 %v4614_v42  ;;  %v4892_v4 = vpack.c.bf16 %v1040_v24, %v1038_v6 }
  0x4c   : > { %v1077_v23 = vrot.slane %v5861_v19, 2  ;;  %v1043_v43 = vsel %vm1020_vm1, %v1041_v9, %v1042_v50  ;;  %v1045_v15 = vsel %vm1020_vm1, %v1042_v50, %v1044_v53  ;;  %v5866_v9 = vunpack.c.l.bf16 %v4576_v57 }
  0x4d   : > { %v1079_v8 = vrot.slane %v5862_v13, 2  ;;  %3807 = vmatmul.mubr.bf16.vlgmr.msra.gmra.mxu1 %v4429_v12  ;;  %3855 = vmatmul.mubr.bf16.vlgmr.msra.gmra.mxu0 %v4820_v41  ;;  %v1089_v5 = vrot.slane %v5865_v31, 2  ;;  %v1047_v53 = vrot.slane %v5867_v51, 2  ;;  %v5868_v19 = vunpack.c.l.bf16 %v4694_v49 }
  0x4e   : > { %v1078_v10 = vsel %vm1020_vm1, %v1076_v0, %v1077_v23  ;;  %3887 = vmatpush3.bf16.msra.mxu1 %v4241_v14  ;;  %3935 = vmatpush3.bf16.msra.mxu0 %v4242_v34  ;;  %v4250_v14 = vld [vmem:[%s5773_s1 + $0x128] sm:$0xff]   ;;  %v5864_v34 = vunpack.c.h.bf16 %v4592_v62  ;;  %v1046_v50 = vrot.slane %v5866_v9, 2  ;;  %v5869_v42 = vunpack.c.h.bf16 %v4694_v49 }
  0x4f   : > { %v1080_v59 = vsel %vm1020_vm1, %v1077_v23, %v1079_v8  ;;  %3810 = vmatprep.mubr.bf16.mxu1 %v4478_v40  ;;  %3858 = vmatprep.mubr.bf16.mxu0 %v4856_v16  ;;  %v1096_v23 = vrot.slane %v5868_v19, 2  ;;  %v4904_v8 = vpack.c.bf16 %v1045_v15, %v1043_v43  ;;  %v5870_v6 = vunpack.c.l.bf16 %v4589_v46  ;;  %v4253_v46 = vld [vmem:[%s5773_s1 + $0xe0] sm:$0xff]   ;;  %v4258_v19 = vld [vmem:[%s5773_s1 + $0x118] sm:$0xff]  }
  0x50   : > { %v4874_v17 = vpack.c.bf16 %v1080_v59, %v1078_v10  ;;  %v1087_v35 = vrot.slane %v5864_v34, 2  ;;  %3888 = vmatprep.subr.bf16.mxu1 %v4245_v29  ;;  %3936 = vmatprep.subr.bf16.mxu0 %v4246_v47  ;;  %v1097_v13 = vrot.slane %v5869_v42, 2  ;;  %v5871_v59 = vunpack.c.l.bf16 %v4701_v7  ;;  %v4254_v7 = vld [vmem:[%s5773_s1 + $0x120] sm:$0xff]  }
  0x51   : > { %v1049_v24 = vrot.slane %v5870_v6, 2 }
  0x52   : > { %v1088_v33 = vsel %vm1020_vm1, %v1086_v3, %v1087_v35  ;;  %v1090_v0 = vsel %vm1020_vm1, %v1087_v35, %v1089_v5  ;;  %3889 = vmatpush3.bf16.msra.mxu1 %v4245_v29  ;;  %3937 = vmatpush3.bf16.msra.mxu0 %v4246_v47  ;;  %v1099_v52 = vrot.slane %v5871_v59, 2  ;;  %v5872_v3 = vunpack.c.l.bf16 %v4628_v2  ;;  %v4262_v59 = vld [vmem:[%s5773_s1 + $0x110] sm:$0xff]  }
  0x53   : > { %v4908_v10 = vpack.c.bf16 %v1090_v0, %v1088_v33  ;;  %3890 = vmatprep.subr.bf16.mxu1 %v4249_v1  ;;  %3938 = vmatprep.subr.bf16.mxu0 %v4250_v14  ;;  %v5873_v35 = vunpack.c.h.bf16 %v4628_v2  ;;  %v5874_v29 = vunpack.c.l.bf16 %v4635_v25  ;;  %v1098_v43 = vsel %vm1020_vm1, %v1096_v23, %v1097_v13  ;;  %v4257_v0 = vld [vmem:[%s5773_s1 + $0xd8] sm:$0xff]  }
  0x54   : > { %v1051_v34 = vrot.slane %v5872_v3, 2  ;;  %v1100_v15 = vsel %vm1020_vm1, %v1097_v13, %v1099_v52  ;;  %v1048_v25 = vsel %vm1020_vm1, %v1046_v50, %v1047_v53  ;;  %v1050_v9 = vsel %vm1020_vm1, %v1047_v53, %v1049_v24  ;;  %v4261_v24 = vld [vmem:[%s5773_s1 + $0xd0] sm:$0xff]   ;;  %v4265_v3 = vld [vmem:[%s5773_s1 + $0xc8] sm:$0xff]  }
  0x55   : > { %v1052_v31 = vrot.slane %v5873_v35, 2  ;;  %v1054_v47 = vrot.slane %v5874_v29, 2  ;;  %3811 = vmatmul.mubr.bf16.gmra.mxu1 %v4507_v54  ;;  %3859 = vmatmul.mubr.bf16.gmra.mxu0 %v4892_v4  ;;  %v4928_v5 = vpack.c.bf16 %v1100_v15, %v1098_v43  ;;  %v4942_v23 = vpack.c.bf16 %v1050_v9, %v1048_v25  ;;  %v4269_v25 = vld [vmem:[%s5773_s1 + $0xc0] sm:$0xff]  }
  0x56   : > { %3814 = vmatprep.mubr.bf16.mxu1 %v4538_v22  ;;  %3862 = vmatprep.mubr.bf16.mxu0 %v4904_v8  ;;  %v5875_v50 = vunpack.c.l.bf16 %v4670_v58  ;;  %v5876_v53 = vunpack.c.h.bf16 %v4670_v58  ;;  %v5877_v13 = vunpack.c.l.bf16 %v4681_v27  ;;  %v5878_v29 = vunpack.c.l.bf16 %v4487_v44  ;;  %v4270_v9 = vld [vmem:[%s5773_s1 + $0x100] sm:$0xff]  }
  0x57   : > { %3891 = vmatpush3.bf16.msra.mxu1 %v4249_v1  ;;  %3939 = vmatpush3.bf16.msra.mxu0 %v4250_v14  ;;  %v1053_v51 = vsel %vm1020_vm1, %v1051_v34, %v1052_v31  ;;  %v1055_v33 = vsel %vm1020_vm1, %v1052_v31, %v1054_v47  ;;  %v4266_v34 = vld [vmem:[%s5773_s1 + $0x108] sm:$0xff]   ;;  %v4973_v31 = vld [vmem:[%s4407_s28 + $0x60] sm:$0xff]  }
  0x58   : > { %3892 = vmatprep.subr.bf16.mxu1 %v4253_v46  ;;  %3940 = vmatprep.subr.bf16.mxu0 %v4254_v7  ;;  %v1056_v1 = vrot.slane %v5875_v50, 2  ;;  %v4946_v14 = vpack.c.bf16 %v1055_v33, %v1053_v51  ;;  %v1057_v42 = vrot.slane %v5876_v53, 2  ;;  %v1059_v6 = vrot.slane %v5877_v13, 2  ;;  %v4271_v33 = vld [vmem:[%s5773_s1 + $0x178] sm:$0xff]  }
  0x59   : > { %v1071_v47 = vrot.slane %v5878_v29, 2 }
  0x5a   : > { %v1058_v27 = vsel %vm1020_vm1, %v1056_v1, %v1057_v42  ;;  %v1060_v52 = vsel %vm1020_vm1, %v1057_v42, %v1059_v6  ;;  %v5881_v1 = vunpack.c.l.bf16 %v4551_v30  ;;  %v5882_v42 = vunpack.c.h.bf16 %v4551_v30 }
  0x5b   : > { %3893 = vmatpush3.bf16.msra.mxu1 %v4253_v46  ;;  %3941 = vmatpush3.bf16.msra.mxu0 %v4254_v7  ;;  %v4970_v35 = vpack.c.bf16 %v1060_v52, %v1058_v27  ;;  %v5879_v46 = vunpack.c.h.bf16 %v4487_v44  ;;  %v5880_v7 = vunpack.c.l.bf16 %v4490_v45  ;;  %v5883_v6 = vunpack.c.l.bf16 %v4561_v37 }
  0x5c   : > { %3894 = vmatprep.subr.bf16.mxu1 %v4257_v0  ;;  %3942 = vmatprep.subr.bf16.mxu0 %v4258_v19  ;;  %v1081_v53 = vrot.slane %v5881_v1, 2  ;;  %v1082_v13 = vrot.slane %v5882_v42, 2  ;;  %v5884_v52 = vunpack.c.l.bf16 %v4638_v38 }
  0x5d   : > { %3815 = vmatmul.mubr.bf16.gmra.mxu1 %v4576_v57  ;;  %3863 = vmatmul.mubr.bf16.gmra.mxu0 %v4942_v23  ;;  %v1072_v43 = vrot.slane %v5879_v46, 2  ;;  %v1074_v15 = vrot.slane %v5880_v7, 2 }
  0x5e   : > { %3818 = vmatprep.mubr.bf16.mxu1 %v4628_v2  ;;  %3866 = vmatprep.mubr.bf16.mxu0 %v4946_v14 }
  0x5f   : > { %3895 = vmatpush3.bf16.msra.mxu1 %v4257_v0  ;;  %3943 = vmatpush3.bf16.msra.mxu0 %v4258_v19  ;;  %v1073_v45 = vsel %vm1020_vm1, %v1071_v47, %v1072_v43  ;;  %v1075_v51 = vsel %vm1020_vm1, %v1072_v43, %v1074_v15  ;;  %v4272_v0 = vld [vmem:[%s5773_s1 + $0x1b8] sm:$0xff]   ;;  %v5000_v19 = vld [vmem:[%s4407_s28 + $0x6c] sm:$0xff]   ;;  %v5886_v47 = vunpack.c.l.bf16 %v4641_v39  ;;  %v5031_v15 = vld [vmem:[%s4407_s28 + $0xc0] sm:$0xff]  }
  0x60   : > { %3896 = vmatprep.subr.bf16.mxu1 %v4261_v24  ;;  %3944 = vmatprep.subr.bf16.mxu0 %v4262_v59  ;;  %v5002_v50 = vpack.c.bf16 %v1075_v51, %v1073_v45  ;;  %v370_v39 = vunpack.c.l.bf16 %v5031_v15  ;;  %v371_v45 = vunpack.c.h.bf16 %v5031_v15 }
  0x61   : > { %v1094_v46 = vrot.slane %v5886_v47, 2  ;;  %v4283_v47 = vld [vmem:[%s5773_s1 + $0x148] sm:$0xff]  }
  0x62   : > { %v1935_v51 = vrot.slane %v370_v39, 2  ;;  %v1936_v1 = vrot.slane %v371_v45, 2 }
  0x63   : > { %3897 = vmatpush3.bf16.msra.mxu1 %v4261_v24  ;;  %3945 = vmatpush3.bf16.msra.mxu0 %v4262_v59  ;;  %v1084_v24 = vrot.slane %v5883_v6, 2  ;;  %v1083_v59 = vsel %vm1020_vm1, %v1081_v53, %v1082_v13 }
  0x64   : > { %3898 = vmatprep.subr.bf16.mxu1 %v4265_v3  ;;  %3946 = vmatprep.subr.bf16.mxu0 %v4266_v34 }
  0x65   : > { %3819 = vmatmul.mubr.bf16.gmra.mxu1 %v4670_v58  ;;  %3867 = vmatmul.mubr.bf16.gmra.mxu0 %v4970_v35  ;;  %v1085_v27 = vsel %vm1020_vm1, %v1082_v13, %v1084_v24  ;;  %v1937_v13 = vsel %vm1020_vm1, %v1935_v51, %v1936_v1  ;;  %v4288_v51 = vld [vmem:[%s5773_s1 + $0x1f8] sm:$0xff]  }
  0x66   : > { %3822 = vmatprep.mubr.bf16.mxu1 %v4973_v31  ;;  %3870 = vmatprep.mubr.bf16.mxu0 %v4844_v26  ;;  %v5016_v37 = vpack.c.bf16 %v1085_v27, %v1083_v59  ;;  %v4273_v59 = vld [vmem:[%s5773_s1 + $0x170] sm:$0xff]  }
  0x67   : > { %3899 = vmatpush3.bf16.msra.mxu1 %v4265_v3  ;;  %3947 = vmatpush3.bf16.msra.mxu0 %v4266_v34  ;;  %v1091_v3 = vrot.slane %v5884_v52, 2  ;;  %v5885_v34 = vunpack.c.h.bf16 %v4638_v38  ;;  %v4274_v27 = vld [vmem:[%s5773_s1 + $0x1b0] sm:$0xff]   ;;  %v4279_v52 = vld [vmem:[%s5773_s1 + $0x158] sm:$0xff]  }
  0x68   : > { %3900 = vmatprep.subr.bf16.mxu1 %v4269_v25  ;;  %3948 = vmatprep.subr.bf16.mxu0 %v4270_v9 }
  0x69   : > { %v1092_v29 = vrot.slane %v5885_v34, 2  ;;  %v4281_v34 = vld [vmem:[%s5773_s1 + $0x150] sm:$0xff]  }
  0x6b   : > { %3901 = vmatpush3.bf16.msra.mxu1 %v4269_v25  ;;  %3949 = vmatpush3.bf16.msra.mxu0 %v4270_v9  ;;  %v1093_v43 = vsel %vm1020_vm1, %v1091_v3, %v1092_v29  ;;  %v1095_v7 = vsel %vm1020_vm1, %v1092_v29, %v1094_v46  ;;  %v5036_v9 = vld [vmem:[%s4407_s28 + $0xc8] sm:$0x1]  ;;  %v4280_v3 = vld [vmem:[%s5773_s1 + $0x198] sm:$0xff]   ;;  %v4282_v29 = vld [vmem:[%s5773_s1 + $0x190] sm:$0xff]  }
  0x6c   : > { %3982 = vmatprep.subr.bf16.mxu1 %v4271_v33  ;;  %4030 = vmatprep.subr.bf16.mxu0 %v4272_v0  ;;  %v5033_v25 = vpack.c.bf16 %v1095_v7, %v1093_v43  ;;  %v372_v53 = vunpack.c.l.bf16 %v5036_v9  ;;  %v4284_v46 = vld [vmem:[%s5773_s1 + $0x188] sm:$0xff]   ;;  %v4286_v43 = vld [vmem:[%s5773_s1 + $0x140] sm:$0xff]   ;;  %v4290_v9 = vld [vmem:[%s5773_s1 + $0x1f0] sm:$0xff]  }
  0x6d   : > { %3823 = vmatmul.mubr.bf16.gmra.mxu1 %v5000_v19  ;;  %3871 = vmatmul.mubr.bf16.gmra.mxu0 %v4852_v18  ;;  %v4287_v7 = vld [vmem:[%s5773_s1 + $0x180] sm:$0xff]  }
  0x6e   : > { %3826 = vmatprep.mubr.bf16.mxu1 %v4487_v44  ;;  %3874 = vmatprep.mubr.bf16.mxu0 %v5002_v50  ;;  %v1938_v42 = vrot.slane %v372_v53, 2 }
  0x70   : > { %v1939_v6 = vsel %vm1020_vm1, %v1936_v1, %v1938_v42  ;;  %v4289_v1 = vld [vmem:[%s5773_s1 + $0x238] sm:$0xff]   ;;  %v5888_v42 = vld [vmem:[#allocation2_spill] sm:$0xff] }
  0x71   : > { %v5053_v24 = vpack.c.bf16 %v1939_v6, %v1937_v13  ;;  %v5889_v13 = vld [vmem:[#allocation3_spill] sm:$0xff]  ;;  %v5890_v6 = vld [vmem:[#allocation4_spill] sm:$0xff] }
  0x73   : > { %5887 = vst [vmem:[#allocation6_spill] sm:$0xff] %v5053_v24 }
  0x75   : > { %3827 = vmatmul.mubr.bf16.gmra.mxu1 %v4510_v55  ;;  %3875 = vmatmul.mubr.bf16.gmra.mxu0 %v4874_v17 }
  0x76   : > { %3830 = vmatprep.mubr.bf16.mxu1 %v4551_v30  ;;  %3878 = vmatprep.mubr.bf16.mxu0 %v5016_v37 }
  0x7d   : > { %3831 = vmatmul.mubr.bf16.gmra.mxu1 %v4592_v62  ;;  %3879 = vmatmul.mubr.bf16.gmra.mxu0 %v4908_v10 }
  0x7e   : > { %3834 = vmatprep.mubr.bf16.mxu1 %v4638_v38  ;;  %3882 = vmatprep.mubr.bf16.mxu0 %v5033_v25 }
  0x85   : > { %3835 = vmatmul.mubr.bf16.gmra.mxu1 %v4694_v49  ;;  %3883 = vmatmul.mubr.bf16.gmra.mxu0 %v4928_v5 }
  0x86   : > { %3902 = vmatprep.mubr.bf16.mxu1 %v4429_v12  ;;  %3950 = vmatprep.mubr.bf16.mxu0 %v4518_v60  ;;  %v4275_v12 = vld [vmem:[%s5773_s1 + $0x168] sm:$0xff]  }
  0x87   : > { %v4276_v60 = vld [vmem:[%s5773_s1 + $0x1a8] sm:$0xff]  }
  0x8d   : > { %3903 = vmatmul.mubr.bf16.vlgmr.msra.gmra.mxu1 %v4478_v40  ;;  %3951 = vmatmul.mubr.bf16.vlgmr.msra.gmra.mxu0 %v4600_v32 }
  0x8e   : > { %3983 = vmatpush3.bf16.msra.mxu1 %v4271_v33  ;;  %4031 = vmatpush3.bf16.msra.mxu0 %v4272_v0  ;;  %v4277_v33 = vld [vmem:[%s5773_s1 + $0x160] sm:$0xff]  }
  0x8f   : > { %3906 = vmatprep.mubr.bf16.mxu1 %v4507_v54  ;;  %3954 = vmatprep.mubr.bf16.mxu0 %v4674_v56  ;;  %v4278_v0 = vld [vmem:[%s5773_s1 + $0x1a0] sm:$0xff]  }
  0x90   : > { %3984 = vmatprep.subr.bf16.mxu1 %v4273_v59  ;;  %4032 = vmatprep.subr.bf16.mxu0 %v4274_v27 }
  0x92   : > { %3985 = vmatpush3.bf16.msra.mxu1 %v4273_v59  ;;  %4033 = vmatpush3.bf16.msra.mxu0 %v4274_v27  ;;  %v5891_v59 = vld [vmem:[#allocation5_spill] sm:$0xff]  ;;  %v1669_v27 = vrot.slane %v370_v39, 1  ;;  %v4291_v39 = vld [vmem:[%s5773_s1 + $0x230] sm:$0xff]  }
  0x93   : > { %3986 = vmatprep.subr.bf16.mxu1 %v4275_v12  ;;  %4034 = vmatprep.subr.bf16.mxu0 %v4276_v60 }
  0x95   : > { %3907 = vmatmul.mubr.bf16.gmra.mxu1 %v4538_v22  ;;  %3955 = vmatmul.mubr.bf16.gmra.mxu0 %v4678_v28 }
  0x96   : > { %3910 = vmatprep.mubr.bf16.mxu1 %v4576_v57  ;;  %3958 = vmatprep.mubr.bf16.mxu0 %v4728_v11 }
  0x97   : > { %3987 = vmatpush3.bf16.msra.mxu1 %v4275_v12  ;;  %4035 = vmatpush3.bf16.msra.mxu0 %v4276_v60  ;;  %v1670_v12 = vrot.slane %v371_v45, 1  ;;  %v1672_v60 = vrot.slane %v372_v53, 1  ;;  %v4296_v45 = vld [vmem:[%s5773_s1 + $0x1d8] sm:$0xff]  }
  0x98   : > { %3988 = vmatprep.subr.bf16.mxu1 %v4277_v33  ;;  %4036 = vmatprep.subr.bf16.mxu0 %v4278_v0  ;;  %v4297_v53 = vld [vmem:[%s5773_s1 + $0x218] sm:$0xff]  }
  0x9b   : > { %3989 = vmatpush3.bf16.msra.mxu1 %v4277_v33  ;;  %4037 = vmatpush3.bf16.msra.mxu0 %v4278_v0  ;;  %v1671_v33 = vsel %vm456_vm0, %v1669_v27, %v1670_v12  ;;  %v1673_v0 = vsel %vm456_vm0, %v1670_v12, %v1672_v60 }
  0x9c   : > { %3990 = vmatprep.subr.bf16.mxu1 %v4279_v52  ;;  %4038 = vmatprep.subr.bf16.mxu0 %v4280_v3 }
  0x9d   : > { %3911 = vmatmul.mubr.bf16.gmra.mxu1 %v4628_v2  ;;  %3959 = vmatmul.mubr.bf16.gmra.mxu0 %v4761_v63 }
  0x9e   : > { %3914 = vmatprep.mubr.bf16.mxu1 %v4670_v58  ;;  %3962 = vmatprep.mubr.bf16.mxu0 %v4789_v20 }
  0x9f   : > { %3991 = vmatpush3.bf16.msra.mxu1 %v4279_v52  ;;  %4039 = vmatpush3.bf16.msra.mxu0 %v4280_v3  ;;  %v5143_v52 = vpack.c.bf16 %v1673_v0, %v1671_v33  ;;  %v4300_v3 = vld [vmem:[%s5773_s1 + $0x1c8] sm:$0xff]  }
  0xa0   : > { %3992 = vmatprep.subr.bf16.mxu1 %v4281_v34  ;;  %4040 = vmatprep.subr.bf16.mxu0 %v4282_v29 }
  0xa1   : > { %5892 = vst [vmem:[#allocation2_spill] sm:$0xff] %v5143_v52 }
  0xa3   : > { %3993 = vmatpush3.bf16.msra.mxu1 %v4281_v34  ;;  %4041 = vmatpush3.bf16.msra.mxu0 %v4282_v29  ;;  %v4301_v34 = vld [vmem:[%s5773_s1 + $0x208] sm:$0xff]  }
  0xa4   : > { %3994 = vmatprep.subr.bf16.mxu1 %v4283_v47  ;;  %4042 = vmatprep.subr.bf16.mxu0 %v4284_v46 }
  0xa5   : > { %3915 = vmatmul.mubr.bf16.gmra.mxu1 %v4973_v31  ;;  %3963 = vmatmul.mubr.bf16.gmra.mxu0 %v4470_v36 }
  0xa6   : > { %3918 = vmatprep.mubr.bf16.mxu1 %v5000_v19  ;;  %3966 = vmatprep.mubr.bf16.mxu0 %v4582_v21 }
  0xa7   : > { %3995 = vmatpush3.bf16.msra.mxu1 %v4283_v47  ;;  %4043 = vmatpush3.bf16.msra.mxu0 %v4284_v46 }
  0xa8   : > { %3996 = vmatprep.subr.bf16.mxu1 %v4286_v43  ;;  %4044 = vmatprep.subr.bf16.mxu0 %v4287_v7 }
  0xab   : > { %3997 = vmatpush3.bf16.msra.mxu1 %v4286_v43  ;;  %4045 = vmatpush3.bf16.msra.mxu0 %v4287_v7 }
  0xac   : > { %4078 = vmatprep.subr.bf16.mxu1 %v4288_v51  ;;  %4126 = vmatprep.subr.bf16.mxu0 %v4289_v1 }
  0xad   : > { %3919 = vmatmul.mubr.bf16.gmra.mxu1 %v4487_v44  ;;  %3967 = vmatmul.mubr.bf16.gmra.mxu0 %v5888_v42 }
  0xae   : > { %3922 = vmatprep.mubr.bf16.mxu1 %v4510_v55  ;;  %3970 = vmatprep.mubr.bf16.mxu0 %v5889_v13 }
  0xb5   : > { %3923 = vmatmul.mubr.bf16.gmra.mxu1 %v4551_v30  ;;  %3971 = vmatmul.mubr.bf16.gmra.mxu0 %v5890_v6 }
  0xb6   : > { %3926 = vmatprep.mubr.bf16.mxu1 %v4592_v62  ;;  %3974 = vmatprep.mubr.bf16.mxu0 %v5891_v59 }
  0xbd   : > { %3927 = vmatmul.mubr.bf16.gmra.mxu1 %v4638_v38  ;;  %3975 = vmatmul.mubr.bf16.gmra.mxu0 %v4763_v61 }
  0xbe   : > { %3930 = vmatprep.mubr.bf16.mxu1 %v4694_v49  ;;  %3978 = vmatprep.mubr.bf16.mxu0 %v4791_v48 }
  0xc5   : > { %3931 = vmatmul.mubr.bf16.gmra.mxu1 %v5031_v15  ;;  %3979 = vmatmul.mubr.bf16.gmra.mxu0 %v5143_v52 }
  0xc6   : > { %3998 = vmatprep.mubr.bf16.mxu1 %v4820_v41  ;;  %4046 = vmatprep.mubr.bf16.mxu0 %v4478_v40  ;;  %v4292_v40 = vld [vmem:[%s5773_s1 + $0x1e8] sm:$0xff]  }
  0xc7   : > { %v4293_v41 = vld [vmem:[%s5773_s1 + $0x228] sm:$0xff]  }
  0xcd   : > { %3999 = vmatmul.mubr.bf16.vlgmr.msra.gmra.mxu1 %v4856_v16  ;;  %4047 = vmatmul.mubr.bf16.vlgmr.msra.gmra.mxu0 %v4507_v54  ;;  %v4294_v54 = vld [vmem:[%s5773_s1 + $0x1e0] sm:$0xff]  }
  0xce   : > { %4079 = vmatpush3.bf16.msra.mxu1 %v4288_v51  ;;  %4127 = vmatpush3.bf16.msra.mxu0 %v4289_v1 }
  0xcf   : > { %4002 = vmatprep.mubr.bf16.mxu1 %v4892_v4  ;;  %4050 = vmatprep.mubr.bf16.mxu0 %v4538_v22  ;;  %v4295_v22 = vld [vmem:[%s5773_s1 + $0x220] sm:$0xff]  }
  0xd0   : > { %4080 = vmatprep.subr.bf16.mxu1 %v4290_v9  ;;  %4128 = vmatprep.subr.bf16.mxu0 %v4291_v39 }
  0xd2   : > { %4081 = vmatpush3.bf16.msra.mxu1 %v4290_v9  ;;  %4129 = vmatpush3.bf16.msra.mxu0 %v4291_v39 }
  0xd3   : > { %4082 = vmatprep.subr.bf16.mxu1 %v4292_v40  ;;  %4130 = vmatprep.subr.bf16.mxu0 %v4293_v41 }
  0xd5   : > { %4003 = vmatmul.mubr.bf16.gmra.mxu1 %v4904_v8  ;;  %4051 = vmatmul.mubr.bf16.gmra.mxu0 %v4576_v57  ;;  %v4298_v57 = vld [vmem:[%s5773_s1 + $0x1d0] sm:$0xff]  }
  0xd6   : > { %4006 = vmatprep.mubr.bf16.mxu1 %v4942_v23  ;;  %4054 = vmatprep.mubr.bf16.mxu0 %v4628_v2  ;;  %v4299_v2 = vld [vmem:[%s5773_s1 + $0x210] sm:$0xff]  }
  0xd7   : > { %4083 = vmatpush3.bf16.msra.mxu1 %v4292_v40  ;;  %4131 = vmatpush3.bf16.msra.mxu0 %v4293_v41 }
  0xd8   : > { %4084 = vmatprep.subr.bf16.mxu1 %v4294_v54  ;;  %4132 = vmatprep.subr.bf16.mxu0 %v4295_v22 }
  0xdb   : > { %4085 = vmatpush3.bf16.msra.mxu1 %v4294_v54  ;;  %4133 = vmatpush3.bf16.msra.mxu0 %v4295_v22 }
  0xdc   : > { %4086 = vmatprep.subr.bf16.mxu1 %v4296_v45  ;;  %4134 = vmatprep.subr.bf16.mxu0 %v4297_v53 }
  0xdd   : > { %4007 = vmatmul.mubr.bf16.gmra.mxu1 %v4946_v14  ;;  %4055 = vmatmul.mubr.bf16.gmra.mxu0 %v4670_v58  ;;  %v4303_v58 = vld [vmem:[%s5773_s1 + $0x1c0] sm:$0xff]  }
  0xde   : > { %4010 = vmatprep.mubr.bf16.mxu1 %v4970_v35  ;;  %4058 = vmatprep.mubr.bf16.mxu0 %v4973_v31  ;;  %v4304_v31 = vld [vmem:[%s5773_s1 + $0x200] sm:$0xff]  }
  0xdf   : > { %4087 = vmatpush3.bf16.msra.mxu1 %v4296_v45  ;;  %4135 = vmatpush3.bf16.msra.mxu0 %v4297_v53 }
  0xe0   : > { %4088 = vmatprep.subr.bf16.mxu1 %v4298_v57  ;;  %4136 = vmatprep.subr.bf16.mxu0 %v4299_v2 }
  0xe3   : > { %4089 = vmatpush3.bf16.msra.mxu1 %v4298_v57  ;;  %4137 = vmatpush3.bf16.msra.mxu0 %v4299_v2 }
  0xe4   : > { %4090 = vmatprep.subr.bf16.mxu1 %v4300_v3  ;;  %4138 = vmatprep.subr.bf16.mxu0 %v4301_v34 }
  0xe5   : > { %4011 = vmatmul.mubr.bf16.gmra.mxu1 %v4844_v26  ;;  %4059 = vmatmul.mubr.bf16.gmra.mxu0 %v5000_v19 }
  0xe6   : > { %4014 = vmatprep.mubr.bf16.mxu1 %v4852_v18  ;;  %4062 = vmatprep.mubr.bf16.mxu0 %v4487_v44 }
  0xe7   : > { %4091 = vmatpush3.bf16.msra.mxu1 %v4300_v3  ;;  %4139 = vmatpush3.bf16.msra.mxu0 %v4301_v34 }
  0xe8   : > { %4092 = vmatprep.subr.bf16.mxu1 %v4303_v58  ;;  %4140 = vmatprep.subr.bf16.mxu0 %v4304_v31 }
  0xeb   : > { %4093 = vmatpush3.bf16.msra.mxu1 %v4303_v58  ;;  %4141 = vmatpush3.bf16.msra.mxu0 %v4304_v31 }
  0xed   : > { %v3760_v29 = vpop.f32.mrf.mxu0  ;;  %v5207_v47 = vpop.f32.mrf.mxu1  ;;  %4015 = vmatmul.mubr.bf16.gmra.mxu1 %v5002_v50  ;;  %4063 = vmatmul.mubr.bf16.gmra.mxu0 %v4510_v55 }
  0xee   : > { %4018 = vmatprep.mubr.bf16.mxu1 %v4874_v17  ;;  %4066 = vmatprep.mubr.bf16.mxu0 %v4551_v30 }
  0xef   : > { %v684_v19 = vpop.f32.mrf.mxu0  ;;  %v5213_v46 = vpop.f32.mrf.mxu1 }
  0xf1   : > { %v3761_v44 = vpop.f32.mrf.mxu0  ;;  %v5215_v43 = vpop.f32.mrf.mxu1 }
  0xf3   : > { %v687_v7 = vpop.f32.mrf.mxu0  ;;  %v5217_v51 = vpop.f32.mrf.mxu1 }
  0xf5   : > { %v3764_v1 = vpop.f32.mrf.mxu0  ;;  %v5219_v27 = vpop.f32.mrf.mxu1  ;;  %4019 = vmatmul.mubr.bf16.gmra.mxu1 %v5016_v37  ;;  %4067 = vmatmul.mubr.bf16.gmra.mxu0 %v4592_v62  ;;  %v5244_v62 = vld [vmem:[%s4407_s28 + $0xcc] sm:$0xff]  }
  0xf6   : > { %4022 = vmatprep.mubr.bf16.mxu1 %v4908_v10  ;;  %4070 = vmatprep.mubr.bf16.mxu0 %v4638_v38 }
  0xf7   : > { %v700_v55 = vpop.f32.mrf.mxu0  ;;  %v5225_v30 = vpop.f32.mrf.mxu1 }
  0xf9   : > { %v5227_v12 = vpop.f32.mrf.mxu0  ;;  %v5229_v60 = vpop.f32.mrf.mxu1 }
  0xfb   : > { %v5231_v33 = vpop.f32.mrf.mxu0  ;;  %v5233_v0 = vpop.f32.mrf.mxu1 }
  0xfd   : > { %v5235_v9 = vpop.f32.mrf.mxu0  ;;  %v5237_v39 = vpop.f32.mrf.mxu1  ;;  %4023 = vmatmul.mubr.bf16.gmra.mxu1 %v5033_v25  ;;  %4071 = vmatmul.mubr.bf16.gmra.mxu0 %v4694_v49 }
  0xfe   : > { %5893 = vst [vmem:[#allocation3_spill] sm:$0xff] %v5237_v39  ;;  %4026 = vmatprep.mubr.bf16.mxu1 %v4928_v5  ;;  %4074 = vmatprep.mubr.bf16.mxu0 %v5031_v15 }
  0xff   : > { %v5246_v38 = vpop.f32.mrf.mxu0  ;;  %v5248_v40 = vpop.f32.mrf.mxu1 }
 0x100   : > { %5894 = vst [vmem:[#allocation4_spill] sm:$0xff] %v5248_v40 }
 0x101   : > { %v5250_v41 = vpop.f32.mrf.mxu0  ;;  %v5252_v54 = vpop.f32.mrf.mxu1 }
 0x102   : > { %5895 = vst [vmem:[#allocation5_spill] sm:$0xff] %v5252_v54 }
 0x103   : > { %v5254_v22 = vpop.f32.mrf.mxu0  ;;  %v5256_v45 = vpop.f32.mrf.mxu1 }
 0x104   : > { %5896 = vst [vmem:[#allocation7_spill] sm:$0xff] %v5256_v45 }
 0x105   : > { %v5258_v53 = vpop.f32.mrf.mxu0  ;;  %v5260_v49 = vpop.f32.mrf.mxu1  ;;  %4027 = vmatmul.mubr.bf16.gmra.mxu1 %v5053_v24  ;;  %4075 = vmatmul.mubr.bf16.gmra.mxu0 %v5244_v62 }
 0x106   : > { %5897 = vst [vmem:[#allocation8_spill] sm:$0xff] %v5260_v49  ;;  %4094 = vmatprep.mubr.bf16.mxu1 %v4600_v32  ;;  %4142 = vmatprep.mubr.bf16.mxu0 %v4856_v16 }
 0x107   : > { %v5266_v15 = vpop.f32.mrf.mxu0  ;;  %v5268_v57 = vpop.f32.mrf.mxu1 }
 0x108   : > { %5898 = vst [vmem:[#allocation9_spill] sm:$0xff] %v5268_v57 }
 0x109   : > { %v5270_v2 = vpop.f32.mrf.mxu0  ;;  %v5272_v3 = vpop.f32.mrf.mxu1 }
 0x10a   : > { %5899 = vst [vmem:[#allocation10_spill] sm:$0xff] %v5272_v3 }
 0x10b   : > { %v5274_v34 = vpop.f32.mrf.mxu0  ;;  %v5276_v58 = vpop.f32.mrf.mxu1 }
 0x10c   : > { %5900 = vst [vmem:[#allocation11_spill] sm:$0xff] %v5276_v58 }
 0x10d   : > { %v3808_v31 = vpop.f32.mrf.mxu1  ;;  %v3856_v49 = vpop.f32.mrf.mxu0  ;;  %4095 = vmatmul.mubr.bf16.vlgmr.msra.gmra.mxu1 %v4674_v56  ;;  %4143 = vmatmul.mubr.bf16.vlgmr.msra.gmra.mxu0 %v4892_v4 }
 0x10e   : > { %v902_v32 = vadd.f32 %v3808_v31, %v3760_v29  ;;  %4098 = vmatprep.mubr.bf16.mxu1 %v4678_v28  ;;  %4146 = vmatprep.mubr.bf16.mxu0 %v4904_v8 }
 0x10f   : > { %v893_v16 = vpop.f32.mrf.mxu1  ;;  %v1248_v57 = vpop.f32.mrf.mxu0 }
 0x110   : > { %v5282_v45 = vadd.f32 %v3856_v49, %v902_v32  ;;  %v894_v3 = vadd.f32 %v893_v16, %v684_v19 }
 0x111   : > { %v3809_v54 = vpop.f32.mrf.mxu1  ;;  %v3857_v40 = vpop.f32.mrf.mxu0 }
 0x112   : > { %v5284_v24 = vadd.f32 %v1248_v57, %v894_v3  ;;  %v905_v58 = vadd.f32 %v3809_v54, %v3761_v44 }
 0x113   : > { %v896_v52 = vpop.f32.mrf.mxu1  ;;  %v1251_v39 = vpop.f32.mrf.mxu0 }
 0x114   : > { %v5286_v56 = vadd.f32 %v3857_v40, %v905_v58  ;;  %v897_v4 = vadd.f32 %v896_v52, %v687_v7 }
 0x115   : > { %v3812_v29 = vpop.f32.mrf.mxu1  ;;  %v3860_v31 = vpop.f32.mrf.mxu0  ;;  %4099 = vmatmul.mubr.bf16.gmra.mxu1 %v4728_v11  ;;  %4147 = vmatmul.mubr.bf16.gmra.mxu0 %v4942_v23 }
 0x116   : > { %v5290_v28 = vadd.f32 %v1251_v39, %v897_v4  ;;  %v918_v8 = vadd.f32 %v3812_v29, %v3764_v1  ;;  %4102 = vmatprep.mubr.bf16.mxu1 %v4761_v63  ;;  %4150 = vmatprep.mubr.bf16.mxu0 %v4946_v14 }
 0x117   : > { %v909_v19 = vpop.f32.mrf.mxu1  ;;  %v1264_v44 = vpop.f32.mrf.mxu0 }
 0x118   : > { %v5294_v54 = vadd.f32 %v3860_v31, %v918_v8  ;;  %v910_v40 = vadd.f32 %v909_v19, %v700_v55 }
 0x119   : > { %v3813_v49 = vpop.f32.mrf.mxu1  ;;  %v3861_v52 = vpop.f32.mrf.mxu0 }
 0x11a   : > { %v5296_v7 = vadd.f32 %v1264_v44, %v910_v40  ;;  %v921_v11 = vadd.f32 %v3813_v49, %v5227_v12 }
 0x11b   : > { %v912_v57 = vpop.f32.mrf.mxu1  ;;  %v1267_v23 = vpop.f32.mrf.mxu0 }
 0x11c   : > { %v5299_v39 = vadd.f32 %v3861_v52, %v921_v11  ;;  %v913_v1 = vadd.f32 %v912_v57, %v5231_v33 }
 0x11d   : > { %v3816_v63 = vpop.f32.mrf.mxu1  ;;  %v3864_v3 = vpop.f32.mrf.mxu0  ;;  %4103 = vmatmul.mubr.bf16.gmra.mxu1 %v4789_v20  ;;  %4151 = vmatmul.mubr.bf16.gmra.mxu0 %v4970_v35 }
 0x11e   : > { %v5304_v14 = vadd.f32 %v1267_v23, %v913_v1  ;;  %v934_v55 = vadd.f32 %v3816_v63, %v5235_v9  ;;  %4106 = vmatprep.mubr.bf16.mxu1 %v4470_v36  ;;  %4154 = vmatprep.mubr.bf16.mxu0 %v4844_v26 }
 0x11f   : > { %v925_v12 = vpop.f32.mrf.mxu1  ;;  %v1280_v58 = vpop.f32.mrf.mxu0 }
 0x120   : > { %v5309_v32 = vadd.f32 %v3864_v3, %v934_v55  ;;  %v926_v33 = vadd.f32 %v925_v12, %v5246_v38 }
 0x121   : > { %v3817_v16 = vpop.f32.mrf.mxu1  ;;  %v3865_v4 = vpop.f32.mrf.mxu0 }
 0x122   : > { %v5312_v29 = vadd.f32 %v1280_v58, %v926_v33  ;;  %v937_v20 = vadd.f32 %v3817_v16, %v5250_v41 }
 0x123   : > { %v928_v35 = vpop.f32.mrf.mxu1  ;;  %v1283_v31 = vpop.f32.mrf.mxu0 }
 0x124   : > { %v5315_v8 = vadd.f32 %v3865_v4, %v937_v20  ;;  %v929_v36 = vadd.f32 %v928_v35, %v5254_v22  ;;  %v374_v4 = vunpack.c.h.bf16 %v5244_v62 }
 0x125   : > { %v3820_v9 = vpop.f32.mrf.mxu1  ;;  %v3868_v26 = vpop.f32.mrf.mxu0  ;;  %4107 = vmatmul.mubr.bf16.gmra.mxu1 %v4582_v21  ;;  %4155 = vmatmul.mubr.bf16.gmra.mxu0 %v4852_v18 }
 0x126   : > { %v5320_v19 = vadd.f32 %v1283_v31, %v929_v36  ;;  %v950_v38 = vadd.f32 %v3820_v9, %v5258_v53  ;;  %4110 = vmatprep.mubr.bf16.mxu1 %v5888_v42  ;;  %4158 = vmatprep.mubr.bf16.mxu0 %v5002_v50 }
 0x127   : > { %v941_v41 = vpop.f32.mrf.mxu1  ;;  %v1296_v44 = vpop.f32.mrf.mxu0 }
 0x128   : > { %v5325_v40 = vadd.f32 %v3868_v26, %v950_v38  ;;  %v942_v22 = vadd.f32 %v941_v41, %v5266_v15  ;;  %v2464_v38 = vrot.slane %v374_v4, 1  ;;  %v2730_v41 = vrot.slane %v374_v4, 2  ;;  %v5905_v4 = vld [vmem:[#allocation5_spill] sm:$0xff] }
 0x129   : > { %v3821_v49 = vpop.f32.mrf.mxu1  ;;  %v3869_v52 = vpop.f32.mrf.mxu0 }
 0x12a   : > { %v5328_v11 = vadd.f32 %v1296_v44, %v942_v22  ;;  %v953_v21 = vadd.f32 %v3821_v49, %v5270_v2 }
 0x12b   : > { %v944_v18 = vpop.f32.mrf.mxu1  ;;  %v1299_v57 = vpop.f32.mrf.mxu0 }
 0x12c   : > { %v5331_v23 = vadd.f32 %v3869_v52, %v953_v21  ;;  %v945_v42 = vadd.f32 %v944_v18, %v5274_v34 }
 0x12d   : > { %v3824_v53 = vpop.f32.mrf.mxu1  ;;  %v3872_v50 = vpop.f32.mrf.mxu0  ;;  %4111 = vmatmul.mubr.bf16.gmra.mxu1 %v5889_v13  ;;  %4159 = vmatmul.mubr.bf16.gmra.mxu0 %v4874_v17  ;;  %v321_v13 = vld [vmem:[%s4407_s28 + $0xd4] sm:$0x1]  ;;  %s3525_s28 = sshll.u32 %s5998_s15, 8 }
 0x12e   : > { %v5336_v15 = vadd.f32 %v1299_v57, %v945_v42  ;;  %v966_v1 = vadd.f32 %v3824_v53, %v5207_v47  ;;  %4114 = vmatprep.mubr.bf16.mxu1 %v5890_v6  ;;  %4162 = vmatprep.mubr.bf16.mxu0 %v5016_v37  ;;  %v373_v47 = vunpack.c.l.bf16 %v5244_v62  ;;  %s5635_s21 = scalar_lea.vmem %s5774_s2, %s3525_s28 }
 0x12f   : > { %v957_v2 = vpop.f32.mrf.mxu1  ;;  %v1312_v63 = vpop.f32.mrf.mxu0 }
 0x130   : > { %v5341_v3 = vadd.f32 %v3872_v50, %v966_v1  ;;  %v958_v34 = vadd.f32 %v957_v2, %v5213_v46  ;;  %v375_v46 = vunpack.c.l.bf16 %v321_v13  ;;  %v5901_v1 = vld [vmem:[#allocation3_spill] sm:$0xff] }
 0x131   : > { %v3825_v55 = vpop.f32.mrf.mxu1  ;;  %v3873_v12 = vpop.f32.mrf.mxu0 }
 0x132   : > { %v5344_v58 = vadd.f32 %v1312_v63, %v958_v34  ;;  %v969_v17 = vadd.f32 %v3825_v55, %v5215_v43  ;;  %v2466_v22 = vrot.slane %v375_v46, 1  ;;  %v5902_v63 = vld [vmem:[#allocation2_spill] sm:$0xff] }
 0x133   : > { %v960_v33 = vpop.f32.mrf.mxu1  ;;  %v1315_v16 = vpop.f32.mrf.mxu0  ;;  %v5903_v34 = vld [vmem:[#allocation6_spill] sm:$0xff] }
 0x134   : > { %v5349_v6 = vadd.f32 %v3873_v12, %v969_v17  ;;  %v961_v37 = vadd.f32 %v960_v33, %v5217_v51  ;;  %v2463_v51 = vrot.slane %v373_v47, 1  ;;  %v2467_v53 = vsel %vm456_vm0, %v2464_v38, %v2466_v22 }
 0x135   : > { %v3828_v20 = vpop.f32.mrf.mxu1  ;;  %v3876_v35 = vpop.f32.mrf.mxu0  ;;  %4115 = vmatmul.mubr.bf16.gmra.mxu1 %v5891_v59  ;;  %4163 = vmatmul.mubr.bf16.gmra.mxu0 %v4908_v10  ;;  %v2729_v59 = vrot.slane %v373_v47, 2 }
 0x136   : > { %v5355_v31 = vadd.f32 %v1315_v16, %v961_v37  ;;  %v982_v43 = vadd.f32 %v3828_v20, %v5219_v27  ;;  %4118 = vmatprep.mubr.bf16.mxu1 %v4763_v61  ;;  %4166 = vmatprep.mubr.bf16.mxu0 %v5033_v25  ;;  %v2732_v61 = vrot.slane %v375_v46, 2 }
 0x137   : > { %v973_v36 = vpop.f32.mrf.mxu1  ;;  %v1328_v9 = vpop.f32.mrf.mxu0  ;;  %v2731_v50 = vsel %vm1020_vm1, %v2729_v59, %v2730_v41  ;;  %v5907_v59 = vld [vmem:[#allocation8_spill] sm:$0xff] }
 0x138   : > { %v5360_v26 = vadd.f32 %v3876_v35, %v982_v43  ;;  %v974_v62 = vadd.f32 %v973_v36, %v5225_v30  ;;  %v2465_v30 = vsel %vm456_vm0, %v2463_v51, %v2464_v38  ;;  %v5906_v36 = vld [vmem:[#allocation7_spill] sm:$0xff] }
 0x139   : > { %v3829_v10 = vpop.f32.mrf.mxu1  ;;  %v3877_v44 = vpop.f32.mrf.mxu0  ;;  %v2470_v16 = vpack.c.bf16 %v2467_v53, %v2465_v30 }
 0x13a   : > { %v5363_v49 = vadd.f32 %v1328_v9, %v974_v62  ;;  %v985_v27 = vadd.f32 %v3829_v10, %v5229_v60 }
 0x13b   : > { %v976_v52 = vpop.f32.mrf.mxu1  ;;  %v1331_v25 = vpop.f32.mrf.mxu0 }
 0x13c   : > { %v5366_v21 = vadd.f32 %v3877_v44, %v985_v27  ;;  %v977_v18 = vadd.f32 %v976_v52, %v5233_v0  ;;  %v2733_v0 = vsel %vm1020_vm1, %v2730_v41, %v2732_v61  ;;  %v5908_v27 = vld [vmem:[#allocation9_spill] sm:$0xff] }
 0x13d   : > { %v3832_v57 = vpop.f32.mrf.mxu1  ;;  %v3880_v42 = vpop.f32.mrf.mxu0  ;;  %4119 = vmatmul.mubr.bf16.gmra.mxu1 %v4791_v48  ;;  %4167 = vmatmul.mubr.bf16.gmra.mxu0 %v4928_v5  ;;  %v5904_v5 = vld [vmem:[#allocation4_spill] sm:$0xff]  ;;  %v2736_v47 = vpack.c.bf16 %v2733_v0, %v2731_v50 }
 0x13e   : > { %v5374_v60 = vadd.f32 %v1331_v25, %v977_v18  ;;  %v998_v2 = vadd.f32 %v3832_v57, %v5901_v1  ;;  %4122 = vmatprep.mubr.bf16.mxu1 %v5902_v63  ;;  %4170 = vmatprep.mubr.bf16.mxu0 %v5903_v34  ;;  %v5909_v57 = vld [vmem:[#allocation10_spill] sm:$0xff]  ;;  %v5910_v1 = vld [vmem:[#allocation11_spill] sm:$0xff] }
 0x13f   : > { %v989_v55 = vpop.f32.mrf.mxu1  ;;  %v1344_v48 = vpop.f32.mrf.mxu0 }
 0x140   : > { %v5380_v12 = vadd.f32 %v3880_v42, %v998_v2  ;;  %v990_v17 = vadd.f32 %v989_v55, %v5904_v5 }
 0x141   : > { %v3833_v13 = vpop.f32.mrf.mxu1  ;;  %v3881_v33 = vpop.f32.mrf.mxu0 }
 0x142   : > { %v5383_v37 = vadd.f32 %v1344_v48, %v990_v17  ;;  %v1001_v20 = vadd.f32 %v3833_v13, %v5905_v4 }
 0x143   : > { %v992_v35 = vpop.f32.mrf.mxu1  ;;  %v1347_v46 = vpop.f32.mrf.mxu0 }
 0x144   : > { %v5386_v43 = vadd.f32 %v3881_v33, %v1001_v20  ;;  %v993_v9 = vadd.f32 %v992_v35, %v5906_v36 }
 0x145   : > { %v3836_v51 = vpop.f32.mrf.mxu1  ;;  %v3884_v62 = vpop.f32.mrf.mxu0  ;;  %4123 = vmatmul.mubr.bf16.gmra.mxu1 %v2470_v16  ;;  %4171 = vmatmul.mubr.bf16.gmra.mxu0 %v2736_v47 }
 0x146   : > { %v5389_v38 = vadd.f32 %v1347_v46, %v993_v9  ;;  %v1014_v41 = vadd.f32 %v3836_v51, %v5907_v59 }
 0x147   : > { %v1005_v10 = vpop.f32.mrf.mxu1  ;;  %v1360_v44 = vpop.f32.mrf.mxu0 }
 0x148   : > { %v5392_v22 = vadd.f32 %v3884_v62, %v1014_v41  ;;  %v1006_v61 = vadd.f32 %v1005_v10, %v5908_v27 }
 0x149   : > { %v3837_v52 = vpop.f32.mrf.mxu1  ;;  %v3885_v25 = vpop.f32.mrf.mxu0 }
 0x14a   : > { %v5395_v18 = vadd.f32 %v1360_v44, %v1006_v61  ;;  %v1017_v42 = vadd.f32 %v3837_v52, %v5909_v57 }
 0x14b   : > { %v1008_v30 = vpop.f32.mrf.mxu1  ;;  %v1363_v53 = vpop.f32.mrf.mxu0 }
 0x14c   : > { %v5398_v50 = vadd.f32 %v3885_v25, %v1017_v42  ;;  %v1009_v2 = vadd.f32 %v1008_v30, %v5910_v1 }
 0x14d   : > { %v3904_v63 = vpop.f32.mrf.mxu1  ;;  %v3952_v34 = vpop.f32.mrf.mxu0 }
 0x14e   : > { %v5401_v0 = vadd.f32 %v1363_v53, %v1009_v2  ;;  %v1636_v55 = vadd.f32 %v3904_v63, %v5282_v45 }
 0x14f   : > { %v1507_v48 = vpop.f32.mrf.mxu1  ;;  %v1776_v5 = vpop.f32.mrf.mxu0 }
 0x150   : > { %v5404_v17 = vadd.f32 %v3952_v34, %v1636_v55  ;;  %v1634_v13 = vadd.f32 %v1507_v48, %v5284_v24 }
 0x151   : > { %v3905_v33 = vpop.f32.mrf.mxu1  ;;  %v3953_v16 = vpop.f32.mrf.mxu0 }
 0x152   : > { %v5407_v47 = vadd.f32 %v1776_v5, %v1634_v13  ;;  %v1637_v4 = vadd.f32 %v3905_v33, %v5286_v56 }
 0x153   : > { %v1510_v20 = vpop.f32.mrf.mxu1  ;;  %v1779_v35 = vpop.f32.mrf.mxu0 }
 0x154   : > { %v5410_v46 = vadd.f32 %v3953_v16, %v1637_v4  ;;  %v1635_v36 = vadd.f32 %v1510_v20, %v5290_v28 }
 0x155   : > { %v3908_v9 = vpop.f32.mrf.mxu1  ;;  %v3956_v45 = vpop.f32.mrf.mxu0 }
 0x156   : > { %v5413_v51 = vadd.f32 %v1779_v35, %v1635_v36  ;;  %v1640_v62 = vadd.f32 %v3908_v9, %v5294_v54 }
 0x157   : > { %v1523_v59 = vpop.f32.mrf.mxu1  ;;  %v1792_v24 = vpop.f32.mrf.mxu0 }
 0x158   : > { %v5416_v41 = vadd.f32 %v3956_v45, %v1640_v62  ;;  %v1638_v10 = vadd.f32 %v1523_v59, %v5296_v7 }
 0x159   : > { %v3909_v44 = vpop.f32.mrf.mxu1  ;;  %v3957_v56 = vpop.f32.mrf.mxu0 }
 0x15a   : > { %v5419_v27 = vadd.f32 %v1792_v24, %v1638_v10  ;;  %v1641_v61 = vadd.f32 %v3909_v44, %v5299_v39 }
 0x15b   : > { %v1526_v52 = vpop.f32.mrf.mxu1  ;;  %v1795_v28 = vpop.f32.mrf.mxu0 }
 0x15c   : > { %v5422_v25 = vadd.f32 %v3957_v56, %v1641_v61  ;;  %v1639_v57 = vadd.f32 %v1526_v52, %v5304_v14 }
 0x15d   : > { %v3912_v42 = vpop.f32.mrf.mxu1  ;;  %v3960_v54 = vpop.f32.mrf.mxu0 }
 0x15e   : > { %v5425_v30 = vadd.f32 %v1795_v28, %v1639_v57  ;;  %v1644_v53 = vadd.f32 %v3912_v42, %v5309_v32 }
 0x15f   : > { %v1539_v1 = vpop.f32.mrf.mxu1  ;;  %v1808_v7 = vpop.f32.mrf.mxu0 }
 0x160   : > { %v5428_v2 = vadd.f32 %v3960_v54, %v1644_v53  ;;  %v1642_v63 = vadd.f32 %v1539_v1, %v5312_v29 }
 0x161   : > { %v3913_v34 = vpop.f32.mrf.mxu1  ;;  %v3961_v39 = vpop.f32.mrf.mxu0 }
 0x162   : > { %v5431_v55 = vadd.f32 %v1808_v7, %v1642_v63  ;;  %v1645_v48 = vadd.f32 %v3913_v34, %v5315_v8 }
 0x163   : > { %v1542_v5 = vpop.f32.mrf.mxu1  ;;  %v1811_v14 = vpop.f32.mrf.mxu0 }
 0x164   : > { %v5434_v13 = vadd.f32 %v3961_v39, %v1645_v48  ;;  %v1643_v33 = vadd.f32 %v1542_v5, %v5320_v19 }
 0x165   : > { %v3916_v16 = vpop.f32.mrf.mxu1  ;;  %v3964_v32 = vpop.f32.mrf.mxu0 }
 0x166   : > { %v5437_v4 = vadd.f32 %v1811_v14, %v1643_v33  ;;  %v1648_v20 = vadd.f32 %v3916_v16, %v5325_v40 }
 0x167   : > { %v1555_v35 = vpop.f32.mrf.mxu1  ;;  %v1824_v29 = vpop.f32.mrf.mxu0 }
 0x168   : > { %v5440_v36 = vadd.f32 %v3964_v32, %v1648_v20  ;;  %v1646_v9 = vadd.f32 %v1555_v35, %v5328_v11 }
 0x169   : > { %v3917_v45 = vpop.f32.mrf.mxu1  ;;  %v3965_v8 = vpop.f32.mrf.mxu0 }
 0x16a   : > { %v5443_v62 = vadd.f32 %v1824_v29, %v1646_v9  ;;  %v1649_v59 = vadd.f32 %v3917_v45, %v5331_v23 }
 0x16b   : > { %v1558_v24 = vpop.f32.mrf.mxu1  ;;  %v1827_v19 = vpop.f32.mrf.mxu0 }
 0x16c   : > { %v5446_v10 = vadd.f32 %v3965_v8, %v1649_v59  ;;  %v1647_v44 = vadd.f32 %v1558_v24, %v5336_v15 }
 0x16d   : > { %v3920_v56 = vpop.f32.mrf.mxu1  ;;  %v3968_v40 = vpop.f32.mrf.mxu0 }
 0x16e   : > { %v5449_v61 = vadd.f32 %v1827_v19, %v1647_v44  ;;  %v1652_v52 = vadd.f32 %v3920_v56, %v5341_v3 }
 0x16f   : > { %v1571_v28 = vpop.f32.mrf.mxu1  ;;  %v1840_v11 = vpop.f32.mrf.mxu0 }
 0x170   : > { %v5452_v57 = vadd.f32 %v3968_v40, %v1652_v52  ;;  %v1650_v42 = vadd.f32 %v1571_v28, %v5344_v58 }
 0x171   : > { %v3921_v54 = vpop.f32.mrf.mxu1  ;;  %v3969_v23 = vpop.f32.mrf.mxu0 }
 0x172   : > { %v5455_v53 = vadd.f32 %v1840_v11, %v1650_v42  ;;  %v1653_v1 = vadd.f32 %v3921_v54, %v5349_v6 }
 0x173   : > { %v1574_v7 = vpop.f32.mrf.mxu1  ;;  %v1843_v15 = vpop.f32.mrf.mxu0 }
 0x174   : > { %v5458_v63 = vadd.f32 %v3969_v23, %v1653_v1  ;;  %v1651_v34 = vadd.f32 %v1574_v7, %v5355_v31 }
 0x175   : > { %v3924_v39 = vpop.f32.mrf.mxu1  ;;  %v3972_v3 = vpop.f32.mrf.mxu0 }
 0x176   : > { %5911 = vst [vmem:[#allocation3_spill] sm:$0xff] %v5458_v63  ;;  %v5461_v48 = vadd.f32 %v1843_v15, %v1651_v34  ;;  %v1656_v5 = vadd.f32 %v3924_v39, %v5360_v26 }
 0x177   : > { %v1587_v14 = vpop.f32.mrf.mxu1  ;;  %v1856_v58 = vpop.f32.mrf.mxu0 }
 0x178   : > { %5912 = vst [vmem:[#allocation2_spill] sm:$0xff] %v5461_v48  ;;  %v5464_v33 = vadd.f32 %v3972_v3, %v1656_v5  ;;  %v1654_v16 = vadd.f32 %v1587_v14, %v5363_v49 }
 0x179   : > { %v3925_v32 = vpop.f32.mrf.mxu1  ;;  %v3973_v6 = vpop.f32.mrf.mxu0 }
 0x17a   : > { %5913 = vst [vmem:[#allocation6_spill] sm:$0xff] %v5464_v33  ;;  %v5467_v20 = vadd.f32 %v1856_v58, %v1654_v16  ;;  %v1657_v35 = vadd.f32 %v3925_v32, %v5366_v21 }
 0x17b   : > { %v1590_v29 = vpop.f32.mrf.mxu1  ;;  %v1859_v31 = vpop.f32.mrf.mxu0 }
 0x17c   : > { %5914 = vst [vmem:[#allocation4_spill] sm:$0xff] %v5467_v20  ;;  %v5470_v9 = vadd.f32 %v3973_v6, %v1657_v35  ;;  %v1655_v45 = vadd.f32 %v1590_v29, %v5374_v60 }
 0x17d   : > { %v3928_v8 = vpop.f32.mrf.mxu1  ;;  %v3976_v26 = vpop.f32.mrf.mxu0 }
 0x17e   : > { %5915 = vst [vmem:[#allocation5_spill] sm:$0xff] %v5470_v9  ;;  %v5473_v59 = vadd.f32 %v1859_v31, %v1655_v45  ;;  %v1660_v24 = vadd.f32 %v3928_v8, %v5380_v12 }
 0x17f   : > { %v1603_v19 = vpop.f32.mrf.mxu1  ;;  %v1872_v49 = vpop.f32.mrf.mxu0 }
 0x180   : > { %5916 = vst [vmem:[#allocation7_spill] sm:$0xff] %v5473_v59  ;;  %v5476_v44 = vadd.f32 %v3976_v26, %v1660_v24  ;;  %v1658_v56 = vadd.f32 %v1603_v19, %v5383_v37 }
 0x181   : > { %v3929_v40 = vpop.f32.mrf.mxu1  ;;  %v3977_v21 = vpop.f32.mrf.mxu0 }
 0x182   : > { %5917 = vst [vmem:[#allocation8_spill] sm:$0xff] %v5476_v44  ;;  %v5479_v52 = vadd.f32 %v1872_v49, %v1658_v56  ;;  %v1661_v28 = vadd.f32 %v3929_v40, %v5386_v43 }
 0x183   : > { %v1606_v11 = vpop.f32.mrf.mxu1  ;;  %v1875_v60 = vpop.f32.mrf.mxu0 }
 0x184   : > { %5918 = vst [vmem:[#allocation9_spill] sm:$0xff] %v5479_v52  ;;  %v5482_v42 = vadd.f32 %v3977_v21, %v1661_v28  ;;  %v1659_v54 = vadd.f32 %v1606_v11, %v5389_v38 }
 0x185   : > { %v3932_v23 = vpop.f32.mrf.mxu1  ;;  %v3980_v12 = vpop.f32.mrf.mxu0 }
 0x186   : > { %5919 = vst [vmem:[#allocation10_spill] sm:$0xff] %v5482_v42  ;;  %v5485_v1 = vadd.f32 %v1875_v60, %v1659_v54  ;;  %v1664_v7 = vadd.f32 %v3932_v23, %v5392_v22 }
 0x187   : > { %v1619_v15 = vpop.f32.mrf.mxu1  ;;  %v1888_v37 = vpop.f32.mrf.mxu0 }
 0x188   : > { %5920 = vst [vmem:[#allocation11_spill] sm:$0xff] %v5485_v1  ;;  %v5488_v34 = vadd.f32 %v3980_v12, %v1664_v7  ;;  %v1662_v39 = vadd.f32 %v1619_v15, %v5395_v18 }
 0x189   : > { %v3933_v3 = vpop.f32.mrf.mxu1  ;;  %v3981_v43 = vpop.f32.mrf.mxu0 }
 0x18a   : > { %5921 = vst [vmem:[#allocation12_spill] sm:$0xff] %v5488_v34  ;;  %v5491_v5 = vadd.f32 %v1888_v37, %v1662_v39  ;;  %v1665_v14 = vadd.f32 %v3933_v3, %v5398_v50 }
 0x18b   : > { %v1622_v58 = vpop.f32.mrf.mxu1  ;;  %v1891_v38 = vpop.f32.mrf.mxu0 }
 0x18c   : > { %5922 = vst [vmem:[#allocation13_spill] sm:$0xff] %v5491_v5  ;;  %v5494_v16 = vadd.f32 %v3981_v43, %v1665_v14  ;;  %v1663_v32 = vadd.f32 %v1622_v58, %v5401_v0 }
 0x18d   : > { %v4000_v6 = vpop.f32.mrf.mxu1  ;;  %v5497_v22 = vpop.f32.mrf.mxu0 }
 0x18e   : > { %5923 = vst [vmem:[#allocation14_spill] sm:$0xff] %v5494_v16  ;;  %v5499_v35 = vadd.f32 %v1891_v38, %v1663_v32 }
 0x18f   : > { %v2042_v29 = vpop.f32.mrf.mxu1  ;;  %v5501_v31 = vpop.f32.mrf.mxu0 }
 0x190   : > { %5924 = vst [vmem:[#allocation15_spill] sm:$0xff] %v5499_v35 }
 0x191   : > { %v5503_v18 = vpop.f32.mrf.mxu1  ;;  %v5505_v45 = vpop.f32.mrf.mxu0 }
 0x193   : > { %v5507_v8 = vpop.f32.mrf.mxu1  ;;  %v5509_v50 = vpop.f32.mrf.mxu0 }
 0x195   : > { %v5511_v26 = vpop.f32.mrf.mxu1  ;;  %v5513_v24 = vpop.f32.mrf.mxu0 }
 0x197   : > { %v5515_v0 = vpop.f32.mrf.mxu1  ;;  %v5517_v19 = vpop.f32.mrf.mxu0 }
 0x199   : > { %v5519_v49 = vpop.f32.mrf.mxu1  ;;  %v5521_v56 = vpop.f32.mrf.mxu0 }
 0x19b   : > { %v5523_v40 = vpop.f32.mrf.mxu1  ;;  %v5525_v21 = vpop.f32.mrf.mxu0 }
 0x19d   : > { %v5527_v28 = vpop.f32.mrf.mxu1  ;;  %v5529_v11 = vpop.f32.mrf.mxu0 }
 0x19f   : > { %v5531_v60 = vpop.f32.mrf.mxu1  ;;  %v5533_v54 = vpop.f32.mrf.mxu0 }
 0x1a1   : > { %v5535_v23 = vpop.f32.mrf.mxu1  ;;  %v5537_v12 = vpop.f32.mrf.mxu0 }
 0x1a3   : > { %v5539_v7 = vpop.f32.mrf.mxu1  ;;  %v5541_v15 = vpop.f32.mrf.mxu0 }
 0x1a5   : > { %v5543_v37 = vpop.f32.mrf.mxu1  ;;  %v5545_v39 = vpop.f32.mrf.mxu0 }
 0x1a7   : > { %v5547_v3 = vpop.f32.mrf.mxu1  ;;  %v5549_v43 = vpop.f32.mrf.mxu0 }
 0x1a9   : > { %v5551_v14 = vpop.f32.mrf.mxu1  ;;  %v5553_v58 = vpop.f32.mrf.mxu0 }
 0x1ab   : > { %v5555_v38 = vpop.f32.mrf.mxu1  ;;  %v5557_v32 = vpop.f32.mrf.mxu0 }
 0x1ad   : > { %v5559_v35 = vpop.f32.mrf.mxu1  ;;  %v5561_v16 = vpop.f32.mrf.mxu0 }
 0x1af   : > { %v5563_v5 = vpop.f32.mrf.mxu1  ;;  %v5565_v34 = vpop.f32.mrf.mxu0 }
 0x1b0   : > { %5925 = vst [vmem:[#allocation16_spill] sm:$0xff] %v5565_v34 }
 0x1b1   : > { %v5567_v1 = vpop.f32.mrf.mxu1  ;;  %v5569_v42 = vpop.f32.mrf.mxu0 }
 0x1b2   : > { %5926 = vst [vmem:[#allocation17_spill] sm:$0xff] %v5567_v1  ;;  %5927 = vst [vmem:[#allocation18_spill] sm:$0xff] %v5569_v42 }
 0x1b3   : > { %v5571_v52 = vpop.f32.mrf.mxu1  ;;  %v5573_v44 = vpop.f32.mrf.mxu0 }
 0x1b4   : > { %5928 = vst [vmem:[#allocation19_spill] sm:$0xff] %v5571_v52  ;;  %5929 = vst [vmem:[#allocation20_spill] sm:$0xff] %v5573_v44 }
 0x1b5   : > { %v5575_v59 = vpop.f32.mrf.mxu1  ;;  %v5577_v9 = vpop.f32.mrf.mxu0 }
 0x1b6   : > { %5930 = vst [vmem:[#allocation21_spill] sm:$0xff] %v5575_v59  ;;  %5931 = vst [vmem:[#allocation22_spill] sm:$0xff] %v5577_v9 }
 0x1b7   : > { %v5579_v20 = vpop.f32.mrf.mxu1  ;;  %v5581_v33 = vpop.f32.mrf.mxu0 }
 0x1b8   : > { %5932 = vst [vmem:[#allocation23_spill] sm:$0xff] %v5579_v20  ;;  %5933 = vst [vmem:[#allocation24_spill] sm:$0xff] %v5581_v33 }
 0x1b9   : > { %v5583_v48 = vpop.f32.mrf.mxu1  ;;  %v5585_v63 = vpop.f32.mrf.mxu0 }
 0x1ba   : > { %5934 = vst [vmem:[#allocation25_spill] sm:$0xff] %v5583_v48  ;;  %5935 = vst [vmem:[#allocation26_spill] sm:$0xff] %v5585_v63 }
 0x1bb   : > { %v5587_v34 = vpop.f32.mrf.mxu1  ;;  %v5589_v1 = vpop.f32.mrf.mxu0 }
 0x1bc   : > { %5936 = vst [vmem:[#allocation27_spill] sm:$0xff] %v5587_v34  ;;  %5937 = vst [vmem:[#allocation28_spill] sm:$0xff] %v5589_v1 }
 0x1bd   : > { %v5591_v42 = vpop.f32.mrf.mxu1  ;;  %v5593_v52 = vpop.f32.mrf.mxu0 }
 0x1be   : > { %5938 = vst [vmem:[#allocation29_spill] sm:$0xff] %v5591_v42  ;;  %5939 = vst [vmem:[#allocation30_spill] sm:$0xff] %v5593_v52 }
 0x1bf   : > { %v5595_v44 = vpop.f32.mrf.mxu1  ;;  %v5597_v59 = vpop.f32.mrf.mxu0 }
 0x1c0   : > { %5940 = vst [vmem:[#allocation31_spill] sm:$0xff] %v5595_v44  ;;  %5941 = vst [vmem:[#allocation32_spill] sm:$0xff] %v5597_v59  ;;  %v2171_v44 = vadd.f32 %v4000_v6, %v5404_v17  ;;  %v2170_v6 = vadd.f32 %v5507_v8, %v5413_v51 }
 0x1c1   : > { %v5599_v9 = vpop.f32.mrf.mxu1  ;;  %v5601_v33 = vpop.f32.mrf.mxu0 }
 0x1c2   : > { %5942 = vst [vmem:[#allocation33_spill] sm:$0xff] %v5599_v9  ;;  %5943 = vst [vmem:[#allocation34_spill] sm:$0xff] %v5601_v33  ;;  %v2169_v33 = vadd.f32 %v2042_v29, %v5407_v47  ;;  %v2429_v51 = vadd.f32 %v5509_v50, %v2170_v6 }
 0x1c3   : > { %v5603_v48 = vpop.f32.mrf.mxu1  ;;  %v5605_v63 = vpop.f32.mrf.mxu0 }
 0x1c4   : > { %5944 = vst [vmem:[#allocation35_spill] sm:$0xff] %v5603_v48  ;;  %5945 = vst [vmem:[#allocation36_spill] sm:$0xff] %v5605_v63  ;;  %v2430_v63 = vadd.f32 %v5497_v22, %v2171_v44  ;;  %v2428_v17 = vadd.f32 %v5501_v31, %v2169_v33  ;;  %v2175_v22 = vadd.f32 %v5511_v26, %v5416_v41 }
 0x1c5   : > { %v5607_v34 = vpop.f32.mrf.mxu1  ;;  %v5609_v1 = vpop.f32.mrf.mxu0 }
 0x1c6   : > { %5946 = vst [vmem:[#allocation37_spill] sm:$0xff] %v5609_v1  ;;  %v2172_v1 = vadd.f32 %v5503_v18, %v5410_v46 }
 0x1c7   : > { %v5611_v42 = vpop.f32.mrf.mxu1  ;;  %v5613_v52 = vpop.f32.mrf.mxu0 }
 0x1c8   : > { %5947 = vst [vmem:[#allocation38_spill] sm:$0xff] %v5611_v42  ;;  %5948 = vst [vmem:[#allocation39_spill] sm:$0xff] %v5613_v52  ;;  %v2431_v46 = vadd.f32 %v5505_v45, %v2172_v1  ;;  %v2434_v1 = vadd.f32 %v5513_v24, %v2175_v22  ;;  %v2174_v45 = vadd.f32 %v5523_v40, %v5425_v30 }
 0x1c9   : > { %v5616_v59 = vpop.f32.mrf.mxu1  ;;  %v5618_v9 = vpop.f32.mrf.mxu0  ;;  %v2179_v24 = vadd.f32 %v5527_v28, %v5428_v2 }
 0x1ca   : > { %5949 = vst [vmem:[#allocation40_spill] sm:$0xff] %v5618_v9  ;;  %v2433_v40 = vadd.f32 %v5525_v21, %v2174_v45 }
 0x1cb   : > { %v5621_v20 = vpop.f32.mrf.mxu1  ;;  %v5623_v48 = vpop.f32.mrf.mxu0  ;;  %v2438_v28 = vadd.f32 %v5529_v11, %v2179_v24 }
 0x1cc   : > { %5950 = vst [vmem:[#allocation41_spill] sm:$0xff] %v5621_v20  ;;  %5951 = vst [vmem:[#allocation42_spill] sm:$0xff] %v5623_v48 }
 0x1cd   : > { %v4096_v42 = vpop.f32.mrf.mxu1  ;;  %v4144_v52 = vpop.f32.mrf.mxu0 }
 0x1ce   : > { %v2699_v9 = vadd.f32 %v4096_v42, %v2430_v63  ;;  %v2173_v63 = vadd.f32 %v5515_v0, %v5419_v27 }
 0x1cf   : > { %v2570_v47 = vpop.f32.mrf.mxu1  ;;  %v2836_v44 = vpop.f32.mrf.mxu0 }
 0x1d0   : > { %v2965_v29 = vadd.f32 %v4144_v52, %v2699_v9  ;;  %v2697_v33 = vadd.f32 %v2570_v47, %v2428_v17  ;;  %v2176_v52 = vadd.f32 %v5519_v49, %v5422_v25  ;;  %v2432_v27 = vadd.f32 %v5517_v19, %v2173_v63 }
 0x1d1   : > { %v4097_v31 = vpop.f32.mrf.mxu1  ;;  %v4145_v18 = vpop.f32.mrf.mxu0 }
 0x1d2   : > { %2997 = vst [vmem:[%s5635_s21 + $0x10] sm:$0xff] %v2965_v29  ;;  %v2963_v42 = vadd.f32 %v2836_v44, %v2697_v33  ;;  %v2700_v8 = vadd.f32 %v4097_v31, %v2431_v46  ;;  %v2435_v30 = vadd.f32 %v5521_v56, %v2176_v52  ;;  %v3067_v22 = vmul.f32 %v2965_v29, %v2965_v29 }
 0x1d3   : > { %v2573_v48 = vpop.f32.mrf.mxu1  ;;  %v2839_v20 = vpop.f32.mrf.mxu0 }
 0x1d4   : > { %2995 = vst [vmem:[%s5635_s21] sm:$0xff] %v2963_v42  ;;  %v2966_v41 = vadd.f32 %v4145_v18, %v2700_v8  ;;  %v2698_v9 = vadd.f32 %v2573_v48, %v2429_v51  ;;  %v3065_v6 = vmul.f32 %v2963_v42, %v2963_v42  ;;  %v2177_v18 = vadd.f32 %v5531_v60, %v5431_v55 }
 0x1d5   : > { %v4100_v50 = vpop.f32.mrf.mxu1  ;;  %v4148_v26 = vpop.f32.mrf.mxu0  ;;  %v2180_v51 = vadd.f32 %v5535_v23, %v5434_v13 }
 0x1d6   : > { %2998 = vst [vmem:[%s5635_s21 + $0x18] sm:$0xff] %v2966_v41  ;;  %v2964_v0 = vadd.f32 %v2839_v20, %v2698_v9  ;;  %v2703_v17 = vadd.f32 %v4100_v50, %v2434_v1  ;;  %v3068_v21 = vmul.f32 %v2966_v41, %v2966_v41  ;;  %v2178_v9 = vadd.f32 %v5539_v7, %v5437_v4 }
 0x1d7   : > { %v2586_v47 = vpop.f32.mrf.mxu1  ;;  %v2852_v48 = vpop.f32.mrf.mxu0 }
 0x1d8   : > { %2996 = vst [vmem:[%s5635_s21 + $0x8] sm:$0xff] %v2964_v0  ;;  %v3027_v44 = vadd.f32 %v2964_v0, %v2963_v42  ;;  %v3066_v25 = vmul.f32 %v2964_v0, %v2964_v0  ;;  %v2969_v49 = vadd.f32 %v4148_v26, %v2703_v17  ;;  %v2701_v46 = vadd.f32 %v2586_v47, %v2432_v27 }
 0x1d9   : > { %v4101_v19 = vpop.f32.mrf.mxu1  ;;  %v4149_v20 = vpop.f32.mrf.mxu0  ;;  %v2436_v26 = vadd.f32 %v5533_v54, %v2177_v18  ;;  %v2439_v27 = vadd.f32 %v5537_v12, %v2180_v51  ;;  %v2183_v47 = vadd.f32 %v5543_v37, %v5440_v36 }
 0x1da   : > { %v3028_v33 = vadd.f32 %v3027_v44, %v2965_v29  ;;  %v3097_v31 = vadd.f32 %v3066_v25, %v3065_v6  ;;  %3001 = vst [vmem:[%s5635_s21 + $0x30] sm:$0xff] %v2969_v49  ;;  %v2967_v2 = vadd.f32 %v2852_v48, %v2701_v46  ;;  %v2704_v63 = vadd.f32 %v4101_v19, %v2435_v30 }
 0x1db   : > { %v2589_v56 = vpop.f32.mrf.mxu1  ;;  %v2855_v42 = vpop.f32.mrf.mxu0  ;;  %v2437_v6 = vadd.f32 %v5541_v15, %v2178_v9  ;;  %v2181_v48 = vadd.f32 %v5547_v3, %v5443_v62  ;;  %v3071_v25 = vmul.f32 %v2969_v49, %v2969_v49  ;;  %v2184_v19 = vadd.f32 %v5551_v14, %v5446_v10 }
 0x1dc   : > { %v3098_v8 = vadd.f32 %v3097_v31, %v3067_v22  ;;  %2999 = vst [vmem:[%s5635_s21 + $0x20] sm:$0xff] %v2967_v2  ;;  %v3029_v1 = vadd.f32 %v3028_v33, %v2966_v41  ;;  %v2702_v29 = vadd.f32 %v2589_v56, %v2433_v40  ;;  %v3069_v11 = vmul.f32 %v2967_v2, %v2967_v2 }
 0x1dd   : > { %v2970_v52 = vadd.f32 %v4149_v20, %v2704_v63  ;;  %v4104_v45 = vpop.f32.mrf.mxu1  ;;  %v4152_v55 = vpop.f32.mrf.mxu0  ;;  %v2442_v31 = vadd.f32 %v5545_v39, %v2183_v47  ;;  %v2443_v63 = vadd.f32 %v5553_v58, %v2184_v19  ;;  %v2182_v56 = vadd.f32 %v5555_v38, %v5449_v61 }
 0x1de   : > { %v3030_v60 = vadd.f32 %v3029_v1, %v2967_v2  ;;  %v3099_v50 = vadd.f32 %v3098_v8, %v3068_v21  ;;  %v2968_v13 = vadd.f32 %v2855_v42, %v2702_v29  ;;  %v2707_v23 = vadd.f32 %v4104_v45, %v2438_v28 }
 0x1df   : > { %3002 = vst [vmem:[%s5635_s21 + $0x38] sm:$0xff] %v2970_v52  ;;  %v2602_v0 = vpop.f32.mrf.mxu1  ;;  %v2868_v41 = vpop.f32.mrf.mxu0  ;;  %v3072_v20 = vmul.f32 %v2970_v52, %v2970_v52  ;;  %v2440_v2 = vadd.f32 %v5549_v43, %v2181_v48  ;;  %v2187_v42 = vadd.f32 %v5559_v35, %v5452_v57 }
 0x1e0   : > { %v3100_v17 = vadd.f32 %v3099_v50, %v3069_v11  ;;  %3000 = vst [vmem:[%s5635_s21 + $0x28] sm:$0xff] %v2968_v13  ;;  %v3031_v24 = vadd.f32 %v3030_v60, %v2968_v13  ;;  %v3070_v4 = vmul.f32 %v2968_v13, %v2968_v13  ;;  %v2973_v7 = vadd.f32 %v4152_v55, %v2707_v23  ;;  %v5952_v13 = vld [vmem:[#allocation3_spill] sm:$0xff]  ;;  %v5953_v23 = vld [vmem:[#allocation17_spill] sm:$0xff] }
 0x1e1   : > { %v2705_v54 = vadd.f32 %v2602_v0, %v2436_v26  ;;  %v4105_v44 = vpop.f32.mrf.mxu1  ;;  %v4153_v12 = vpop.f32.mrf.mxu0  ;;  %v2185_v11 = vadd.f32 %v5563_v5, %v5455_v53  ;;  %v2441_v60 = vadd.f32 %v5557_v32, %v2182_v56  ;;  %v2446_v50 = vadd.f32 %v5561_v16, %v2187_v42  ;;  %v5963_v42 = vld [vmem:[#allocation5_spill] sm:$0xff] }
 0x1e2   : > { %v3032_v46 = vadd.f32 %v3031_v24, %v2969_v49  ;;  %v3101_v30 = vadd.f32 %v3100_v17, %v3070_v4  ;;  %3005 = vst [vmem:[%s5635_s21 + $0x50] sm:$0xff] %v2973_v7  ;;  %v2708_v40 = vadd.f32 %v4105_v44, %v2439_v27  ;;  %v2188_v26 = vadd.f32 %v5953_v23, %v5952_v13  ;;  %v5954_v24 = vld [vmem:[#allocation16_spill] sm:$0xff]  ;;  %v5967_v23 = vld [vmem:[#allocation7_spill] sm:$0xff] }
 0x1e3   : > { %v2971_v15 = vadd.f32 %v2868_v41, %v2705_v54  ;;  %v2605_v22 = vpop.f32.mrf.mxu1  ;;  %v2871_v36 = vpop.f32.mrf.mxu0  ;;  %v2444_v4 = vadd.f32 %v5954_v24, %v2185_v11  ;;  %v5965_v11 = vld [vmem:[#allocation22_spill] sm:$0xff] }
 0x1e4   : > { %v3102_v37 = vadd.f32 %v3101_v30, %v3071_v25  ;;  %v3033_v33 = vadd.f32 %v3032_v46, %v2970_v52  ;;  %v2974_v62 = vadd.f32 %v4153_v12, %v2708_v40  ;;  %v2706_v3 = vadd.f32 %v2605_v22, %v2437_v6  ;;  %v5956_v6 = vld [vmem:[#allocation19_spill] sm:$0xff]  ;;  %v5957_v46 = vld [vmem:[#allocation18_spill] sm:$0xff]  ;;  %v5959_v22 = vld [vmem:[#allocation21_spill] sm:$0xff] }
 0x1e5   : > { %3003 = vst [vmem:[%s5635_s21 + $0x40] sm:$0xff] %v2971_v15  ;;  %v4108_v49 = vpop.f32.mrf.mxu1  ;;  %v4156_v28 = vpop.f32.mrf.mxu0  ;;  %v3073_v51 = vmul.f32 %v2971_v15, %v2971_v15  ;;  %v3075_v52 = vmul.f32 %v2973_v7, %v2973_v7  ;;  %v2447_v30 = vadd.f32 %v5957_v46, %v2188_v26  ;;  %v5968_v26 = vld [vmem:[#allocation27_spill] sm:$0xff] }
 0x1e6   : > { %v3034_v18 = vadd.f32 %v3033_v33, %v2971_v15  ;;  %v3103_v10 = vadd.f32 %v3102_v37, %v3072_v20  ;;  %3006 = vst [vmem:[%s5635_s21 + $0x58] sm:$0xff] %v2974_v62  ;;  %v2972_v14 = vadd.f32 %v2871_v36, %v2706_v3  ;;  %v2711_v39 = vadd.f32 %v4108_v49, %v2442_v31  ;;  %v5958_v15 = vld [vmem:[#allocation6_spill] sm:$0xff] }
 0x1e7   : > { %v2618_v21 = vpop.f32.mrf.mxu1  ;;  %v2884_v43 = vpop.f32.mrf.mxu0  ;;  %v3076_v5 = vmul.f32 %v2974_v62, %v2974_v62  ;;  %v2191_v36 = vadd.f32 %v5959_v22, %v5958_v15 }
 0x1e8   : > { %v3104_v8 = vadd.f32 %v3103_v10, %v3073_v51  ;;  %3004 = vst [vmem:[%s5635_s21 + $0x48] sm:$0xff] %v2972_v14  ;;  %v3035_v1 = vadd.f32 %v3034_v18, %v2972_v14  ;;  %v3074_v29 = vmul.f32 %v2972_v14, %v2972_v14  ;;  %v2709_v9 = vadd.f32 %v2618_v21, %v2440_v2  ;;  %v5961_v51 = vld [vmem:[#allocation4_spill] sm:$0xff]  ;;  %v5962_v10 = vld [vmem:[#allocation23_spill] sm:$0xff] }
 0x1e9   : > { %v2977_v58 = vadd.f32 %v4156_v28, %v2711_v39  ;;  %v4109_v45 = vpop.f32.mrf.mxu1  ;;  %v4157_v61 = vpop.f32.mrf.mxu0  ;;  %v5960_v28 = vld [vmem:[#allocation20_spill] sm:$0xff]  ;;  %v2189_v14 = vadd.f32 %v5962_v10, %v5961_v51  ;;  %v5964_v39 = vld [vmem:[#allocation25_spill] sm:$0xff]  ;;  %v5977_v51 = vld [vmem:[#allocation30_spill] sm:$0xff] }
 0x1ea   : > { %v3036_v38 = vadd.f32 %v3035_v1, %v2973_v7  ;;  %v3105_v55 = vadd.f32 %v3104_v8, %v3074_v29  ;;  %v2975_v57 = vadd.f32 %v2884_v43, %v2709_v9  ;;  %v2712_v35 = vadd.f32 %v4109_v45, %v2443_v63  ;;  %v5955_v7 = vld [vmem:[#allocation2_spill] sm:$0xff] }
 0x1eb   : > { %3009 = vst [vmem:[%s5635_s21 + $0x70] sm:$0xff] %v2977_v58  ;;  %v2621_v27 = vpop.f32.mrf.mxu1  ;;  %v2887_v53 = vpop.f32.mrf.mxu0  ;;  %v2186_v47 = vadd.f32 %v5956_v6, %v5955_v7  ;;  %v2192_v21 = vadd.f32 %v5964_v39, %v5963_v42  ;;  %v3079_v43 = vmul.f32 %v2977_v58, %v2977_v58 }
 0x1ec   : > { %v3106_v0 = vadd.f32 %v3105_v55, %v3075_v52  ;;  %3007 = vst [vmem:[%s5635_s21 + $0x60] sm:$0xff] %v2975_v57  ;;  %v3037_v41 = vadd.f32 %v3036_v38, %v2974_v62  ;;  %v2978_v17 = vadd.f32 %v4157_v61, %v2712_v35  ;;  %v2710_v32 = vadd.f32 %v2621_v27, %v2441_v60 }
 0x1ed   : > { %v4112_v16 = vpop.f32.mrf.mxu1  ;;  %v4160_v48 = vpop.f32.mrf.mxu0  ;;  %v3077_v44 = vmul.f32 %v2975_v57, %v2975_v57  ;;  %v2445_v18 = vadd.f32 %v5960_v28, %v2186_v47  ;;  %v2450_v52 = vadd.f32 %v5965_v11, %v2191_v36  ;;  %v2190_v27 = vadd.f32 %v5968_v26, %v5967_v23  ;;  %v5970_v47 = vld [vmem:[#allocation8_spill] sm:$0xff] }
 0x1ee   : > { %v3038_v54 = vadd.f32 %v3037_v41, %v2975_v57  ;;  %v3107_v12 = vadd.f32 %v3106_v0, %v3076_v5  ;;  %3010 = vst [vmem:[%s5635_s21 + $0x78] sm:$0xff] %v2978_v17  ;;  %v2715_v25 = vadd.f32 %v4112_v16, %v2446_v50  ;;  %v2976_v40 = vadd.f32 %v2887_v53, %v2710_v32  ;;  %v5966_v50 = vld [vmem:[#allocation24_spill] sm:$0xff]  ;;  %v5969_v5 = vld [vmem:[#allocation26_spill] sm:$0xff] }
 0x1ef   : > { %v2634_v19 = vpop.f32.mrf.mxu1  ;;  %v2900_v20 = vpop.f32.mrf.mxu0  ;;  %v3080_v38 = vmul.f32 %v2978_v17, %v2978_v17  ;;  %v2448_v13 = vadd.f32 %v5966_v50, %v2189_v14  ;;  %v2451_v0 = vadd.f32 %v5969_v5, %v2192_v21 }
 0x1f0   : > { %v3108_v37 = vadd.f32 %v3107_v12, %v3077_v44  ;;  %v2981_v33 = vadd.f32 %v4160_v48, %v2715_v25  ;;  %v2713_v62 = vadd.f32 %v2634_v19, %v2444_v4  ;;  %3008 = vst [vmem:[%s5635_s21 + $0x68] sm:$0xff] %v2976_v40  ;;  %v3039_v3 = vadd.f32 %v3038_v54, %v2976_v40  ;;  %v5973_v19 = vld [vmem:[#allocation9_spill] sm:$0xff] }
 0x1f1   : > { %v3078_v31 = vmul.f32 %v2976_v40, %v2976_v40  ;;  %v4113_v2 = vpop.f32.mrf.mxu1  ;;  %v4161_v49 = vpop.f32.mrf.mxu0 }
 0x1f2   : > { %3013 = vst [vmem:[%s5635_s21 + $0x90] sm:$0xff] %v2981_v33  ;;  %v2979_v63 = vadd.f32 %v2900_v20, %v2713_v62  ;;  %v2716_v56 = vadd.f32 %v4113_v2, %v2447_v30  ;;  %v3040_v8 = vadd.f32 %v3039_v3, %v2977_v58  ;;  %v5972_v30 = vld [vmem:[#allocation28_spill] sm:$0xff]  ;;  %v5974_v20 = vld [vmem:[#allocation31_spill] sm:$0xff]  ;;  %v5976_v62 = vld [vmem:[#allocation33_spill] sm:$0xff] }
 0x1f3   : > { %v3109_v1 = vadd.f32 %v3108_v37, %v3078_v31  ;;  %v2637_v29 = vpop.f32.mrf.mxu1  ;;  %v2903_v9 = vpop.f32.mrf.mxu0  ;;  %v2449_v40 = vadd.f32 %v5972_v30, %v2190_v27  ;;  %v2193_v15 = vadd.f32 %v5974_v20, %v5973_v19  ;;  %v5975_v37 = vld [vmem:[#allocation10_spill] sm:$0xff]  ;;  %v3083_v31 = vmul.f32 %v2981_v33, %v2981_v33 }
 0x1f4   : > { %3011 = vst [vmem:[%s5635_s21 + $0x80] sm:$0xff] %v2979_v63  ;;  %v2982_v45 = vadd.f32 %v4161_v49, %v2716_v56  ;;  %v2714_v61 = vadd.f32 %v2637_v29, %v2445_v18  ;;  %v3041_v57 = vadd.f32 %v3040_v8, %v2978_v17  ;;  %v3081_v24 = vmul.f32 %v2979_v63, %v2979_v63  ;;  %v5971_v17 = vld [vmem:[#allocation29_spill] sm:$0xff]  ;;  %v5978_v8 = vld [vmem:[#allocation32_spill] sm:$0xff]  ;;  %v5979_v29 = vld [vmem:[#allocation11_spill] sm:$0xff] }
 0x1f5   : > { %v3110_v55 = vadd.f32 %v3109_v1, %v3079_v43  ;;  %v4116_v35 = vpop.f32.mrf.mxu1  ;;  %v4164_v60 = vpop.f32.mrf.mxu0  ;;  %v2195_v32 = vadd.f32 %v5971_v17, %v5970_v47  ;;  %v2196_v3 = vadd.f32 %v5976_v62, %v5975_v37  ;;  %v2452_v1 = vadd.f32 %v5978_v8, %v2193_v15  ;;  %v5988_v62 = vld [vmem:[#allocation39_spill] sm:$0xff] }
 0x1f6   : > { %3014 = vst [vmem:[%s5635_s21 + $0x98] sm:$0xff] %v2982_v45  ;;  %v2980_v58 = vadd.f32 %v2903_v9, %v2714_v61  ;;  %v2719_v53 = vadd.f32 %v4116_v35, %v2450_v52  ;;  %v3042_v41 = vadd.f32 %v3041_v57, %v2979_v63  ;;  %v3084_v56 = vmul.f32 %v2982_v45, %v2982_v45  ;;  %v5980_v9 = vld [vmem:[#allocation35_spill] sm:$0xff]  ;;  %v5981_v61 = vld [vmem:[#allocation34_spill] sm:$0xff] }
 0x1f7   : > { %v3111_v4 = vadd.f32 %v3110_v55, %v3080_v38  ;;  %v2650_v7 = vpop.f32.mrf.mxu1  ;;  %v2916_v6 = vpop.f32.mrf.mxu0  ;;  %v2454_v10 = vadd.f32 %v5977_v51, %v2195_v32  ;;  %v2194_v11 = vadd.f32 %v5980_v9, %v5979_v29  ;;  %v2455_v38 = vadd.f32 %v5981_v61, %v2196_v3  ;;  %v5989_v3 = vld [vmem:[#allocation15_spill] sm:$0xff]  ;;  %v5992_v9 = vld [vmem:[#allocation42_spill] sm:$0xff] }
 0x1f8   : > { %3012 = vst [vmem:[%s5635_s21 + $0x88] sm:$0xff] %v2980_v58  ;;  %v3082_v16 = vmul.f32 %v2980_v58, %v2980_v58  ;;  %v2985_v48 = vadd.f32 %v4164_v60, %v2719_v53  ;;  %v2717_v54 = vadd.f32 %v2650_v7, %v2448_v13  ;;  %v3043_v12 = vadd.f32 %v3042_v41, %v2980_v58  ;;  %v5982_v13 = vld [vmem:[#allocation12_spill] sm:$0xff]  ;;  %v5985_v7 = vld [vmem:[#allocation38_spill] sm:$0xff] }
 0x1f9   : > { %v3112_v44 = vadd.f32 %v3111_v4, %v3081_v24  ;;  %v4117_v25 = vpop.f32.mrf.mxu1  ;;  %v4165_v46 = vpop.f32.mrf.mxu0  ;;  %v5983_v41 = vld [vmem:[#allocation36_spill] sm:$0xff]  ;;  %v5984_v4 = vld [vmem:[#allocation13_spill] sm:$0xff] }
 0x1fa   : > { %3017 = vst [vmem:[%s5635_s21 + $0xb0] sm:$0xff] %v2985_v48  ;;  %v2983_v22 = vadd.f32 %v2916_v6, %v2717_v54  ;;  %v2720_v36 = vadd.f32 %v4117_v25, %v2451_v0  ;;  %v3044_v2 = vadd.f32 %v3043_v12, %v2981_v33  ;;  %v2453_v24 = vadd.f32 %v5983_v41, %v2194_v11  ;;  %v5986_v12 = vld [vmem:[#allocation37_spill] sm:$0xff] }
 0x1fb   : > { %v3113_v49 = vadd.f32 %v3112_v44, %v3082_v16  ;;  %v2653_v28 = vpop.f32.mrf.mxu1  ;;  %v2919_v18 = vpop.f32.mrf.mxu0  ;;  %v2197_v6 = vadd.f32 %v5985_v7, %v5984_v4  ;;  %v3087_v32 = vmul.f32 %v2985_v48, %v2985_v48 }
 0x1fc   : > { %3015 = vst [vmem:[%s5635_s21 + $0xa0] sm:$0xff] %v2983_v22  ;;  %v2986_v14 = vadd.f32 %v4165_v46, %v2720_v36  ;;  %v2718_v63 = vadd.f32 %v2653_v28, %v2449_v40  ;;  %v3045_v39 = vadd.f32 %v3044_v2, %v2982_v45  ;;  %v3085_v57 = vmul.f32 %v2983_v22, %v2983_v22  ;;  %v5987_v46 = vld [vmem:[#allocation14_spill] sm:$0xff] }
 0x1fd   : > { %v3114_v42 = vadd.f32 %v3113_v49, %v3083_v31  ;;  %v4120_v21 = vpop.f32.mrf.mxu1  ;;  %v4168_v43 = vpop.f32.mrf.mxu0  ;;  %v2199_v45 = vadd.f32 %v5607_v34, %v5982_v13  ;;  %v2200_v30 = vadd.f32 %v5616_v59, %v5987_v46  ;;  %v5990_v31 = vld [vmem:[#allocation41_spill] sm:$0xff] }
 0x1fe   : > { %3018 = vst [vmem:[%s5635_s21 + $0xb8] sm:$0xff] %v2986_v14  ;;  %v2984_v33 = vadd.f32 %v2919_v18, %v2718_v63  ;;  %v2723_v52 = vadd.f32 %v4120_v21, %v2454_v10  ;;  %v3046_v55 = vadd.f32 %v3045_v39, %v2983_v22  ;;  %v3088_v20 = vmul.f32 %v2986_v14, %v2986_v14 }
 0x1ff   : > { %v3115_v35 = vadd.f32 %v3114_v42, %v3084_v56  ;;  %v2666_v60 = vpop.f32.mrf.mxu1  ;;  %v2932_v50 = vpop.f32.mrf.mxu0  ;;  %v2458_v25 = vadd.f32 %v5986_v12, %v2199_v45  ;;  %v2198_v2 = vadd.f32 %v5990_v31, %v5989_v3  ;;  %v5991_v56 = vld [vmem:[#allocation40_spill] sm:$0xff] }
 0x200   : > { %3016 = vst [vmem:[%s5635_s21 + $0xa8] sm:$0xff] %v2984_v33  ;;  %v3086_v23 = vmul.f32 %v2984_v33, %v2984_v33  ;;  %v2989_v26 = vadd.f32 %v4168_v43, %v2723_v52  ;;  %v2721_v27 = vadd.f32 %v2666_v60, %v2452_v1  ;;  %v3047_v53 = vadd.f32 %v3046_v55, %v2984_v33 }
 0x201   : > { %v3116_v58 = vadd.f32 %v3115_v35, %v3085_v57  ;;  %v4121_v5 = vpop.f32.mrf.mxu1  ;;  %v4169_v0 = vpop.f32.mrf.mxu0  ;;  %v2459_v42 = vadd.f32 %v5991_v56, %v2200_v30  ;;  %v2457_v11 = vadd.f32 %v5992_v9, %v2198_v2 }
 0x202   : > { %3021 = vst [vmem:[%s5635_s21 + $0xd0] sm:$0xff] %v2989_v26  ;;  %v2987_v47 = vadd.f32 %v2932_v50, %v2721_v27  ;;  %v2724_v17 = vadd.f32 %v4121_v5, %v2455_v38  ;;  %v3048_v16 = vadd.f32 %v3047_v53, %v2985_v48  ;;  %v2456_v48 = vadd.f32 %v5988_v62, %v2197_v6 }
 0x203   : > { %v3117_v34 = vadd.f32 %v3116_v58, %v3086_v23  ;;  %v2669_v54 = vpop.f32.mrf.mxu1  ;;  %v2935_v44 = vpop.f32.mrf.mxu0  ;;  %v3091_v61 = vmul.f32 %v2989_v26, %v2989_v26 }
 0x204   : > { %3019 = vst [vmem:[%s5635_s21 + $0xc0] sm:$0xff] %v2987_v47  ;;  %v2990_v40 = vadd.f32 %v4169_v0, %v2724_v17  ;;  %v2722_v19 = vadd.f32 %v2669_v54, %v2453_v24  ;;  %v3049_v22 = vadd.f32 %v3048_v16, %v2986_v14  ;;  %v3089_v59 = vmul.f32 %v2987_v47, %v2987_v47 }
 0x205   : > { %v3118_v15 = vadd.f32 %v3117_v34, %v3087_v32  ;;  %v4124_v36 = vpop.f32.mrf.mxu1  ;;  %v4172_v37 = vpop.f32.mrf.mxu0 }
 0x206   : > { %3022 = vst [vmem:[%s5635_s21 + $0xd8] sm:$0xff] %v2990_v40  ;;  %v2988_v49 = vadd.f32 %v2935_v44, %v2722_v19  ;;  %v2727_v28 = vadd.f32 %v4124_v36, %v2458_v25  ;;  %v3050_v18 = vadd.f32 %v3049_v22, %v2987_v47  ;;  %v3092_v50 = vmul.f32 %v2990_v40, %v2990_v40 }
 0x207   : > { %v3119_v51 = vadd.f32 %v3118_v15, %v3088_v20  ;;  %v2682_v10 = vpop.f32.mrf.mxu1  ;;  %v2948_v63 = vpop.f32.mrf.mxu0 }
 0x208   : > { %3020 = vst [vmem:[%s5635_s21 + $0xc8] sm:$0xff] %v2988_v49  ;;  %v3090_v14 = vmul.f32 %v2988_v49, %v2988_v49  ;;  %v2993_v39 = vadd.f32 %v4172_v37, %v2727_v28  ;;  %v2725_v21 = vadd.f32 %v2682_v10, %v2456_v48  ;;  %v3051_v8 = vadd.f32 %v3050_v18, %v2988_v49 }
 0x209   : > { %v3120_v43 = vadd.f32 %v3119_v51, %v3089_v59  ;;  %v4125_v1 = vpop.f32.mrf.mxu1  ;;  %v4173_v29 = vpop.f32.mrf.mxu0 }
 0x20a   : > { %3025 = vst [vmem:[%s5635_s21 + $0xf0] sm:$0xff] %v2993_v39  ;;  %v2991_v33 = vadd.f32 %v2948_v63, %v2725_v21  ;;  %v2728_v52 = vadd.f32 %v4125_v1, %v2459_v42  ;;  %v3052_v38 = vadd.f32 %v3051_v8, %v2989_v26  ;;  %v3095_v4 = vmul.f32 %v2993_v39, %v2993_v39 }
 0x20b   : > { %v3121_v55 = vadd.f32 %v3120_v43, %v3090_v14  ;;  %v2685_v57 = vpop.f32.mrf.mxu1  ;;  %v2951_v23 = vpop.f32.mrf.mxu0 }
 0x20c   : > { %3023 = vst [vmem:[%s5635_s21 + $0xe0] sm:$0xff] %v2991_v33  ;;  %v2994_v35 = vadd.f32 %v4173_v29, %v2728_v52  ;;  %v2726_v60 = vadd.f32 %v2685_v57, %v2457_v11  ;;  %v3053_v45 = vadd.f32 %v3052_v38, %v2990_v40  ;;  %v3093_v53 = vmul.f32 %v2991_v33, %v2991_v33 }
 0x20d   : > { %v3122_v13 = vadd.f32 %v3121_v55, %v3091_v61 }
 0x20e   : > { %3026 = vst [vmem:[%s5635_s21 + $0xf8] sm:$0xff] %v2994_v35  ;;  %v2992_v27 = vadd.f32 %v2951_v23, %v2726_v60  ;;  %v3054_v58 = vadd.f32 %v3053_v45, %v2991_v33  ;;  %v3096_v6 = vmul.f32 %v2994_v35, %v2994_v35 }
 0x20f   : > { %v3123_v5 = vadd.f32 %v3122_v13, %v3092_v50 }
 0x210   : > { %3024 = vst [vmem:[%s5635_s21 + $0xe8] sm:$0xff] %v2992_v27  ;;  %v3094_v0 = vmul.f32 %v2992_v27, %v2992_v27  ;;  %v3055_v24 = vadd.f32 %v3054_v58, %v2992_v27 }
 0x211   : > { %v3124_v41 = vadd.f32 %v3123_v5, %v3093_v53 }
 0x212   : > { %v3056_v26 = vadd.f32 %v3055_v24, %v2993_v39 }
 0x213   : > { %v3125_v7 = vadd.f32 %v3124_v41, %v3094_v0 }
 0x214   : > { %v3057_v47 = vadd.f32 %v3056_v26, %v2994_v35 }
 0x215   : > { %v3126_v17 = vadd.f32 %v3125_v7, %v3095_v4 }
 0x216   : > { %v3058_v32 = vrot.slane %v3057_v47, 4 }
 0x217   : > { %v3127_v16 = vadd.f32 %v3126_v17, %v3096_v6 }
 0x218   : > { %v3059_v34 = vadd.f32 %v3058_v32, %v3057_v47 }
 0x219   : > { %v3128_v54 = vrot.slane %v3127_v16, 4 }
 0x21a   : > { %v3060_v44 = vrot.slane %v3059_v34, 2 }
 0x21b   : > { %v3129_v12 = vadd.f32 %v3128_v54, %v3127_v16 }
 0x21c   : > { %v3061_v25 = vadd.f32 %v3060_v44, %v3059_v34 }
 0x21d   : > { %v3130_v46 = vrot.slane %v3129_v12, 2 }
 0x21e   : > { %v3062_v30 = vrot.slane %v3061_v25, 1 }
 0x21f   : > { %v3131_v40 = vadd.f32 %v3130_v46, %v3129_v12 }
 0x220   : > { %v3063_v19 = vadd.f32 %v3062_v30, %v3061_v25 }
 0x221   : > { %v3132_v20 = vrot.slane %v3131_v40, 1 }
 0x222   : > { %3064 = vst [vmem:[%s260_s24] sm:$0x1] %v3063_v19 }
 0x223   : > { %v3133_v15 = vadd.f32 %v3132_v20, %v3131_v40 }
 0x225   : > { %3134 = vst [vmem:[%s266_s27] sm:$0x1] %v3133_v15 }
 0x226 PF: > { %s15_s17 = sadd.s32 1, %s4347_s17   ;;  %s5993_s15 = smov %s4343_s16 }
 0x227   : > { %p12_p5 = scmp.ge.s32.totalorder %s15_s17, 4   ;;  %s5994_s16 = smov %s5996_s18 }
 0x229   :  { %14 = sbr.rel (!%p12_p5) target bundleno = 2 (0x2), region = 90 }

</bundles_post_ra>
